<compile_context>
chip_gen: v6e
topology: v6e:2x2x1
jax: 0.10.0
libtpu: 0.0.40
codegen_flags: <defaults>
</compile_context>

<pallas_src>
import functools

import jax
import jax.numpy as jnp
from jax import lax
from jax.experimental import pallas as pl
from jax.experimental.pallas import tpu as pltpu

HEAD_PAD = 128  # fused head width: 3 rgb + 1 radiance + 124 zero lanes


def nerf_kernel(x_ref,
                w1_ref, b1_ref,
                w2_ref, b2_ref,
                w3_ref, b3_ref,
                w4_ref, b4_ref,
                wh_ref, bh_ref,
                o_ref, *, act_dtype):
    # bf16 operands on the MXU, f32 accumulation.
    dot = lambda a, b: jnp.dot(a, b, preferred_element_type=jnp.float32)

    def layer(h, w_ref, b_ref):
        acc = dot(h, w_ref[...]).astype(act_dtype) + b_ref[...]
        return jnp.maximum(acc, 0).astype(jnp.bfloat16)

    h = x_ref[...].astype(jnp.bfloat16)
    h = layer(h, w1_ref, b1_ref)
    h = layer(h, w2_ref, b2_ref)
    h = layer(h, w3_ref, b3_ref)
    h = layer(h, w4_ref, b4_ref)

    # Fused heads: lanes 0..2 -> rgb (sigmoid), lane 3 -> radiance (linear),
    # lanes 4..127 -> zero padding (discarded outside).  Epilogue stays f32.
    out = dot(h, wh_ref[...]) + bh_ref[...]
    lane = lax.broadcasted_iota(jnp.int32, out.shape, dimension=1)
    out = jnp.where(lane < 3, jax.nn.sigmoid(out), out)
    o_ref[...] = out.astype(o_ref.dtype)


def _round_up(x, m):
    return (x + m - 1) // m * m


def _default_act_is_bf16():
    """bf16 elementwise only where the VPU supports it (v6e / v7x)."""
    try:
        kind = jax.devices()[0].device_kind.lower()
    except Exception:
        return False
    return ("v6" in kind) or ("v7" in kind)


@functools.partial(jax.jit, static_argnames=("tile_m", "act_is_bf16"))
def _nerf_forward_padded(x, prep, *, tile_m, act_is_bf16):
    n, in_dim = x.shape
    w1, b1, w2, b2, w3, b3, w4, b4, wh, bh = prep
    layer_size = w1.shape[1]
    act_dtype = jnp.bfloat16 if act_is_bf16 else jnp.float32

    grid = pl.cdiv(n, tile_m)
    full = lambda shape: pl.BlockSpec(shape, lambda i: (0, 0))

    weight_elems = (in_dim * layer_size
                    + 3 * layer_size * layer_size
                    + layer_size * HEAD_PAD)
    cost = pl.CostEstimate(
        flops=2 * grid * tile_m * weight_elems,
        transcendentals=2 * 3 * grid * tile_m,            # sigmoid ~ exp + recip
        bytes_accessed=(n * in_dim * 4                    # f32 x read
                        + weight_elems * 2                # bf16 resident weights
                        + (4 * layer_size + HEAD_PAD) * 4  # biases
                        + n * HEAD_PAD * 2))               # bf16 output write

    kernel = functools.partial(nerf_kernel, act_dtype=act_dtype)
    out = pl.pallas_call(
        kernel,
        out_shape=jax.ShapeDtypeStruct((n, HEAD_PAD), jnp.bfloat16),
        grid_spec=pltpu.PrefetchScalarGridSpec(
            num_scalar_prefetch=0,
            grid=(grid,),
            in_specs=[
                pl.BlockSpec((tile_m, in_dim), lambda i: (i, 0)),        # x tile (f32)
                full((in_dim, layer_size)), full((1, layer_size)),       # layer1
                full((layer_size, layer_size)), full((1, layer_size)),   # layer2
                full((layer_size, layer_size)), full((1, layer_size)),   # layer3
                full((layer_size, layer_size)), full((1, layer_size)),   # layer4
                full((layer_size, HEAD_PAD)), full((1, HEAD_PAD)),       # fused heads
            ],
            out_specs=pl.BlockSpec((tile_m, HEAD_PAD), lambda i: (i, 0)),
        ),
        compiler_params=pltpu.CompilerParams(
            dimension_semantics=("parallel",),
            vmem_limit_bytes=48 * 1024 * 1024),
        cost_estimate=cost,
    )(x, w1, b1, w2, b2, w3, b3, w4, b4, wh, bh)
    return out


def nerf_forward(x, prepared_params, *, tile_m=4096, act_is_bf16=None):
    """x: (N, 3 + 6*num_fourier_features) f32.  Returns (N, 4) f32
    = concat([sigmoid(rgb), radiance], -1), same semantics as NeRfModel."""
    if act_is_bf16 is None:
        act_is_bf16 = _default_act_is_bf16()
    n = x.shape[0]
    # Keep >= 2 grid steps so both v7x TensorCores get work on the parallel axis.
    tile_m = int(min(tile_m, max(8, _round_up(pl.cdiv(n, 2), 8))))
    out = _nerf_forward_padded(x, prepared_params,
                               tile_m=tile_m, act_is_bf16=bool(act_is_bf16))
    return out[:n, :4].astype(jnp.float32)


def prepare_params(params, act_is_bf16):
    """One-time weight prep: bf16 weights, head zero-padded to HEAD_PAD lanes,
    biases in the elementwise dtype (head bias stays f32)."""
    (w1, b1), (w2, b2), (w3, b3), (w4, b4), (wh, bh) = params
    bias_dt = jnp.bfloat16 if act_is_bf16 else jnp.float32
    bf = lambda a: a.astype(jnp.bfloat16)
    wh_p = jnp.pad(wh, ((0, 0), (0, HEAD_PAD - wh.shape[1])))
    bh_p = jnp.pad(bh, ((0, 0), (0, HEAD_PAD - bh.shape[1])))
    return (bf(w1), b1.astype(bias_dt),
            bf(w2), b2.astype(bias_dt),
            bf(w3), b3.astype(bias_dt),
            bf(w4), b4.astype(bias_dt),
            bf(wh_p), bh_p.astype(jnp.float32))


def init_params(key, in_dim, layer_size):
    """Deterministic synthetic weights (shapes match NeRfModel.__init__),
    stored as x @ W + b with W of shape (in_features, out_features)."""
    def linear(k, fan_in, fan_out):
        kw, kb = jax.random.split(k)
        scale = 1.0 / jnp.sqrt(fan_in)
        w = jax.random.uniform(kw, (fan_in, fan_out), jnp.float32, -scale, scale)
        b = jax.random.uniform(kb, (1, fan_out), jnp.float32, -scale, scale)
        return w, b

    keys = jax.random.split(key, 6)
    w1, b1 = linear(keys[0], in_dim, layer_size)
    w2, b2 = linear(keys[1], layer_size, layer_size)
    w3, b3 = linear(keys[2], layer_size, layer_size)
    w4, b4 = linear(keys[3], layer_size, layer_size)
    w_rgb, b_rgb = linear(keys[4], layer_size, 3)
    w_rad, b_rad = linear(keys[5], layer_size, 1)
    # Fuse rgb + radiance heads into one (layer_size, 4) matmul.
    wh = jnp.concatenate([w_rgb, w_rad], axis=1)
    bh = jnp.concatenate([b_rgb, b_rad], axis=1)
    return (w1, b1), (w2, b2), (w3, b3), (w4, b4), (wh, bh)


def nerf_forward_ref_f32(x, params):
    """Pure f32 reference (module semantics)."""
    (w1, b1), (w2, b2), (w3, b3), (w4, b4), (wh, bh) = params
    h = jnp.maximum(x @ w1 + b1, 0.0)
    h = jnp.maximum(h @ w2 + b2, 0.0)
    h = jnp.maximum(h @ w3 + b3, 0.0)
    h = jnp.maximum(h @ w4 + b4, 0.0)
    out = h @ wh + bh
    return jnp.concatenate([jax.nn.sigmoid(out[:, :3]), out[:, 3:]], axis=-1)


def nerf_forward_ref_mirror(x, params, act_is_bf16):
    """Reference mirroring kernel numerics: bf16 MXU operands / f32 accumulate,
    elementwise in act dtype, bf16 final store."""
    (w1, b1), (w2, b2), (w3, b3), (w4, b4), (wh, bh) = params
    act = jnp.bfloat16 if act_is_bf16 else jnp.float32
    bf = lambda a: a.astype(jnp.bfloat16)
    dot = lambda a, b: jnp.dot(bf(a), bf(b), preferred_element_type=jnp.float32)

    def layer(h, w, b):
        return jnp.maximum(dot(h, w).astype(act) + b.astype(act), 0)

    h = layer(x, w1, b1)
    h = layer(h, w2, b2)
    h = layer(h, w3, b3)
    h = layer(h, w4, b4)
    out = dot(h, wh) + bh
    out = jnp.concatenate([jax.nn.sigmoid(out[:, :3]), out[:, 3:]], axis=-1)
    return out.astype(jnp.bfloat16).astype(jnp.float32)


if __name__ == "__main__":
    # Shapes consistent with the module:
    #   num_fourier_features = 4 -> in_dim = 3 + 6*4 = 27
    #   layer_size = 128, batch N = 2048 (tile_m clamps to 1024 -> 2 parallel steps)
    num_fourier_features = 4
    in_dim = 3 + 6 * num_fourier_features
    layer_size = 128
    n = 2048

    key = jax.random.PRNGKey(0)
    kx, kp = jax.random.split(key)
    x = jax.random.normal(kx, (n, in_dim), jnp.float32)
    params = init_params(kp, in_dim, layer_size)

    act_is_bf16 = _default_act_is_bf16()
    prep = prepare_params(params, act_is_bf16)

    out = nerf_forward(x, prep, tile_m=4096, act_is_bf16=act_is_bf16)
    out = jax.block_until_ready(out)
    assert out.shape == (n, 4)

    # Tight check vs. a reference with the same bf16/f32 numerics as the kernel.
    ref_mirror = nerf_forward_ref_mirror(x, params, act_is_bf16)
    assert jnp.allclose(out, ref_mirror, atol=1e-2, rtol=1e-2), \
        "mismatch vs mirrored JAX reference"

    # Loose sanity check vs. the pure f32 module semantics.
    ref_f32 = nerf_forward_ref_f32(x, params)
    assert jnp.allclose(out, ref_f32, atol=8e-2, rtol=8e-2), \
        "mismatch vs f32 JAX reference"

    print("KERNEL_OK")
</pallas_src>

<mosaic_0001>
module attributes {stable_mosaic.version = 11 : i64} {
  func.func @nerf_kernel(%arg0: i32, %arg1: memref<1024x27xf32, #tpu.memory_space<vmem>>, %arg2: memref<27x128xbf16, #tpu.memory_space<vmem>>, %arg3: memref<1x128xf32, #tpu.memory_space<vmem>>, %arg4: memref<128x128xbf16, #tpu.memory_space<vmem>>, %arg5: memref<1x128xf32, #tpu.memory_space<vmem>>, %arg6: memref<128x128xbf16, #tpu.memory_space<vmem>>, %arg7: memref<1x128xf32, #tpu.memory_space<vmem>>, %arg8: memref<128x128xbf16, #tpu.memory_space<vmem>>, %arg9: memref<1x128xf32, #tpu.memory_space<vmem>>, %arg10: memref<128x128xbf16, #tpu.memory_space<vmem>>, %arg11: memref<1x128xf32, #tpu.memory_space<vmem>>, %arg12: memref<1024x128xbf16, #tpu.memory_space<vmem>>) attributes {dimension_semantics = [#tpu.dimension_semantics<parallel>], iteration_bounds = array<i64: 2>, scalar_prefetch = 0 : i64, scratch_operands = 0 : i64, tpu.core_type = #tpu.core_type<tc>, window_params = [{transform_indices = @transform_0, window_bounds = array<i64: 1024, 27>}, {pipeline_mode = #tpu.pipeline_mode<synchronous>, transform_indices = @transform_1, window_bounds = array<i64: 27, 128>}, {pipeline_mode = #tpu.pipeline_mode<synchronous>, transform_indices = @transform_2, window_bounds = array<i64: 1, 128>}, {pipeline_mode = #tpu.pipeline_mode<synchronous>, transform_indices = @transform_3, window_bounds = array<i64: 128, 128>}, {pipeline_mode = #tpu.pipeline_mode<synchronous>, transform_indices = @transform_4, window_bounds = array<i64: 1, 128>}, {pipeline_mode = #tpu.pipeline_mode<synchronous>, transform_indices = @transform_5, window_bounds = array<i64: 128, 128>}, {pipeline_mode = #tpu.pipeline_mode<synchronous>, transform_indices = @transform_6, window_bounds = array<i64: 1, 128>}, {pipeline_mode = #tpu.pipeline_mode<synchronous>, transform_indices = @transform_7, window_bounds = array<i64: 128, 128>}, {pipeline_mode = #tpu.pipeline_mode<synchronous>, transform_indices = @transform_8, window_bounds = array<i64: 1, 128>}, {pipeline_mode = #tpu.pipeline_mode<synchronous>, transform_indices = @transform_9, window_bounds = array<i64: 128, 128>}, {pipeline_mode = #tpu.pipeline_mode<synchronous>, transform_indices = @transform_10, window_bounds = array<i64: 1, 128>}, {transform_indices = @transform_11, window_bounds = array<i64: 1024, 128>}]} {
    %c0 = arith.constant 0 : index
    %c0_0 = arith.constant 0 : index
    %0 = vector.load %arg1[%c0, %c0_0] : memref<1024x27xf32, #tpu.memory_space<vmem>>, vector<1024x27xf32>
    %1 = arith.truncf %0 : vector<1024x27xf32> to vector<1024x27xbf16>
    %c0_1 = arith.constant 0 : index
    %c0_2 = arith.constant 0 : index
    %2 = vector.load %arg2[%c0_1, %c0_2] : memref<27x128xbf16, #tpu.memory_space<vmem>>, vector<27x128xbf16>
    %cst = arith.constant dense<0.000000e+00> : vector<1024x128xf32>
    %3 = tpu.matmul %1, %2, %cst {dimension_numbers = #tpu.dot_dimension_numbers<[1], [0], [0], [1], [0, 0, 1, 1], [], []>} : vector<1024x27xbf16>, vector<27x128xbf16>, vector<1024x128xf32> -> vector<1024x128xf32>
    %c0_3 = arith.constant 0 : index
    %c0_4 = arith.constant 0 : index
    %4 = vector.load %arg3[%c0_3, %c0_4] : memref<1x128xf32, #tpu.memory_space<vmem>>, vector<1x128xf32>
    %5 = vector.broadcast %4 : vector<1x128xf32> to vector<1024x128xf32>
    %6 = arith.addf %3, %5 : vector<1024x128xf32>
    %cst_5 = arith.constant 0.000000e+00 : f32
    %7 = vector.broadcast %cst_5 : f32 to vector<1024x128xf32>
    %8 = arith.maximumf %6, %7 : vector<1024x128xf32>
    %9 = arith.truncf %8 : vector<1024x128xf32> to vector<1024x128xbf16>
    %c0_6 = arith.constant 0 : index
    %c0_7 = arith.constant 0 : index
    %10 = vector.load %arg4[%c0_6, %c0_7] : memref<128x128xbf16, #tpu.memory_space<vmem>>, vector<128x128xbf16>
    %cst_8 = arith.constant dense<0.000000e+00> : vector<1024x128xf32>
    %11 = tpu.matmul %9, %10, %cst_8 {dimension_numbers = #tpu.dot_dimension_numbers<[1], [0], [0], [1], [0, 0, 1, 1], [], []>} : vector<1024x128xbf16>, vector<128x128xbf16>, vector<1024x128xf32> -> vector<1024x128xf32>
    %c0_9 = arith.constant 0 : index
    %c0_10 = arith.constant 0 : index
    %12 = vector.load %arg5[%c0_9, %c0_10] : memref<1x128xf32, #tpu.memory_space<vmem>>, vector<1x128xf32>
    %13 = vector.broadcast %12 : vector<1x128xf32> to vector<1024x128xf32>
    %14 = arith.addf %11, %13 : vector<1024x128xf32>
    %cst_11 = arith.constant 0.000000e+00 : f32
    %15 = vector.broadcast %cst_11 : f32 to vector<1024x128xf32>
    %16 = arith.maximumf %14, %15 : vector<1024x128xf32>
    %17 = arith.truncf %16 : vector<1024x128xf32> to vector<1024x128xbf16>
    %c0_12 = arith.constant 0 : index
    %c0_13 = arith.constant 0 : index
    %18 = vector.load %arg6[%c0_12, %c0_13] : memref<128x128xbf16, #tpu.memory_space<vmem>>, vector<128x128xbf16>
    %cst_14 = arith.constant dense<0.000000e+00> : vector<1024x128xf32>
    %19 = tpu.matmul %17, %18, %cst_14 {dimension_numbers = #tpu.dot_dimension_numbers<[1], [0], [0], [1], [0, 0, 1, 1], [], []>} : vector<1024x128xbf16>, vector<128x128xbf16>, vector<1024x128xf32> -> vector<1024x128xf32>
    %c0_15 = arith.constant 0 : index
    %c0_16 = arith.constant 0 : index
    %20 = vector.load %arg7[%c0_15, %c0_16] : memref<1x128xf32, #tpu.memory_space<vmem>>, vector<1x128xf32>
    %21 = vector.broadcast %20 : vector<1x128xf32> to vector<1024x128xf32>
    %22 = arith.addf %19, %21 : vector<1024x128xf32>
    %cst_17 = arith.constant 0.000000e+00 : f32
    %23 = vector.broadcast %cst_17 : f32 to vector<1024x128xf32>
    %24 = arith.maximumf %22, %23 : vector<1024x128xf32>
    %25 = arith.truncf %24 : vector<1024x128xf32> to vector<1024x128xbf16>
    %c0_18 = arith.constant 0 : index
    %c0_19 = arith.constant 0 : index
    %26 = vector.load %arg8[%c0_18, %c0_19] : memref<128x128xbf16, #tpu.memory_space<vmem>>, vector<128x128xbf16>
    %cst_20 = arith.constant dense<0.000000e+00> : vector<1024x128xf32>
    %27 = tpu.matmul %25, %26, %cst_20 {dimension_numbers = #tpu.dot_dimension_numbers<[1], [0], [0], [1], [0, 0, 1, 1], [], []>} : vector<1024x128xbf16>, vector<128x128xbf16>, vector<1024x128xf32> -> vector<1024x128xf32>
    %c0_21 = arith.constant 0 : index
    %c0_22 = arith.constant 0 : index
    %28 = vector.load %arg9[%c0_21, %c0_22] : memref<1x128xf32, #tpu.memory_space<vmem>>, vector<1x128xf32>
    %29 = vector.broadcast %28 : vector<1x128xf32> to vector<1024x128xf32>
    %30 = arith.addf %27, %29 : vector<1024x128xf32>
    %cst_23 = arith.constant 0.000000e+00 : f32
    %31 = vector.broadcast %cst_23 : f32 to vector<1024x128xf32>
    %32 = arith.maximumf %30, %31 : vector<1024x128xf32>
    %33 = arith.truncf %32 : vector<1024x128xf32> to vector<1024x128xbf16>
    %c0_24 = arith.constant 0 : index
    %c0_25 = arith.constant 0 : index
    %34 = vector.load %arg10[%c0_24, %c0_25] : memref<128x128xbf16, #tpu.memory_space<vmem>>, vector<128x128xbf16>
    %cst_26 = arith.constant dense<0.000000e+00> : vector<1024x128xf32>
    %35 = tpu.matmul %33, %34, %cst_26 {dimension_numbers = #tpu.dot_dimension_numbers<[1], [0], [0], [1], [0, 0, 1, 1], [], []>} : vector<1024x128xbf16>, vector<128x128xbf16>, vector<1024x128xf32> -> vector<1024x128xf32>
    %c0_27 = arith.constant 0 : index
    %c0_28 = arith.constant 0 : index
    %36 = vector.load %arg11[%c0_27, %c0_28] : memref<1x128xf32, #tpu.memory_space<vmem>>, vector<1x128xf32>
    %37 = vector.broadcast %36 : vector<1x128xf32> to vector<1024x128xf32>
    %38 = arith.addf %35, %37 : vector<1024x128xf32>
    %39 = tpu.iota {dimensions = array<i32: 1>} : vector<1024x128xi32>
    %c3_i32 = arith.constant 3 : i32
    %40 = vector.broadcast %c3_i32 : i32 to vector<1024x128xi32>
    %41 = arith.cmpi slt, %39, %40 : vector<1024x128xi32>
    %42 = arith.negf %38 : vector<1024x128xf32>
    %43 = math.exp %42 : vector<1024x128xf32>
    %cst_29 = arith.constant 1.000000e+00 : f32
    %44 = vector.broadcast %cst_29 : f32 to vector<1024x128xf32>
    %45 = arith.addf %44, %43 : vector<1024x128xf32>
    %46 = arith.divf %44, %45 : vector<1024x128xf32>
    %47 = arith.select %41, %46, %38 : vector<1024x128xi1>, vector<1024x128xf32>
    %48 = arith.truncf %47 : vector<1024x128xf32> to vector<1024x128xbf16>
    %c0_30 = arith.constant 0 : index
    %c0_31 = arith.constant 0 : index
    %49 = vector.load %arg12[%c0_30, %c0_31] : memref<1024x128xbf16, #tpu.memory_space<vmem>>, vector<1024x128xbf16>
    tpu.vector_store %arg12[%c0_30, %c0_31], %48 {strides = array<i32>} : memref<1024x128xbf16, #tpu.memory_space<vmem>>, vector<1024x128xbf16>,
    return
  }
  func.func @transform_0(%arg0: i32) -> (i32, i32) {
    %c0_i32 = arith.constant 0 : i32
    %c0_i32_0 = arith.constant 0 : i32
    return %arg0, %c0_i32 : i32, i32
  }
  func.func @transform_1(%arg0: i32) -> (i32, i32) {
    %c0_i32 = arith.constant 0 : i32
    %c0_i32_0 = arith.constant 0 : i32
    %c0_i32_1 = arith.constant 0 : i32
    return %c0_i32, %c0_i32_0 : i32, i32
  }
  func.func @transform_2(%arg0: i32) -> (i32, i32) {
    %c0_i32 = arith.constant 0 : i32
    %c0_i32_0 = arith.constant 0 : i32
    %c0_i32_1 = arith.constant 0 : i32
    return %c0_i32, %c0_i32_0 : i32, i32
  }
  func.func @transform_3(%arg0: i32) -> (i32, i32) {
    %c0_i32 = arith.constant 0 : i32
    %c0_i32_0 = arith.constant 0 : i32
    %c0_i32_1 = arith.constant 0 : i32
    return %c0_i32, %c0_i32_0 : i32, i32
  }
  func.func @transform_4(%arg0: i32) -> (i32, i32) {
    %c0_i32 = arith.constant 0 : i32
    %c0_i32_0 = arith.constant 0 : i32
    %c0_i32_1 = arith.constant 0 : i32
    return %c0_i32, %c0_i32_0 : i32, i32
  }
  func.func @transform_5(%arg0: i32) -> (i32, i32) {
    %c0_i32 = arith.constant 0 : i32
    %c0_i32_0 = arith.constant 0 : i32
    %c0_i32_1 = arith.constant 0 : i32
    return %c0_i32, %c0_i32_0 : i32, i32
  }
  func.func @transform_6(%arg0: i32) -> (i32, i32) {
    %c0_i32 = arith.constant 0 : i32
    %c0_i32_0 = arith.constant 0 : i32
    %c0_i32_1 = arith.constant 0 : i32
    return %c0_i32, %c0_i32_0 : i32, i32
  }
  func.func @transform_7(%arg0: i32) -> (i32, i32) {
    %c0_i32 = arith.constant 0 : i32
    %c0_i32_0 = arith.constant 0 : i32
    %c0_i32_1 = arith.constant 0 : i32
    return %c0_i32, %c0_i32_0 : i32, i32
  }
  func.func @transform_8(%arg0: i32) -> (i32, i32) {
    %c0_i32 = arith.constant 0 : i32
    %c0_i32_0 = arith.constant 0 : i32
    %c0_i32_1 = arith.constant 0 : i32
    return %c0_i32, %c0_i32_0 : i32, i32
  }
  func.func @transform_9(%arg0: i32) -> (i32, i32) {
    %c0_i32 = arith.constant 0 : i32
    %c0_i32_0 = arith.constant 0 : i32
    %c0_i32_1 = arith.constant 0 : i32
    return %c0_i32, %c0_i32_0 : i32, i32
  }
  func.func @transform_10(%arg0: i32) -> (i32, i32) {
    %c0_i32 = arith.constant 0 : i32
    %c0_i32_0 = arith.constant 0 : i32
    %c0_i32_1 = arith.constant 0 : i32
    return %c0_i32, %c0_i32_0 : i32, i32
  }
  func.func @transform_11(%arg0: i32) -> (i32, i32) {
    %c0_i32 = arith.constant 0 : i32
    %c0_i32_0 = arith.constant 0 : i32
    return %arg0, %c0_i32 : i32, i32
  }
}

</mosaic_0001>

<bundles_post_ra>
// kernel: _nerf_forward_padded.1
= control target key start
LH: loop header
LB: loop body
LE: loop exit
PB: predicated region body
PF: predicated region fallthrough
CT: control target
= control target key end

     0   :  { %s10996_s0 = inlined_call_operand.vmem [shape: f32[2048,27], index: 0, kind: input, shape index: {}]   ;;  %s10997_s1 = inlined_call_operand.vmem [shape: bf16[27,128], index: 1, kind: input, shape index: {}]   ;;  %s10998_s2 = inlined_call_operand.vmem [shape: f32[1,128], index: 2, kind: input, shape index: {}]   ;;  %s10999_s3 = inlined_call_operand.vmem [shape: bf16[128,128], index: 3, kind: input, shape index: {}]   ;;  %s11000_s4 = inlined_call_operand.vmem [shape: f32[1,128], index: 4, kind: input, shape index: {}]   ;;  %s11001_s5 = inlined_call_operand.vmem [shape: bf16[128,128], index: 5, kind: input, shape index: {}]   ;;  %s11002_s6 = inlined_call_operand.vmem [shape: f32[1,128], index: 6, kind: input, shape index: {}]   ;;  %s11003_s7 = inlined_call_operand.vmem [shape: bf16[128,128], index: 7, kind: input, shape index: {}]   ;;  %s11004_s8 = inlined_call_operand.vmem [shape: f32[1,128], index: 8, kind: input, shape index: {}]   ;;  %s11005_s9 = inlined_call_operand.vmem [shape: bf16[128,128], index: 9, kind: input, shape index: {}]   ;;  %s11006_s10 = inlined_call_operand.vmem [shape: f32[1,128], index: 10, kind: input, shape index: {}]   ;;  %s11007_s11 = inlined_call_operand.hbm [shape: bf16[2048,128], index: 11, kind: output, shape index: {}]  }
   0x1   :  { %11008 = sst [smem:[#allocation5_spill]] %s10996_s0 }
   0x2   :  { %16 = vsyncpa [#allocation3], 0 }
   0x3   :  { %18 = vsyncpa [#allocation3 + $0x1], 0  ;;  %s8864_s17 = smov 0   ;;  %s8866_s18 = smov 0  }
   0x4   :  { %s8868_s19 = smov 0   ;;  %s8870_s20 = smov 0  }
   0x5 LB: > { %s8885_s21 = sadd.s32 4294967295, %s8798_s20   ;;  %s6195_s22 = sadd.s32 4294967294, %s8798_s20   ;;  %s8798_s20 = sphi %s8870_s20, %s11015_s20   ;;  %s8794_s19 = sphi %s8868_s19, %s11014_s19   ;;  %s8790_s18 = sphi %s8866_s18, %s11013_s18   ;;  %s8786_s17 = sphi %s8864_s17, %s11012_s17  }
   0x6   : > { %s8889_s23 = sadd.s32 1, %s8798_s20   ;;  %s267_s24 = sadd.s32 1, %s8794_s19 }
   0x7   : > { %s264_s25 = ssub.s32 %s8798_s20, %s8889_s23  ;;  %p277_p0 = scmp.ne.s32.totalorder %s8794_s19, %s8790_s18 }
   0x8   : > { %p265_p1 = scmp.eq.s32.totalorder %s264_s25, 0  ;;  %p278_p2 = scmp.eq.s32.totalorder %s8885_s21, 1 }
   0x9   : > { %p283_p3 = scmp.ne.s32.totalorder %s8790_s18, %s8786_s17  ;;  %p284_p4 = scmp.eq.s32.totalorder %s6195_s22, 1 }
   0xa   : > { %s8900_s26 = scalar_select %p265_p1, %s8794_s19, %s267_s24  }
   0xb   : > { %p8902_p5 = por %p278_p2, %p277_p0  ;;  %p8906_p6 = por %p284_p4, %p283_p3 }
   0xc   : > { %p6198_p7 = scmp.ge.s32.totalorder %s8798_s20, 1  ;;  %p341_p8 = scmp.lt.s32.totalorder %s8798_s20, 3 }
   0xe   : > { %p342_p9 = pnand %p6198_p7, %p341_p8 }
   0xf   : > { %s6200_s12 = sshll.u32 (!%p342_p9), %s8885_s21, 7  ;;  %s11011_s0 = sld [smem:[#allocation5_spill]] (!%p342_p9) }
  0x10   : > { %345 = sbr.rel (%p342_p9) target bundleno = 1361 (0x551), region = 64  ;;  %p382_p10 = scmp.lt.s32.totalorder (!%p342_p9), %s6200_s12, 255 }
  0x11   : > { %s6694_s29 = sshll.u32 (!%p342_p9), %s8885_s21, 13  ;;  %s8801_s22 = smov (!%p342_p9), [#allocation2]  }
  0x12   : > { %s8742_s25 = sshll.u32 (!%p342_p9), %s8801_s22, 4  ;;  %s8743_s25 = int_to_ptr.vmem [resolvable:$false] %s8742_s25 }
  0x15   : > { %v8186_v0 = vld [vmem:[%s10997_s1 + $0x8] sm:$0x3f]   ;;  %vm796_vm0 = vcmask 1044480   ;;  %vm797_vm1 = vcmask 1045504   ;;  %v8800_v1 = vmov 65535   ;;  %v8187_v5 = vld [vmem:[%s10997_s1] sm:$0xff]  }
  0x16   : > { %v798_v2 = vsel %vm796_vm0, 4294967295, %v8800_v1  ;;  %s11017_s12 = smov (!%p382_p10, %s6200_s12), 255  ;;  %v8188_v6 = vld [vmem:[%s10999_s3 + $0x38] sm:$0xff]   ;;  %vm603_vm2 = vcmask 220160   ;;  %v8189_v26 = vld [vmem:[%s10999_s3 + $0x30] sm:$0xff]   ;;  %v8190_v42 = vld [vmem:[%s10999_s3 + $0x28] sm:$0xff]  }
  0x17   : > { %v799_v3 = vsel %vm797_vm1, %v798_v2, 0  ;;  %s6201_s15 = sshll.u32 %s11017_s12, 3  ;;  %v8191_v49 = vld [vmem:[%s10999_s3 + $0x20] sm:$0xff]   ;;  %v8192_v56 = vld [vmem:[%s10999_s3 + $0x18] sm:$0xff]   ;;  %v8193_v63 = vld [vmem:[%s10999_s3 + $0x10] sm:$0xff]  }
  0x18   : > { %v801_v4 = vand.u32 %v8186_v0, %v799_v3  ;;  %s8922_s24 = scalar_lea.vmem %s11011_s0, %s6201_s15 }
  0x19   : > { %v389_v7 = vld [vmem:[%s8922_s24] sm:$0xff]  ;;  %v390_v8 = vld [vmem:[%s8922_s24 + $0x8] sm:$0xff]  ;;  %v391_v9 = vld [vmem:[%s8922_s24 + $0x10] sm:$0xff] }
  0x1a   : > { %7432 = vmatprep.subr.bf16.mxu0 %v801_v4  ;;  %8140 = vmatprep.subr.bf16.mxu1 %v801_v4  ;;  %v517_v10 = vpack.c.bf16 %v390_v8, %v389_v7  ;;  %v392_v11 = vld [vmem:[%s8922_s24 + $0x18] sm:$0xff]  ;;  %v393_v12 = vld [vmem:[%s8922_s24 + $0x20] sm:$0xff]  ;;  %v394_v13 = vld [vmem:[%s8922_s24 + $0x28] sm:$0xff] }
  0x1b   : > { %7433 = vmatpush3.bf16.msra.mxu0 %v801_v4  ;;  %8142 = vmatpush3.bf16.msra.mxu1 %v801_v4  ;;  %v518_v14 = vpack.c.bf16 %v392_v11, %v391_v9  ;;  %v519_v15 = vpack.c.bf16 %v394_v13, %v393_v12  ;;  %v395_v16 = vld [vmem:[%s8922_s24 + $0x30] sm:$0xff]  ;;  %v396_v17 = vld [vmem:[%s8922_s24 + $0x38] sm:$0xff]  ;;  %v397_v18 = vld [vmem:[%s8922_s24 + $0x40] sm:$0xff] }
  0x1c   : > { %7434 = vmatprep.subr.bf16.mxu0 %v8187_v5  ;;  %8141 = vmatprep.subr.bf16.mxu1 %v8187_v5  ;;  %v398_v19 = vld [vmem:[%s8922_s24 + $0x48] sm:$0xff]  ;;  %v520_v20 = vpack.c.bf16 %v396_v17, %v395_v16  ;;  %v453_v22 = vld [vmem:[%s8922_s24 + $0x200] sm:$0xff]  ;;  %v399_v23 = vld [vmem:[%s8922_s24 + $0x50] sm:$0xff] }
  0x1d   : > { %7436 = vmatprep.mubr.msk.bf16.mxu0 %vm603_vm2, %v517_v10  ;;  %v521_v21 = vpack.c.bf16 %v398_v19, %v397_v18  ;;  %v400_v24 = vld [vmem:[%s8922_s24 + $0x58] sm:$0xff]  ;;  %v454_v25 = vld [vmem:[%s8922_s24 + $0x208] sm:$0xff]  ;;  %v401_v27 = vld [vmem:[%s8922_s24 + $0x60] sm:$0xff] }
  0x1e   : > { %v549_v28 = vpack.c.bf16 %v454_v25, %v453_v22  ;;  %v455_v29 = vld [vmem:[%s8922_s24 + $0x210] sm:$0xff]  ;;  %v456_v30 = vld [vmem:[%s8922_s24 + $0x218] sm:$0xff]  ;;  %v402_v31 = vld [vmem:[%s8922_s24 + $0x68] sm:$0xff]  ;;  %v522_v36 = vpack.c.bf16 %v400_v24, %v399_v23 }
  0x1f   : > { %7435 = vmatpush3.bf16.msra.mxu0 %v8187_v5  ;;  %8143 = vmatpush3.bf16.msra.mxu1 %v8187_v5  ;;  %v550_v32 = vpack.c.bf16 %v456_v30, %v455_v29  ;;  %v457_v33 = vld [vmem:[%s8922_s24 + $0x220] sm:$0xff]  ;;  %v458_v34 = vld [vmem:[%s8922_s24 + $0x228] sm:$0xff]  ;;  %v523_v37 = vpack.c.bf16 %v402_v31, %v401_v27  ;;  %v459_v38 = vld [vmem:[%s8922_s24 + $0x230] sm:$0xff] }
  0x20   : > { %7564 = vmatprep.subr.bf16.mxu1 %v8188_v6  ;;  %7500 = vmatprep.mubr.msk.bf16.mxu1 %vm603_vm2, %v549_v28  ;;  %v551_v35 = vpack.c.bf16 %v458_v34, %v457_v33  ;;  %v460_v39 = vld [vmem:[%s8922_s24 + $0x238] sm:$0xff]  ;;  %v461_v40 = vld [vmem:[%s8922_s24 + $0x240] sm:$0xff]  ;;  %v462_v41 = vld [vmem:[%s8922_s24 + $0x248] sm:$0xff] }
  0x21   : > { %v552_v43 = vpack.c.bf16 %v460_v39, %v459_v38  ;;  %v403_v44 = vld [vmem:[%s8922_s24 + $0x70] sm:$0xff]  ;;  %v404_v45 = vld [vmem:[%s8922_s24 + $0x78] sm:$0xff]  ;;  %v553_v46 = vpack.c.bf16 %v462_v41, %v461_v40  ;;  %v405_v47 = vld [vmem:[%s8922_s24 + $0x80] sm:$0xff] }
  0x22   : > { %7437 = vmatmul.mubr.msk.bf16.vlgmr.msra.gmra.mxu0 %vm603_vm2, %v518_v14  ;;  %7501 = vmatmul.mubr.msk.bf16.vlgmr.msra.gmra.mxu1 %vm603_vm2, %v550_v32  ;;  %v406_v48 = vld [vmem:[%s8922_s24 + $0x88] sm:$0xff]  ;;  %v524_v50 = vpack.c.bf16 %v404_v45, %v403_v44  ;;  %v463_v52 = vld [vmem:[%s8922_s24 + $0x250] sm:$0xff]  ;;  %v464_v53 = vld [vmem:[%s8922_s24 + $0x258] sm:$0xff] }
  0x23   : > { %7440 = vmatprep.mubr.msk.bf16.mxu0 %vm603_vm2, %v519_v15  ;;  %7565 = vmatpush3.bf16.msra.mxu1 %v8188_v6  ;;  %v525_v51 = vpack.c.bf16 %v406_v48, %v405_v47  ;;  %v465_v54 = vld [vmem:[%s8922_s24 + $0x260] sm:$0xff]  ;;  %v466_v55 = vld [vmem:[%s8922_s24 + $0x268] sm:$0xff]  ;;  %v554_v57 = vpack.c.bf16 %v464_v53, %v463_v52  ;;  %v407_v58 = vld [vmem:[%s8922_s24 + $0x90] sm:$0xff] }
  0x24   : > { %7504 = vmatprep.mubr.msk.bf16.mxu1 %vm603_vm2, %v551_v35  ;;  %7566 = vmatprep.subr.bf16.mxu1 %v8189_v26  ;;  %v408_v59 = vld [vmem:[%s8922_s24 + $0x98] sm:$0xff]  ;;  %v555_v60 = vpack.c.bf16 %v466_v55, %v465_v54  ;;  %v409_v61 = vld [vmem:[%s8922_s24 + $0xa0] sm:$0xff]  ;;  %v410_v62 = vld [vmem:[%s8922_s24 + $0xa8] sm:$0xff] }
  0x25   : > { %v526_v0 = vpack.c.bf16 %v408_v59, %v407_v58  ;;  %v527_v1 = vpack.c.bf16 %v410_v62, %v409_v61  ;;  %v467_v2 = vld [vmem:[%s8922_s24 + $0x270] sm:$0xff]  ;;  %v468_v3 = vld [vmem:[%s8922_s24 + $0x278] sm:$0xff]  ;;  %v469_v4 = vld [vmem:[%s8922_s24 + $0x280] sm:$0xff] }
  0x26   : > { %v470_v5 = vld [vmem:[%s8922_s24 + $0x288] sm:$0xff]  ;;  %v411_v6 = vld [vmem:[%s8922_s24 + $0xb0] sm:$0xff]  ;;  %v556_v7 = vpack.c.bf16 %v468_v3, %v467_v2  ;;  %v412_v8 = vld [vmem:[%s8922_s24 + $0xb8] sm:$0xff] }
  0x27   : > { %7567 = vmatpush3.bf16.msra.mxu1 %v8189_v26  ;;  %v413_v9 = vld [vmem:[%s8922_s24 + $0xc0] sm:$0xff]  ;;  %v557_v10 = vpack.c.bf16 %v470_v5, %v469_v4  ;;  %v414_v11 = vld [vmem:[%s8922_s24 + $0xc8] sm:$0xff]  ;;  %v528_v13 = vpack.c.bf16 %v412_v8, %v411_v6  ;;  %v471_v14 = vld [vmem:[%s8922_s24 + $0x290] sm:$0xff] }
  0x28   : > { %7568 = vmatprep.subr.bf16.mxu1 %v8190_v42  ;;  %v8194_v12 = vld [vmem:[%s10999_s3 + $0x8] sm:$0xff]   ;;  %v529_v15 = vpack.c.bf16 %v414_v11, %v413_v9  ;;  %v472_v16 = vld [vmem:[%s8922_s24 + $0x298] sm:$0xff]  ;;  %v473_v17 = vld [vmem:[%s8922_s24 + $0x2a0] sm:$0xff] }
  0x29   : > { %v474_v18 = vld [vmem:[%s8922_s24 + $0x2a8] sm:$0xff]  ;;  %v8195_v19 = vld [vmem:[%s10999_s3] sm:$0xff]   ;;  %v558_v24 = vpack.c.bf16 %v472_v16, %v471_v14  ;;  %v475_v26 = vld [vmem:[%s8922_s24 + $0x2b0] sm:$0xff] }
  0x2a   : > { %7441 = vmatmul.mubr.msk.bf16.gmra.mxu0 %vm603_vm2, %v520_v20  ;;  %7505 = vmatmul.mubr.msk.bf16.gmra.mxu1 %vm603_vm2, %v552_v43  ;;  %v415_v20 = vld [vmem:[%s8922_s24 + $0xd0] sm:$0xff]  ;;  %v417_v22 = vld [vmem:[%s8922_s24 + $0xe0] sm:$0xff]  ;;  %v418_v23 = vld [vmem:[%s8922_s24 + $0xe8] sm:$0xff]  ;;  %v559_v25 = vpack.c.bf16 %v474_v18, %v473_v17 }
  0x2b   : > { %7444 = vmatprep.mubr.msk.bf16.mxu0 %vm603_vm2, %v521_v21  ;;  %7508 = vmatprep.mubr.msk.bf16.mxu1 %vm603_vm2, %v553_v46  ;;  %v416_v21 = vld [vmem:[%s8922_s24 + $0xd8] sm:$0xff]  ;;  %v477_v29 = vld [vmem:[%s8922_s24 + $0x2c0] sm:$0xff]  ;;  %v478_v30 = vld [vmem:[%s8922_s24 + $0x2c8] sm:$0xff]  ;;  %v531_v31 = vpack.c.bf16 %v418_v23, %v417_v22 }
  0x2c   : > { %7569 = vmatpush3.bf16.msra.mxu1 %v8190_v42  ;;  %v476_v27 = vld [vmem:[%s8922_s24 + $0x2b8] sm:$0xff]  ;;  %v530_v28 = vpack.c.bf16 %v416_v21, %v415_v20  ;;  %v419_v32 = vld [vmem:[%s8922_s24 + $0xf0] sm:$0xff]  ;;  %v421_v34 = vld [vmem:[%s8922_s24 + $0x100] sm:$0xff] }
  0x2d   : > { %7570 = vmatprep.subr.bf16.mxu1 %v8191_v49  ;;  %v420_v33 = vld [vmem:[%s8922_s24 + $0xf8] sm:$0xff]  ;;  %v422_v35 = vld [vmem:[%s8922_s24 + $0x108] sm:$0xff]  ;;  %v479_v38 = vld [vmem:[%s8922_s24 + $0x2d0] sm:$0xff] }
  0x2e   : > { %v480_v39 = vld [vmem:[%s8922_s24 + $0x2d8] sm:$0xff]  ;;  %v532_v40 = vpack.c.bf16 %v420_v33, %v419_v32  ;;  %v481_v41 = vld [vmem:[%s8922_s24 + $0x2e0] sm:$0xff]  ;;  %v482_v42 = vld [vmem:[%s8922_s24 + $0x2e8] sm:$0xff]  ;;  %v533_v43 = vpack.c.bf16 %v422_v35, %v421_v34 }
  0x2f   : > { %v562_v44 = vpack.c.bf16 %v480_v39, %v479_v38  ;;  %v423_v45 = vld [vmem:[%s8922_s24 + $0x110] sm:$0xff]  ;;  %v424_v46 = vld [vmem:[%s8922_s24 + $0x118] sm:$0xff]  ;;  %v563_v47 = vpack.c.bf16 %v482_v42, %v481_v41  ;;  %v425_v48 = vld [vmem:[%s8922_s24 + $0x120] sm:$0xff] }
  0x30   : > { %7571 = vmatpush3.bf16.msra.mxu1 %v8191_v49  ;;  %v426_v49 = vld [vmem:[%s8922_s24 + $0x128] sm:$0xff]  ;;  %v483_v52 = vld [vmem:[%s8922_s24 + $0x2f0] sm:$0xff]  ;;  %v484_v53 = vld [vmem:[%s8922_s24 + $0x2f8] sm:$0xff] }
  0x31   : > { %7572 = vmatprep.subr.bf16.mxu1 %v8192_v56  ;;  %v485_v54 = vld [vmem:[%s8922_s24 + $0x300] sm:$0xff]  ;;  %v486_v55 = vld [vmem:[%s8922_s24 + $0x308] sm:$0xff]  ;;  %v428_v58 = vld [vmem:[%s8922_s24 + $0x138] sm:$0xff] }
  0x32   : > { %7445 = vmatmul.mubr.msk.bf16.gmra.mxu0 %vm603_vm2, %v522_v36  ;;  %7509 = vmatmul.mubr.msk.bf16.gmra.mxu1 %vm603_vm2, %v554_v57  ;;  %v560_v36 = vpack.c.bf16 %v476_v27, %v475_v26  ;;  %v427_v57 = vld [vmem:[%s8922_s24 + $0x130] sm:$0xff]  ;;  %v565_v59 = vpack.c.bf16 %v486_v55, %v485_v54  ;;  %v430_v61 = vld [vmem:[%s8922_s24 + $0x148] sm:$0xff]  ;;  %v489_v2 = vld [vmem:[%s8922_s24 + $0x320] sm:$0xff] }
  0x33   : > { %7448 = vmatprep.mubr.msk.bf16.mxu0 %vm603_vm2, %v523_v37  ;;  %7512 = vmatprep.mubr.msk.bf16.mxu1 %vm603_vm2, %v555_v60  ;;  %v561_v37 = vpack.c.bf16 %v478_v30, %v477_v29  ;;  %v429_v60 = vld [vmem:[%s8922_s24 + $0x140] sm:$0xff]  ;;  %v536_v62 = vpack.c.bf16 %v428_v58, %v427_v57  ;;  %v490_v3 = vld [vmem:[%s8922_s24 + $0x328] sm:$0xff]  ;;  %v431_v5 = vld [vmem:[%s8922_s24 + $0x150] sm:$0xff] }
  0x34   : > { %7573 = vmatpush3.bf16.msra.mxu1 %v8192_v56  ;;  %v564_v56 = vpack.c.bf16 %v484_v53, %v483_v52  ;;  %v432_v6 = vld [vmem:[%s8922_s24 + $0x158] sm:$0xff]  ;;  %v433_v8 = vld [vmem:[%s8922_s24 + $0x160] sm:$0xff]  ;;  %v434_v9 = vld [vmem:[%s8922_s24 + $0x168] sm:$0xff] }
  0x35   : > { %7574 = vmatprep.subr.bf16.mxu1 %v8193_v63  ;;  %v539_v11 = vpack.c.bf16 %v434_v9, %v433_v8  ;;  %v493_v14 = vld [vmem:[%s8922_s24 + $0x340] sm:$0xff]  ;;  %v435_v17 = vld [vmem:[%s8922_s24 + $0x170] sm:$0xff]  ;;  %v436_v18 = vld [vmem:[%s8922_s24 + $0x178] sm:$0xff] }
  0x36   : > { %v437_v20 = vld [vmem:[%s8922_s24 + $0x180] sm:$0xff]  ;;  %v438_v21 = vld [vmem:[%s8922_s24 + $0x188] sm:$0xff]  ;;  %v540_v22 = vpack.c.bf16 %v436_v18, %v435_v17  ;;  %v439_v29 = vld [vmem:[%s8922_s24 + $0x190] sm:$0xff] }
  0x37   : > { %v541_v23 = vpack.c.bf16 %v438_v21, %v437_v20  ;;  %v497_v26 = vld [vmem:[%s8922_s24 + $0x360] sm:$0xff]  ;;  %v498_v27 = vld [vmem:[%s8922_s24 + $0x368] sm:$0xff]  ;;  %v440_v30 = vld [vmem:[%s8922_s24 + $0x198] sm:$0xff] }
  0x38   : > { %7575 = vmatpush3.bf16.msra.mxu1 %v8193_v63  ;;  %v537_v63 = vpack.c.bf16 %v430_v61, %v429_v60  ;;  %v441_v32 = vld [vmem:[%s8922_s24 + $0x1a0] sm:$0xff]  ;;  %v442_v33 = vld [vmem:[%s8922_s24 + $0x1a8] sm:$0xff]  ;;  %v542_v34 = vpack.c.bf16 %v440_v30, %v439_v29  ;;  %v443_v41 = vld [vmem:[%s8922_s24 + $0x1b0] sm:$0xff] }
  0x39   : > { %7576 = vmatprep.subr.bf16.mxu1 %v8194_v12  ;;  %v543_v35 = vpack.c.bf16 %v442_v33, %v441_v32  ;;  %v501_v38 = vld [vmem:[%s8922_s24 + $0x380] sm:$0xff]  ;;  %v502_v39 = vld [vmem:[%s8922_s24 + $0x388] sm:$0xff]  ;;  %v444_v42 = vld [vmem:[%s8922_s24 + $0x1b8] sm:$0xff] }
  0x3a   : > { %7449 = vmatmul.mubr.msk.bf16.gmra.mxu0 %vm603_vm2, %v524_v50  ;;  %7513 = vmatmul.mubr.msk.bf16.gmra.mxu1 %vm603_vm2, %v556_v7  ;;  %v534_v50 = vpack.c.bf16 %v424_v46, %v423_v45  ;;  %v567_v7 = vpack.c.bf16 %v490_v3, %v489_v2  ;;  %v446_v45 = vld [vmem:[%s8922_s24 + $0x1c8] sm:$0xff]  ;;  %v544_v46 = vpack.c.bf16 %v444_v42, %v443_v41  ;;  %v447_v53 = vld [vmem:[%s8922_s24 + $0x1d0] sm:$0xff]  ;;  %v448_v54 = vld [vmem:[%s8922_s24 + $0x1d8] sm:$0xff] }
  0x3b   : > { %7452 = vmatprep.mubr.msk.bf16.mxu0 %vm603_vm2, %v525_v51  ;;  %7516 = vmatprep.mubr.msk.bf16.mxu1 %vm603_vm2, %v557_v10  ;;  %v535_v51 = vpack.c.bf16 %v426_v49, %v425_v48  ;;  %v538_v10 = vpack.c.bf16 %v432_v6, %v431_v5  ;;  %v503_v48 = vld [vmem:[%s8922_s24 + $0x390] sm:$0xff]  ;;  %v504_v49 = vld [vmem:[%s8922_s24 + $0x398] sm:$0xff]  ;;  %v450_v57 = vld [vmem:[%s8922_s24 + $0x1e8] sm:$0xff]  ;;  %v546_v58 = vpack.c.bf16 %v448_v54, %v447_v53 }
  0x3c   : > { %7577 = vmatpush3.bf16.msra.mxu1 %v8194_v12  ;;  %v491_v12 = vld [vmem:[%s8922_s24 + $0x330] sm:$0xff]  ;;  %v574_v52 = vpack.c.bf16 %v504_v49, %v503_v48  ;;  %v508_v61 = vld [vmem:[%s8922_s24 + $0x3b8] sm:$0xff]  ;;  %v514_v8 = vld [vmem:[%s8922_s24 + $0x3e8] sm:$0xff] }
  0x3d   : > { %7578 = vmatprep.subr.bf16.mxu1 %v8195_v19  ;;  %v507_v60 = vld [vmem:[%s8922_s24 + $0x3b0] sm:$0xff]  ;;  %v452_v2 = vld [vmem:[%s8922_s24 + $0x1f8] sm:$0xff] }
  0x3e   : > { %v511_v5 = vld [vmem:[%s8922_s24 + $0x3d0] sm:$0xff]  ;;  %v512_v6 = vld [vmem:[%s8922_s24 + $0x3d8] sm:$0xff] }
  0x3f   : > { %v578_v9 = vpack.c.bf16 %v512_v6, %v511_v5 }
  0x40   : > { %7579 = vmatpush3.bf16.msra.mxu1 %v8195_v19 }
  0x42   : > { %7453 = vmatmul.mubr.msk.bf16.gmra.mxu0 %vm603_vm2, %v526_v0  ;;  %7517 = vmatmul.mubr.msk.bf16.gmra.mxu1 %vm603_vm2, %v558_v24  ;;  %v487_v0 = vld [vmem:[%s8922_s24 + $0x310] sm:$0xff] }
  0x43   : > { %7456 = vmatprep.mubr.msk.bf16.mxu0 %vm603_vm2, %v527_v1  ;;  %7520 = vmatprep.mubr.msk.bf16.mxu1 %vm603_vm2, %v559_v25  ;;  %v488_v1 = vld [vmem:[%s8922_s24 + $0x318] sm:$0xff]  ;;  %v495_v24 = vld [vmem:[%s8922_s24 + $0x350] sm:$0xff] }
  0x44   : > { %v566_v4 = vpack.c.bf16 %v488_v1, %v487_v0  ;;  %v496_v25 = vld [vmem:[%s8922_s24 + $0x358] sm:$0xff]  ;;  %v576_v0 = vpack.c.bf16 %v508_v61, %v507_v60  ;;  %v451_v1 = vld [vmem:[%s8922_s24 + $0x1f0] sm:$0xff] }
  0x45   : > { %v8200_v61 = vld [vmem:[%s11001_s5 + $0x18] sm:$0xff]  }
  0x4a   : > { %7457 = vmatmul.mubr.msk.bf16.gmra.mxu0 %vm603_vm2, %v528_v13  ;;  %7521 = vmatmul.mubr.msk.bf16.gmra.mxu1 %vm603_vm2, %v560_v36  ;;  %v492_v13 = vld [vmem:[%s8922_s24 + $0x338] sm:$0xff]  ;;  %v499_v36 = vld [vmem:[%s8922_s24 + $0x370] sm:$0xff] }
  0x4b   : > { %7460 = vmatprep.mubr.msk.bf16.mxu0 %vm603_vm2, %v529_v15  ;;  %7524 = vmatprep.mubr.msk.bf16.mxu1 %vm603_vm2, %v561_v37  ;;  %v494_v15 = vld [vmem:[%s8922_s24 + $0x348] sm:$0xff]  ;;  %v568_v16 = vpack.c.bf16 %v492_v13, %v491_v12  ;;  %v500_v37 = vld [vmem:[%s8922_s24 + $0x378] sm:$0xff] }
  0x4c   : > { %v569_v19 = vpack.c.bf16 %v494_v15, %v493_v14  ;;  %v516_v12 = vld [vmem:[%s8922_s24 + $0x3f8] sm:$0xff]  ;;  %v8197_v15 = vld [vmem:[%s11001_s5 + $0x30] sm:$0xff]  }
  0x4d   : > { %v8196_v14 = vld [vmem:[%s11001_s5 + $0x38] sm:$0xff]  }
  0x4e   : > { %7708 = vmatprep.subr.bf16.mxu0 %v8196_v14 }
  0x4f   : > { %7709 = vmatpush3.bf16.msra.mxu0 %v8196_v14 }
  0x50   : > { %7710 = vmatprep.subr.bf16.mxu0 %v8197_v15 }
  0x52   : > { %7461 = vmatmul.mubr.msk.bf16.gmra.mxu0 %vm603_vm2, %v530_v28  ;;  %7525 = vmatmul.mubr.msk.bf16.gmra.mxu1 %vm603_vm2, %v562_v44  ;;  %v570_v28 = vpack.c.bf16 %v496_v25, %v495_v24  ;;  %v445_v44 = vld [vmem:[%s8922_s24 + $0x1c0] sm:$0xff] }
  0x53   : > { %7464 = vmatprep.mubr.msk.bf16.mxu0 %vm603_vm2, %v531_v31  ;;  %7528 = vmatprep.mubr.msk.bf16.mxu1 %vm603_vm2, %v563_v47  ;;  %v571_v31 = vpack.c.bf16 %v498_v27, %v497_v26  ;;  %v545_v47 = vpack.c.bf16 %v446_v45, %v445_v44  ;;  %v8199_v26 = vld [vmem:[%s11001_s5 + $0x20] sm:$0xff]  }
  0x54   : > { %7711 = vmatpush3.bf16.msra.mxu0 %v8197_v15 }
  0x5a   : > { %7465 = vmatmul.mubr.msk.bf16.gmra.mxu0 %vm603_vm2, %v532_v40  ;;  %7529 = vmatmul.mubr.msk.bf16.gmra.mxu1 %vm603_vm2, %v564_v56  ;;  %v572_v40 = vpack.c.bf16 %v500_v37, %v499_v36  ;;  %v449_v56 = vld [vmem:[%s8922_s24 + $0x1e0] sm:$0xff] }
  0x5b   : > { %7468 = vmatprep.mubr.msk.bf16.mxu0 %vm603_vm2, %v533_v43  ;;  %7532 = vmatprep.mubr.msk.bf16.mxu1 %vm603_vm2, %v565_v59  ;;  %v573_v43 = vpack.c.bf16 %v502_v39, %v501_v38  ;;  %v547_v59 = vpack.c.bf16 %v450_v57, %v449_v56 }
  0x62   : > { %7469 = vmatmul.mubr.msk.bf16.gmra.mxu0 %vm603_vm2, %v534_v50  ;;  %7533 = vmatmul.mubr.msk.bf16.gmra.mxu1 %vm603_vm2, %v566_v4  ;;  %v505_v50 = vld [vmem:[%s8922_s24 + $0x3a0] sm:$0xff]  ;;  %v548_v4 = vpack.c.bf16 %v452_v2, %v451_v1 }
  0x63   : > { %7472 = vmatprep.mubr.msk.bf16.mxu0 %vm603_vm2, %v535_v51  ;;  %7536 = vmatprep.mubr.msk.bf16.mxu1 %vm603_vm2, %v567_v7  ;;  %v506_v51 = vld [vmem:[%s8922_s24 + $0x3a8] sm:$0xff]  ;;  %v513_v7 = vld [vmem:[%s8922_s24 + $0x3e0] sm:$0xff] }
  0x64   : > { %v575_v55 = vpack.c.bf16 %v506_v51, %v505_v50 }
  0x6a   : > { %7473 = vmatmul.mubr.msk.bf16.gmra.mxu0 %vm603_vm2, %v536_v62  ;;  %7537 = vmatmul.mubr.msk.bf16.gmra.mxu1 %vm603_vm2, %v568_v16  ;;  %v509_v62 = vld [vmem:[%s8922_s24 + $0x3c0] sm:$0xff]  ;;  %v8198_v16 = vld [vmem:[%s11001_s5 + $0x28] sm:$0xff]  }
  0x6b   : > { %7476 = vmatprep.mubr.msk.bf16.mxu0 %vm603_vm2, %v537_v63  ;;  %7540 = vmatprep.mubr.msk.bf16.mxu1 %vm603_vm2, %v569_v19  ;;  %v510_v63 = vld [vmem:[%s8922_s24 + $0x3c8] sm:$0xff]  ;;  %v9152_v19 = vld [vmem:[%s10998_s2] ss:$0 sm:$0xff] }
  0x6c   : > { %v577_v3 = vpack.c.bf16 %v510_v63, %v509_v62  ;;  %7712 = vmatprep.subr.bf16.mxu0 %v8198_v16 }
  0x6d   : > { %7713 = vmatpush3.bf16.msra.mxu0 %v8198_v16 }
  0x6e   : > { %7714 = vmatprep.subr.bf16.mxu0 %v8199_v26 }
  0x71   : > { %7715 = vmatpush3.bf16.msra.mxu0 %v8199_v26 }
  0x72   : > { %7477 = vmatmul.mubr.msk.bf16.gmra.mxu0 %vm603_vm2, %v538_v10  ;;  %7541 = vmatmul.mubr.msk.bf16.gmra.mxu1 %vm603_vm2, %v570_v28  ;;  %v579_v10 = vpack.c.bf16 %v514_v8, %v513_v7 }
  0x73   : > { %7480 = vmatprep.mubr.msk.bf16.mxu0 %vm603_vm2, %v539_v11  ;;  %7544 = vmatprep.mubr.msk.bf16.mxu1 %vm603_vm2, %v571_v31  ;;  %v515_v11 = vld [vmem:[%s8922_s24 + $0x3f0] sm:$0xff]  ;;  %s378_s24 = sand.u32 1, %s8790_s18  }
  0x74   : > { %v580_v13 = vpack.c.bf16 %v516_v12, %v515_v11  ;;  %7716 = vmatprep.subr.bf16.mxu0 %v8200_v61  ;;  %s10030_s13 = sshll.u32 %s378_s24, 9  ;;  %s10956_s15 = scalar_lea.sflag [#allocation3], %s378_s24 }
  0x75   : > { %7717 = vmatpush3.bf16.msra.mxu0 %v8200_v61  ;;  %s10057_s14 = scalar_lea.vmem [#allocation2], %s10030_s13  ;;  %s10948_s13 = scalar_lea.hbm %s11007_s11, %s6694_s29 }
  0x76   : > { %s6133_s30 = sshll.u32 %s10057_s14, 4  ;;  %s8744_s29 = scalar_lea.vmem %s8743_s25, 16384  ;;  %s10950_s30 = int_to_ptr.vmem [resolvable:$true] %s6133_s30 }
  0x77   : > { %s8738_s16 = scalar_lea.vmem %s10950_s30, 8192  ;;  %p8745_p0 = scmp.lt.s32.totalorder %s10950_s30, %s8743_s25 }
  0x78   : > { %p8739_p11 = scmp.ne.s32.totalorder %s10950_s30, %s8738_s16  ;;  %p8746_p1 = scmp.lt.s32.totalorder %s8744_s29, %s8738_s16 }
  0x7a   : > { %7481 = vmatmul.mubr.msk.bf16.gmra.mxu0 %vm603_vm2, %v540_v22  ;;  %7545 = vmatmul.mubr.msk.bf16.gmra.mxu1 %vm603_vm2, %v572_v40  ;;  %p8740_p12 = pnand %p8739_p11, %p8902_p5  ;;  %p8747_p2 = por %p8746_p1, %p8745_p0 }
  0x7b   : > { %7484 = vmatprep.mubr.msk.bf16.mxu0 %vm603_vm2, %v541_v23  ;;  %7548 = vmatprep.mubr.msk.bf16.mxu1 %vm603_vm2, %v573_v43 }
  0x7c   : > { %p8741_p13 = pneg %p8740_p12 }
  0x7e   : > { %p8748_p3 = pnand %p8747_p2, %p8741_p13 }
  0x82   : > { %7485 = vmatmul.mubr.msk.bf16.gmra.mxu0 %vm603_vm2, %v542_v34  ;;  %7549 = vmatmul.mubr.msk.bf16.gmra.mxu1 %vm603_vm2, %v574_v52 }
  0x83   : > { %7488 = vmatprep.mubr.msk.bf16.mxu0 %vm603_vm2, %v543_v35  ;;  %7552 = vmatprep.mubr.msk.bf16.mxu1 %vm603_vm2, %v575_v55 }
  0x8a   : > { %7489 = vmatmul.mubr.msk.bf16.gmra.mxu0 %vm603_vm2, %v544_v46  ;;  %7553 = vmatmul.mubr.msk.bf16.gmra.mxu1 %vm603_vm2, %v576_v0 }
  0x8b   : > { %7492 = vmatprep.mubr.msk.bf16.mxu0 %vm603_vm2, %v545_v47  ;;  %7556 = vmatprep.mubr.msk.bf16.mxu1 %vm603_vm2, %v577_v3 }
  0x92   : > { %7493 = vmatmul.mubr.msk.bf16.gmra.mxu0 %vm603_vm2, %v546_v58  ;;  %7557 = vmatmul.mubr.msk.bf16.gmra.mxu1 %vm603_vm2, %v578_v9 }
  0x93   : > { %7496 = vmatprep.mubr.msk.bf16.mxu0 %vm603_vm2, %v547_v59  ;;  %7560 = vmatprep.mubr.msk.bf16.mxu1 %vm603_vm2, %v579_v10 }
  0x9a   : > { %7497 = vmatmul.mubr.msk.bf16.gmra.mxu0 %vm603_vm2, %v548_v4  ;;  %7561 = vmatmul.mubr.msk.bf16.gmra.mxu1 %vm603_vm2, %v580_v13 }
  0xe2   : > { %v7438_v17 = vpop.f32.mrf.mxu0  ;;  %v9161_v36 = vpop.f32.mrf.mxu1 }
  0xe3   : > { %v846_v23 = vadd.f32 %v7438_v17, %v9152_v19 }
  0xe4   : > { %v837_v18 = vpop.f32.mrf.mxu0  ;;  %v9166_v41 = vpop.f32.mrf.mxu1 }
  0xe5   : > { %v838_v21 = vadd.f32 %v9152_v19, %v837_v18  ;;  %v1350_v31 = vmax.f32 %v846_v23, 0.0 }
  0xe6   : > { %v7439_v20 = vpop.f32.mrf.mxu0  ;;  %v9169_v45 = vpop.f32.mrf.mxu1 }
  0xe7   : > { %v849_v22 = vadd.f32 %v7439_v20, %v9152_v19  ;;  %v1348_v29 = vmax.f32 %v838_v21, 0.0 }
  0xe8   : > { %v840_v24 = vpop.f32.mrf.mxu0  ;;  %v9171_v50 = vpop.f32.mrf.mxu1 }
  0xe9   : > { %v841_v25 = vadd.f32 %v9152_v19, %v840_v24  ;;  %v1351_v27 = vmax.f32 %v849_v22, 0.0 }
  0xea   : > { %v7442_v28 = vpop.f32.mrf.mxu0  ;;  %v9173_v54 = vpop.f32.mrf.mxu1 }
  0xeb   : > { %v1349_v30 = vmax.f32 %v841_v25, 0.0  ;;  %v1477_v34 = vpack.c.bf16 %v1351_v27, %v1350_v31  ;;  %v862_v39 = vadd.f32 %v7442_v28, %v9152_v19 }
  0xec   : > { %v853_v32 = vpop.f32.mrf.mxu0  ;;  %v9178_v59 = vpop.f32.mrf.mxu1 }
  0xed   : > { %v1476_v33 = vpack.c.bf16 %v1349_v30, %v1348_v29  ;;  %v854_v37 = vadd.f32 %v9152_v19, %v853_v32  ;;  %v1354_v48 = vmax.f32 %v862_v39, 0.0 }
  0xee   : > { %v7443_v35 = vpop.f32.mrf.mxu0  ;;  %v9184_v0 = vpop.f32.mrf.mxu1 }
  0xef   : > { %v865_v38 = vadd.f32 %v7443_v35, %v9152_v19  ;;  %7580 = vmatprep.mubr.bf16.mxu1 %v1476_v33  ;;  %v1352_v46 = vmax.f32 %v854_v37, 0.0  ;;  %v8201_v35 = vld [vmem:[%s11003_s7 + $0x38] sm:$0xff]   ;;  %v8202_v37 = vld [vmem:[%s11001_s5 + $0x10] sm:$0xff]  }
  0xf0   : > { %v856_v40 = vpop.f32.mrf.mxu0  ;;  %7581 = vmatmul.mubr.bf16.vlgmr.msra.gmra.mxu1 %v1477_v34  ;;  %v9186_v5 = vpop.f32.mrf.mxu1  ;;  %7852 = vmatprep.subr.bf16.mxu1 %v8201_v35 }
  0xf1   : > { %v857_v42 = vadd.f32 %v9152_v19, %v856_v40  ;;  %v1355_v43 = vmax.f32 %v865_v38, 0.0  ;;  %7718 = vmatprep.subr.bf16.mxu0 %v8202_v37  ;;  %7853 = vmatpush3.bf16.msra.mxu1 %v8201_v35 }
  0xf2   : > { %v7446_v44 = vpop.f32.mrf.mxu0  ;;  %v9188_v9 = vpop.f32.mrf.mxu1  ;;  %7719 = vmatpush3.bf16.msra.mxu0 %v8202_v37 }
  0xf3   : > { %v1353_v47 = vmax.f32 %v857_v42, 0.0  ;;  %v1479_v52 = vpack.c.bf16 %v1355_v43, %v1354_v48  ;;  %v878_v57 = vadd.f32 %v7446_v44, %v9152_v19 }
  0xf4   : > { %v869_v49 = vpop.f32.mrf.mxu0  ;;  %v9193_v14 = vpop.f32.mrf.mxu1 }
  0xf5   : > { %v1478_v51 = vpack.c.bf16 %v1353_v47, %v1352_v46  ;;  %v870_v55 = vadd.f32 %v9152_v19, %v869_v49  ;;  %v1358_v3 = vmax.f32 %v878_v57, 0.0 }
  0xf6   : > { %v7447_v53 = vpop.f32.mrf.mxu0  ;;  %v9196_v18 = vpop.f32.mrf.mxu1 }
  0xf7   : > { %v881_v56 = vadd.f32 %v7447_v53, %v9152_v19  ;;  %7584 = vmatprep.mubr.bf16.mxu1 %v1478_v51  ;;  %v1356_v1 = vmax.f32 %v870_v55, 0.0 }
  0xf8   : > { %v872_v58 = vpop.f32.mrf.mxu0  ;;  %7585 = vmatmul.mubr.bf16.gmra.mxu1 %v1479_v52  ;;  %v9198_v24 = vpop.f32.mrf.mxu1 }
  0xf9   : > { %v873_v60 = vadd.f32 %v9152_v19, %v872_v58  ;;  %v1359_v62 = vmax.f32 %v881_v56, 0.0 }
  0xfa   : > { %v7450_v63 = vpop.f32.mrf.mxu0  ;;  %v9200_v28 = vpop.f32.mrf.mxu1 }
  0xfb   : > { %v1357_v2 = vmax.f32 %v873_v60, 0.0  ;;  %v1481_v7 = vpack.c.bf16 %v1359_v62, %v1358_v3  ;;  %v894_v12 = vadd.f32 %v7450_v63, %v9152_v19 }
  0xfc   : > { %v885_v4 = vpop.f32.mrf.mxu0  ;;  %v9205_v33 = vpop.f32.mrf.mxu1 }
  0xfd   : > { %v1480_v6 = vpack.c.bf16 %v1357_v2, %v1356_v1  ;;  %v886_v10 = vadd.f32 %v9152_v19, %v885_v4  ;;  %v1362_v22 = vmax.f32 %v894_v12, 0.0 }
  0xfe   : > { %v7451_v8 = vpop.f32.mrf.mxu0  ;;  %v9214_v40 = vpop.f32.mrf.mxu1 }
  0xff   : > { %v897_v11 = vadd.f32 %v7451_v8, %v9152_v19  ;;  %7588 = vmatprep.mubr.bf16.mxu1 %v1480_v6  ;;  %v1360_v20 = vmax.f32 %v886_v10, 0.0 }
 0x100   : > { %v888_v13 = vpop.f32.mrf.mxu0  ;;  %7589 = vmatmul.mubr.bf16.gmra.mxu1 %v1481_v7  ;;  %v9216_v47 = vpop.f32.mrf.mxu1 }
 0x101   : > { %v889_v15 = vadd.f32 %v9152_v19, %v888_v13  ;;  %v1363_v16 = vmax.f32 %v897_v11, 0.0 }
 0x102   : > { %v7454_v17 = vpop.f32.mrf.mxu0  ;;  %v9218_v52 = vpop.f32.mrf.mxu1 }
 0x103   : > { %v1361_v21 = vmax.f32 %v889_v15, 0.0  ;;  %v1483_v26 = vpack.c.bf16 %v1363_v16, %v1362_v22  ;;  %v910_v31 = vadd.f32 %v7454_v17, %v9152_v19 }
 0x104   : > { %v901_v23 = vpop.f32.mrf.mxu0  ;;  %v9223_v58 = vpop.f32.mrf.mxu1 }
 0x105   : > { %v1482_v25 = vpack.c.bf16 %v1361_v21, %v1360_v20  ;;  %v902_v29 = vadd.f32 %v9152_v19, %v901_v23  ;;  %v1366_v44 = vmax.f32 %v910_v31, 0.0  ;;  %v8203_v21 = vld [vmem:[%s11001_s5 + $0x8] sm:$0xff]  }
 0x106   : > { %v7455_v27 = vpop.f32.mrf.mxu0  ;;  %v9226_v63 = vpop.f32.mrf.mxu1  ;;  %7720 = vmatprep.subr.bf16.mxu0 %v8203_v21 }
 0x107   : > { %v913_v30 = vadd.f32 %v7455_v27, %v9152_v19  ;;  %7592 = vmatprep.mubr.bf16.mxu1 %v1482_v25  ;;  %v1364_v42 = vmax.f32 %v902_v29, 0.0  ;;  %7721 = vmatpush3.bf16.msra.mxu0 %v8203_v21 }
 0x108   : > { %v904_v32 = vpop.f32.mrf.mxu0  ;;  %7593 = vmatmul.mubr.bf16.gmra.mxu1 %v1483_v26  ;;  %v9228_v6 = vpop.f32.mrf.mxu1 }
 0x109   : > { %v905_v34 = vadd.f32 %v9152_v19, %v904_v32  ;;  %v1367_v38 = vmax.f32 %v913_v30, 0.0 }
 0x10a   : > { %v7458_v39 = vpop.f32.mrf.mxu0  ;;  %v9230_v11 = vpop.f32.mrf.mxu1 }
 0x10b   : > { %v1365_v43 = vmax.f32 %v905_v34, 0.0  ;;  %v1485_v49 = vpack.c.bf16 %v1367_v38, %v1366_v44  ;;  %v926_v56 = vadd.f32 %v7458_v39, %v9152_v19 }
 0x10c   : > { %v917_v46 = vpop.f32.mrf.mxu0  ;;  %v9235_v17 = vpop.f32.mrf.mxu1 }
 0x10d   : > { %v1484_v48 = vpack.c.bf16 %v1365_v43, %v1364_v42  ;;  %v918_v53 = vadd.f32 %v9152_v19, %v917_v46  ;;  %v1370_v3 = vmax.f32 %v926_v56, 0.0 }
 0x10e   : > { %v7459_v51 = vpop.f32.mrf.mxu0  ;;  %v9241_v25 = vpop.f32.mrf.mxu1 }
 0x10f   : > { %v929_v55 = vadd.f32 %v7459_v51, %v9152_v19  ;;  %7596 = vmatprep.mubr.bf16.mxu1 %v1484_v48  ;;  %v1368_v1 = vmax.f32 %v918_v53, 0.0 }
 0x110   : > { %v920_v57 = vpop.f32.mrf.mxu0  ;;  %7597 = vmatmul.mubr.bf16.gmra.mxu1 %v1485_v49  ;;  %v9243_v31 = vpop.f32.mrf.mxu1 }
 0x111   : > { %v921_v60 = vadd.f32 %v9152_v19, %v920_v57  ;;  %v1371_v61 = vmax.f32 %v929_v55, 0.0 }
 0x112   : > { %v7462_v62 = vpop.f32.mrf.mxu0  ;;  %v9245_v37 = vpop.f32.mrf.mxu1 }
 0x113   : > { %v1369_v2 = vmax.f32 %v921_v60, 0.0  ;;  %v1487_v8 = vpack.c.bf16 %v1371_v61, %v1370_v3  ;;  %v942_v15 = vadd.f32 %v7462_v62, %v9152_v19 }
 0x114   : > { %v933_v4 = vpop.f32.mrf.mxu0  ;;  %v9250_v44 = vpop.f32.mrf.mxu1 }
 0x115   : > { %v1486_v7 = vpack.c.bf16 %v1369_v2, %v1368_v1  ;;  %v934_v12 = vadd.f32 %v9152_v19, %v933_v4  ;;  %v1374_v29 = vmax.f32 %v942_v15, 0.0  ;;  %v8205_v15 = vld [vmem:[%s11001_s5] sm:$0xff]  }
 0x116   : > { %v7463_v10 = vpop.f32.mrf.mxu0  ;;  %v9253_v51 = vpop.f32.mrf.mxu1  ;;  %7722 = vmatprep.subr.bf16.mxu0 %v8205_v15 }
 0x117   : > { %v945_v13 = vadd.f32 %v7463_v10, %v9152_v19  ;;  %7600 = vmatprep.mubr.bf16.mxu1 %v1486_v7  ;;  %v1372_v26 = vmax.f32 %v934_v12, 0.0  ;;  %7723 = vmatpush3.bf16.msra.mxu0 %v8205_v15 }
 0x118   : > { %v936_v16 = vpop.f32.mrf.mxu0  ;;  %7601 = vmatmul.mubr.bf16.gmra.mxu1 %v1487_v8  ;;  %v9255_v60 = vpop.f32.mrf.mxu1 }
 0x119   : > { %v937_v20 = vadd.f32 %v9152_v19, %v936_v16  ;;  %v1375_v22 = vmax.f32 %v945_v13, 0.0  ;;  %v8204_v13 = vld [vmem:[%s11003_s7 + $0x30] sm:$0xff]  }
 0x11a   : > { %v7466_v23 = vpop.f32.mrf.mxu0  ;;  %v9257_v2 = vpop.f32.mrf.mxu1  ;;  %7854 = vmatprep.subr.bf16.mxu1 %v8204_v13 }
 0x11b   : > { %v1373_v27 = vmax.f32 %v937_v20, 0.0  ;;  %v1489_v34 = vpack.c.bf16 %v1375_v22, %v1374_v29  ;;  %v958_v42 = vadd.f32 %v7466_v23, %v9152_v19  ;;  %7855 = vmatpush3.bf16.msra.mxu1 %v8204_v13 }
 0x11c   : > { %v949_v30 = vpop.f32.mrf.mxu0  ;;  %v9262_v10 = vpop.f32.mrf.mxu1 }
 0x11d   : > { %v1488_v32 = vpack.c.bf16 %v1373_v27, %v1372_v26  ;;  %v950_v38 = vadd.f32 %v9152_v19, %v949_v30  ;;  %v1378_v56 = vmax.f32 %v958_v42, 0.0 }
 0x11e   : > { %v7467_v35 = vpop.f32.mrf.mxu0  ;;  %v9271_v21 = vpop.f32.mrf.mxu1 }
 0x11f   : > { %v961_v39 = vadd.f32 %v7467_v35, %v9152_v19  ;;  %7604 = vmatprep.mubr.bf16.mxu1 %v1488_v32  ;;  %v1376_v53 = vmax.f32 %v950_v38, 0.0 }
 0x120   : > { %v952_v43 = vpop.f32.mrf.mxu0  ;;  %7605 = vmatmul.mubr.bf16.gmra.mxu1 %v1489_v34  ;;  %v9273_v34 = vpop.f32.mrf.mxu1 }
 0x121   : > { %v953_v46 = vadd.f32 %v9152_v19, %v952_v43  ;;  %v1379_v48 = vmax.f32 %v961_v39, 0.0 }
 0x122   : > { %v7470_v49 = vpop.f32.mrf.mxu0 }
 0x123   : > { %v1377_v55 = vmax.f32 %v953_v46, 0.0  ;;  %v1491_v62 = vpack.c.bf16 %v1379_v48, %v1378_v56  ;;  %v974_v7 = vadd.f32 %v7470_v49, %v9152_v19  ;;  %v9279_v49 = vpop.f32.mrf.mxu1 }
 0x124   : > { %v965_v57 = vpop.f32.mrf.mxu0 }
 0x125   : > { %v1490_v61 = vpack.c.bf16 %v1377_v55, %v1376_v53  ;;  %v966_v3 = vadd.f32 %v9152_v19, %v965_v57  ;;  %v1382_v26 = vmax.f32 %v974_v7, 0.0 }
 0x126   : > { %v7471_v1 = vpop.f32.mrf.mxu0 }
 0x127   : > { %v977_v4 = vadd.f32 %v7471_v1, %v9152_v19  ;;  %7608 = vmatprep.mubr.bf16.mxu1 %v1490_v61  ;;  %v1380_v22 = vmax.f32 %v966_v3, 0.0  ;;  %v9281_v3 = vpop.f32.mrf.mxu1 }
 0x128   : > { %v968_v8 = vpop.f32.mrf.mxu0  ;;  %7609 = vmatmul.mubr.bf16.gmra.mxu1 %v1491_v62 }
 0x129   : > { %v969_v12 = vadd.f32 %v9152_v19, %v968_v8  ;;  %v1383_v16 = vmax.f32 %v977_v4, 0.0 }
 0x12a   : > { %v7474_v20 = vpop.f32.mrf.mxu0 }
 0x12b   : > { %v1381_v23 = vmax.f32 %v969_v12, 0.0  ;;  %v1493_v30 = vpack.c.bf16 %v1383_v16, %v1382_v26  ;;  %v990_v39 = vadd.f32 %v7474_v20, %v9152_v19  ;;  %v9287_v20 = vpop.f32.mrf.mxu1 }
 0x12c   : > { %v981_v27 = vpop.f32.mrf.mxu0 }
 0x12d   : > { %v1492_v29 = vpack.c.bf16 %v1381_v23, %v1380_v22  ;;  %v982_v35 = vadd.f32 %v9152_v19, %v981_v27  ;;  %v1386_v56 = vmax.f32 %v990_v39, 0.0 }
 0x12e   : > { %v7475_v32 = vpop.f32.mrf.mxu0 }
 0x12f   : > { %v993_v38 = vadd.f32 %v7475_v32, %v9152_v19  ;;  %7612 = vmatprep.mubr.bf16.mxu1 %v1492_v29  ;;  %v1384_v53 = vmax.f32 %v982_v35, 0.0  ;;  %v9289_v35 = vpop.f32.mrf.mxu1 }
 0x130   : > { %v984_v42 = vpop.f32.mrf.mxu0  ;;  %7613 = vmatmul.mubr.bf16.gmra.mxu1 %v1493_v30 }
 0x131   : > { %v985_v43 = vadd.f32 %v9152_v19, %v984_v42  ;;  %v1387_v46 = vmax.f32 %v993_v38, 0.0 }
 0x132   : > { %v7478_v48 = vpop.f32.mrf.mxu0 }
 0x133   : > { %v1385_v55 = vmax.f32 %v985_v43, 0.0  ;;  %v1495_v62 = vpack.c.bf16 %v1387_v46, %v1386_v56  ;;  %v1006_v8 = vadd.f32 %v7478_v48, %v9152_v19 }
 0x134   : > { %v997_v57 = vpop.f32.mrf.mxu0 }
 0x135   : > { %v1494_v61 = vpack.c.bf16 %v1385_v55, %v1384_v53  ;;  %v998_v4 = vadd.f32 %v9152_v19, %v997_v57  ;;  %v1390_v26 = vmax.f32 %v1006_v8, 0.0  ;;  %v9295_v55 = vpop.f32.mrf.mxu1 }
 0x136   : > { %v7479_v1 = vpop.f32.mrf.mxu0 }
 0x137   : > { %v1009_v7 = vadd.f32 %v7479_v1, %v9152_v19  ;;  %7616 = vmatprep.mubr.bf16.mxu1 %v1494_v61  ;;  %v1388_v22 = vmax.f32 %v998_v4, 0.0  ;;  %v9297_v8 = vpop.f32.mrf.mxu1 }
 0x138   : > { %v1000_v12 = vpop.f32.mrf.mxu0  ;;  %7617 = vmatmul.mubr.bf16.gmra.mxu1 %v1495_v62 }
 0x139   : > { %v1001_v13 = vadd.f32 %v9152_v19, %v1000_v12  ;;  %v1391_v15 = vmax.f32 %v1009_v7, 0.0 }
 0x13a   : > { %v7482_v16 = vpop.f32.mrf.mxu0 }
 0x13b   : > { %v1389_v23 = vmax.f32 %v1001_v13, 0.0  ;;  %v1497_v30 = vpack.c.bf16 %v1391_v15, %v1390_v26  ;;  %v1022_v42 = vadd.f32 %v7482_v16, %v9152_v19 }
 0x13c   : > { %v1013_v27 = vpop.f32.mrf.mxu0 }
 0x13d   : > { %v1496_v29 = vpack.c.bf16 %v1389_v23, %v1388_v22  ;;  %v1014_v38 = vadd.f32 %v9152_v19, %v1013_v27  ;;  %v1394_v61 = vmax.f32 %v1022_v42, 0.0  ;;  %v9303_v27 = vpop.f32.mrf.mxu1  ;;  %v8206_v42 = vld [vmem:[%s11003_s7 + $0x28] sm:$0xff]  }
 0x13e   : > { %v7483_v32 = vpop.f32.mrf.mxu0  ;;  %7856 = vmatprep.subr.bf16.mxu1 %v8206_v42 }
 0x13f   : > { %v1025_v39 = vadd.f32 %v7483_v32, %v9152_v19  ;;  %7620 = vmatprep.mubr.bf16.mxu1 %v1496_v29  ;;  %v1392_v56 = vmax.f32 %v1014_v38, 0.0  ;;  %7857 = vmatpush3.bf16.msra.mxu1 %v8206_v42 }
 0x140   : > { %v1016_v43 = vpop.f32.mrf.mxu0  ;;  %7621 = vmatmul.mubr.bf16.gmra.mxu1 %v1497_v30 }
 0x141   : > { %v1017_v46 = vadd.f32 %v9152_v19, %v1016_v43  ;;  %v1395_v48 = vmax.f32 %v1025_v39, 0.0 }
 0x142   : > { %v7486_v53 = vpop.f32.mrf.mxu0 }
 0x143   : > { %v1393_v57 = vmax.f32 %v1017_v46, 0.0  ;;  %v1499_v4 = vpack.c.bf16 %v1395_v48, %v1394_v61  ;;  %v1038_v15 = vadd.f32 %v7486_v53, %v9152_v19  ;;  %v9308_v48 = vpop.f32.mrf.mxu1 }
 0x144   : > { %v1029_v62 = vpop.f32.mrf.mxu0 }
 0x145   : > { %v1498_v1 = vpack.c.bf16 %v1393_v57, %v1392_v56  ;;  %v1030_v12 = vadd.f32 %v9152_v19, %v1029_v62  ;;  %v1398_v32 = vmax.f32 %v1038_v15, 0.0 }
 0x146   : > { %v7487_v7 = vpop.f32.mrf.mxu0 }
 0x147   : > { %v1041_v13 = vadd.f32 %v7487_v7, %v9152_v19  ;;  %7624 = vmatprep.mubr.bf16.mxu1 %v1498_v1  ;;  %v1396_v29 = vmax.f32 %v1030_v12, 0.0  ;;  %v9314_v7 = vpop.f32.mrf.mxu1 }
 0x148   : > { %v1032_v16 = vpop.f32.mrf.mxu0  ;;  %7625 = vmatmul.mubr.bf16.gmra.mxu1 %v1499_v4 }
 0x149   : > { %v1033_v22 = vadd.f32 %v9152_v19, %v1032_v16  ;;  %v1399_v23 = vmax.f32 %v1041_v13, 0.0 }
 0x14a   : > { %v7490_v26 = vpop.f32.mrf.mxu0 }
 0x14b   : > { %v1397_v30 = vmax.f32 %v1033_v22, 0.0  ;;  %v1501_v43 = vpack.c.bf16 %v1399_v23, %v1398_v32  ;;  %v1054_v57 = vadd.f32 %v7490_v26, %v9152_v19 }
 0x14c   : > { %v1045_v38 = vpop.f32.mrf.mxu0 }
 0x14d   : > { %v1500_v39 = vpack.c.bf16 %v1397_v30, %v1396_v29  ;;  %v1046_v53 = vadd.f32 %v9152_v19, %v1045_v38  ;;  %v1402_v15 = vmax.f32 %v1054_v57, 0.0  ;;  %v9316_v30 = vpop.f32.mrf.mxu1 }
 0x14e   : > { %v7491_v46 = vpop.f32.mrf.mxu0 }
 0x14f   : > { %v1057_v56 = vadd.f32 %v7491_v46, %v9152_v19  ;;  %7628 = vmatprep.mubr.bf16.mxu1 %v1500_v39  ;;  %v1400_v12 = vmax.f32 %v1046_v53, 0.0  ;;  %v9322_v53 = vpop.f32.mrf.mxu1 }
 0x150   : > { %v1048_v61 = vpop.f32.mrf.mxu0  ;;  %7629 = vmatmul.mubr.bf16.gmra.mxu1 %v1501_v43 }
 0x151   : > { %v1049_v62 = vadd.f32 %v9152_v19, %v1048_v61  ;;  %v1403_v1 = vmax.f32 %v1057_v56, 0.0 }
 0x152   : > { %v7494_v4 = vpop.f32.mrf.mxu0 }
 0x153   : > { %v1401_v13 = vmax.f32 %v1049_v62, 0.0  ;;  %v1503_v23 = vpack.c.bf16 %v1403_v1, %v1402_v15  ;;  %v1070_v38 = vadd.f32 %v7494_v4, %v9152_v19  ;;  %v9324_v15 = vpop.f32.mrf.mxu1  ;;  %v1094_v4 = vadd.f32 %v9152_v19, %v9166_v41 }
 0x154   : > { %v1061_v16 = vpop.f32.mrf.mxu0 }
 0x155   : > { %v1502_v22 = vpack.c.bf16 %v1401_v13, %v1400_v12  ;;  %v1062_v26 = vadd.f32 %v9152_v19, %v1061_v16  ;;  %v1406_v61 = vmax.f32 %v1070_v38, 0.0  ;;  %v1097_v16 = vadd.f32 %v9152_v19, %v9171_v50 }
 0x156   : > { %v7495_v29 = vpop.f32.mrf.mxu0 }
 0x157   : > { %v1073_v32 = vadd.f32 %v7495_v29, %v9152_v19  ;;  %7632 = vmatprep.mubr.bf16.mxu1 %v1502_v22  ;;  %v1404_v56 = vmax.f32 %v1062_v26, 0.0 }
 0x158   : > { %v1064_v39 = vpop.f32.mrf.mxu0  ;;  %7633 = vmatmul.mubr.bf16.gmra.mxu1 %v1503_v23 }
 0x159   : > { %v1065_v42 = vadd.f32 %v9152_v19, %v1064_v39  ;;  %v1407_v43 = vmax.f32 %v1073_v32, 0.0  ;;  %v9334_v39 = vpop.f32.mrf.mxu1 }
 0x15a   : > { %v7498_v46 = vpop.f32.mrf.mxu0 }
 0x15b   : > { %v1405_v57 = vmax.f32 %v1065_v42, 0.0  ;;  %v1505_v12 = vpack.c.bf16 %v1407_v43, %v1406_v61  ;;  %v1086_v29 = vadd.f32 %v7498_v46, %v9152_v19  ;;  %v1412_v42 = vmax.f32 %v1094_v4, 0.0 }
 0x15c   : > { %v1077_v62 = vpop.f32.mrf.mxu0  ;;  %v1413_v43 = vmax.f32 %v1097_v16, 0.0  ;;  %v1102_v61 = vadd.f32 %v9161_v36, %v9152_v19 }
 0x15d   : > { %v1504_v1 = vpack.c.bf16 %v1405_v57, %v1404_v56  ;;  %v1078_v22 = vadd.f32 %v9152_v19, %v1077_v62  ;;  %v1410_v57 = vmax.f32 %v1086_v29, 0.0  ;;  %v1105_v62 = vadd.f32 %v9169_v45, %v9152_v19  ;;  %v8207_v45 = vld [vmem:[%s11003_s7 + $0x20] sm:$0xff]  }
 0x15e   : > { %v7499_v13 = vpop.f32.mrf.mxu0  ;;  %v1508_v4 = vpack.c.bf16 %v1413_v43, %v1412_v42  ;;  %v1414_v16 = vmax.f32 %v1102_v61, 0.0  ;;  %v1129_v42 = vadd.f32 %v9152_v19, %v9198_v24  ;;  %7858 = vmatprep.subr.bf16.mxu1 %v8207_v45  ;;  %v1134_v61 = vadd.f32 %v9188_v9, %v9152_v19 }
 0x15f   : > { %v1089_v23 = vadd.f32 %v7499_v13, %v9152_v19  ;;  %7636 = vmatprep.mubr.bf16.mxu1 %v1504_v1  ;;  %v1408_v41 = vmax.f32 %v1078_v22, 0.0  ;;  %v9340_v1 = vpop.f32.mrf.mxu1  ;;  %v1113_v13 = vadd.f32 %v9152_v19, %v9186_v5  ;;  %v1415_v22 = vmax.f32 %v1105_v62, 0.0  ;;  %7859 = vmatpush3.bf16.msra.mxu1 %v8207_v45 }
 0x160   : > { %v1080_v26 = vpop.f32.mrf.mxu0  ;;  %7637 = vmatmul.mubr.bf16.gmra.mxu1 %v1505_v12  ;;  %v1110_v12 = vadd.f32 %v9152_v19, %v9178_v59  ;;  %v1118_v59 = vadd.f32 %v9173_v54, %v9152_v19  ;;  %v1121_v5 = vadd.f32 %v9184_v0, %v9152_v19  ;;  %v1142_v24 = vadd.f32 %v9152_v19, %v9205_v33 }
 0x161   : > { %v1081_v32 = vadd.f32 %v9152_v19, %v1080_v26  ;;  %v1411_v38 = vmax.f32 %v1089_v23, 0.0  ;;  %v9346_v23 = vpop.f32.mrf.mxu1  ;;  %v1417_v29 = vmax.f32 %v1113_v13, 0.0  ;;  %v1509_v26 = vpack.c.bf16 %v1415_v22, %v1414_v16 }
 0x162   : > { %v1416_v36 = vmax.f32 %v1110_v12, 0.0  ;;  %v1422_v13 = vmax.f32 %v1134_v61, 0.0  ;;  %v1424_v22 = vmax.f32 %v1142_v24, 0.0  ;;  %v1161_v45 = vadd.f32 %v9152_v19, %v9228_v6 }
 0x163   : > { %v1409_v56 = vmax.f32 %v1081_v32, 0.0  ;;  %v1507_v46 = vpack.c.bf16 %v1411_v38, %v1410_v57  ;;  %v9355_v32 = vpop.f32.mrf.mxu1  ;;  %v1126_v38 = vadd.f32 %v9152_v19, %v9193_v14  ;;  %v1137_v14 = vadd.f32 %v9196_v18, %v9152_v19 }
 0x164   : > { %v1510_v43 = vpack.c.bf16 %v1417_v29, %v1416_v36  ;;  %v1150_v18 = vadd.f32 %v9200_v28, %v9152_v19  ;;  %v1153_v29 = vadd.f32 %v9214_v40, %v9152_v19  ;;  %v1429_v28 = vmax.f32 %v1161_v45, 0.0 }
 0x165   : > { %v1506_v50 = vpack.c.bf16 %v1409_v56, %v1408_v41  ;;  %v1418_v41 = vmax.f32 %v1118_v59, 0.0  ;;  %v1419_v56 = vmax.f32 %v1121_v5, 0.0  ;;  %v9361_v57 = vpop.f32.mrf.mxu1  ;;  %v1420_v54 = vmax.f32 %v1126_v38, 0.0 }
 0x166   : > { %v1426_v59 = vmax.f32 %v1150_v18, 0.0  ;;  %v1427_v5 = vmax.f32 %v1153_v29, 0.0  ;;  %v1166_v40 = vadd.f32 %v9218_v52, %v9152_v19  ;;  %v1174_v6 = vadd.f32 %v9152_v19, %v9235_v17 }
 0x167   : > { %7640 = vmatprep.mubr.bf16.mxu1 %v1506_v50  ;;  %v1421_v50 = vmax.f32 %v1129_v42, 0.0  ;;  %v1511_v0 = vpack.c.bf16 %v1419_v56, %v1418_v41  ;;  %v9367_v62 = vpop.f32.mrf.mxu1  ;;  %v1169_v41 = vadd.f32 %v9226_v63, %v9152_v19  ;;  %v1177_v56 = vadd.f32 %v9152_v19, %v9243_v31  ;;  %v8208_v63 = vld [vmem:[%s11003_s7 + $0x18] sm:$0xff]  }
 0x168   : > { %7641 = vmatmul.mubr.bf16.gmra.mxu1 %v1507_v46  ;;  %v1145_v46 = vadd.f32 %v9152_v19, %v9216_v47  ;;  %v1158_v47 = vadd.f32 %v9152_v19, %v9223_v58  ;;  %v1182_v17 = vadd.f32 %v9230_v11, %v9152_v19  ;;  %v1185_v31 = vadd.f32 %v9241_v25, %v9152_v19 }
 0x169   : > { %7644 = vmatprep.mubr.bf16.mxu1 %v1508_v4  ;;  %v1512_v12 = vpack.c.bf16 %v1421_v50, %v1420_v54  ;;  %v1423_v4 = vmax.f32 %v1137_v14, 0.0  ;;  %v9373_v16 = vpop.f32.mrf.mxu1  ;;  %v1430_v50 = vmax.f32 %v1166_v40, 0.0  ;;  %v1432_v14 = vmax.f32 %v1174_v6, 0.0  ;;  %7860 = vmatprep.subr.bf16.mxu1 %v8208_v63 }
 0x16a   : > { %v1425_v9 = vmax.f32 %v1145_v46, 0.0  ;;  %v1428_v42 = vmax.f32 %v1158_v47, 0.0  ;;  %v1433_v52 = vmax.f32 %v1177_v56, 0.0  ;;  %7861 = vmatpush3.bf16.msra.mxu1 %v8208_v63  ;;  %v1198_v29 = vadd.f32 %v9245_v37, %v9152_v19 }
 0x16b   : > { %v1513_v36 = vpack.c.bf16 %v1423_v4, %v1422_v13  ;;  %v9379_v33 = vpop.f32.mrf.mxu1  ;;  %v1193_v13 = vadd.f32 %v9152_v19, %v9255_v60  ;;  %v1206_v60 = vadd.f32 %v9152_v19, %v9262_v10  ;;  %v1209_v45 = vadd.f32 %v9152_v19, %v9273_v34 }
 0x16c   : > { %v1516_v54 = vpack.c.bf16 %v1429_v28, %v1428_v42  ;;  %v1518_v4 = vpack.c.bf16 %v1433_v52, %v1432_v14  ;;  %v1217_v40 = vadd.f32 %v9271_v21, %v9152_v19  ;;  %v1222_v34 = vadd.f32 %v9152_v19, %v9281_v3 }
 0x16d   : > { %v9385_v38 = vpop.f32.mrf.mxu1  ;;  %v1437_v18 = vmax.f32 %v1193_v13, 0.0  ;;  %v1440_v28 = vmax.f32 %v1206_v60, 0.0  ;;  %v1441_v37 = vmax.f32 %v1209_v45, 0.0  ;;  %v1230_v21 = vadd.f32 %v9279_v49, %v9152_v19 }
 0x16e   : > { %v1233_v52 = vadd.f32 %v9287_v20, %v9152_v19  ;;  %v1241_v63 = vadd.f32 %v9152_v19, %v9308_v48  ;;  %v8209_v20 = vld [vmem:[%s11003_s7 + $0x10] sm:$0xff]   ;;  %v1249_v48 = vadd.f32 %v9303_v27, %v9152_v19  ;;  %v9466_v27 = vld [vmem:[%s11000_s4] ss:$0 sm:$0xff] }
 0x16f   : > { %v9391_v58 = vpop.f32.mrf.mxu1  ;;  %v1522_v6 = vpack.c.bf16 %v1441_v37, %v1440_v28  ;;  %7862 = vmatprep.subr.bf16.mxu1 %v8209_v20  ;;  %v1265_v28 = vadd.f32 %v9322_v53, %v9152_v19 }
 0x170   : > { %7645 = vmatmul.mubr.bf16.gmra.mxu1 %v1509_v26  ;;  %v1514_v26 = vpack.c.bf16 %v1425_v9, %v1424_v22  ;;  %v1434_v22 = vmax.f32 %v1182_v17, 0.0  ;;  %v1435_v9 = vmax.f32 %v1185_v31, 0.0  ;;  %v1446_v17 = vmax.f32 %v1230_v21, 0.0 }
 0x171   : > { %7648 = vmatprep.mubr.bf16.mxu1 %v1510_v43  ;;  %v1515_v43 = vpack.c.bf16 %v1427_v5, %v1426_v59  ;;  %v9397_v61 = vpop.f32.mrf.mxu1  ;;  %v1438_v59 = vmax.f32 %v1198_v29, 0.0  ;;  %v1447_v31 = vmax.f32 %v1233_v52, 0.0  ;;  %v1449_v49 = vmax.f32 %v1241_v63, 0.0  ;;  %7863 = vmatpush3.bf16.msra.mxu1 %v8209_v20 }
 0x172   : > { %v1519_v25 = vpack.c.bf16 %v1435_v9, %v1434_v22  ;;  %v1254_v9 = vadd.f32 %v9152_v19, %v9316_v30  ;;  %v1455_v53 = vmax.f32 %v1265_v28, 0.0 }
 0x173   : > { %v9406_v46 = vpop.f32.mrf.mxu1 }
 0x174   : > { %v1452_v60 = vmax.f32 %v1254_v9, 0.0 }
 0x178   : > { %7649 = vmatmul.mubr.bf16.gmra.mxu1 %v1511_v0  ;;  %v1431_v0 = vmax.f32 %v1169_v41, 0.0  ;;  %v1225_v41 = vadd.f32 %v9152_v19, %v9289_v35  ;;  %v1238_v35 = vadd.f32 %v9152_v19, %v9297_v8  ;;  %v1246_v8 = vadd.f32 %v9295_v55, %v9152_v19 }
 0x179   : > { %7652 = vmatprep.mubr.bf16.mxu1 %v1512_v12  ;;  %v1190_v12 = vadd.f32 %v9152_v19, %v9250_v44  ;;  %v1201_v44 = vadd.f32 %v9253_v51, %v9152_v19  ;;  %v1214_v51 = vadd.f32 %v9257_v2, %v9152_v19 }
 0x17a   : > { %v1517_v24 = vpack.c.bf16 %v1431_v0, %v1430_v50  ;;  %v1444_v0 = vmax.f32 %v1222_v34, 0.0  ;;  %v1445_v2 = vmax.f32 %v1225_v41, 0.0  ;;  %v1448_v13 = vmax.f32 %v1238_v35, 0.0 }
 0x17b   : > { %v1436_v11 = vmax.f32 %v1190_v12, 0.0  ;;  %v1439_v5 = vmax.f32 %v1201_v44, 0.0  ;;  %v1442_v56 = vmax.f32 %v1214_v51, 0.0  ;;  %v1450_v29 = vmax.f32 %v1246_v8, 0.0 }
 0x17c   : > { %v1451_v44 = vmax.f32 %v1249_v48, 0.0  ;;  %v1270_v51 = vadd.f32 %v9152_v19, %v9340_v1 }
 0x17e   : > { %v1456_v21 = vmax.f32 %v1270_v51, 0.0 }
 0x180   : > { %7653 = vmatmul.mubr.bf16.gmra.mxu1 %v1513_v36  ;;  %v9412_v36 = vpop.f32.mrf.mxu1 }
 0x181   : > { %7656 = vmatprep.mubr.bf16.mxu1 %v1514_v26  ;;  %v1520_v26 = vpack.c.bf16 %v1437_v18, %v1436_v11  ;;  %v1257_v11 = vadd.f32 %v9152_v19, %v9324_v15  ;;  %v1526_v18 = vpack.c.bf16 %v1449_v49, %v1448_v13  ;;  %v1281_v13 = vadd.f32 %v9346_v23, %v9152_v19 }
 0x182   : > { %v9418_v47 = vpop.f32.mrf.mxu1 }
 0x183   : > { %v1453_v45 = vmax.f32 %v1257_v11, 0.0 }
 0x184   : > { %v9424_v42 = vpop.f32.mrf.mxu1 }
 0x185   : > { %v1528_v41 = vpack.c.bf16 %v1453_v45, %v1452_v60 }
 0x186   : > { %v9430_v10 = vpop.f32.mrf.mxu1 }
 0x188   : > { %7657 = vmatmul.mubr.bf16.gmra.mxu1 %v1515_v43  ;;  %v1521_v43 = vpack.c.bf16 %v1439_v5, %v1438_v59  ;;  %v9436_v50 = vpop.f32.mrf.mxu1  ;;  %v1527_v59 = vpack.c.bf16 %v1451_v44, %v1450_v29  ;;  %v1262_v5 = vadd.f32 %v9314_v7, %v9152_v19  ;;  %v1459_v29 = vmax.f32 %v1281_v13, 0.0 }
 0x189   : > { %7660 = vmatprep.mubr.bf16.mxu1 %v1516_v54  ;;  %v1443_v54 = vmax.f32 %v1217_v40, 0.0  ;;  %v1273_v40 = vadd.f32 %v9152_v19, %v9355_v32 }
 0x18a   : > { %v9442_v3 = vpop.f32.mrf.mxu1 }
 0x18b   : > { %v1523_v14 = vpack.c.bf16 %v1443_v54, %v1442_v56  ;;  %v1457_v52 = vmax.f32 %v1273_v40, 0.0 }
 0x18c   : > { %v9448_v12 = vpop.f32.mrf.mxu1 }
 0x18d   : > { %v1530_v9 = vpack.c.bf16 %v1457_v52, %v1456_v21 }
 0x18e   : > { %v9457_v22 = vpop.f32.mrf.mxu1 }
 0x190   : > { %7661 = vmatmul.mubr.bf16.gmra.mxu1 %v1517_v24  ;;  %v1524_v24 = vpack.c.bf16 %v1445_v2, %v1444_v0  ;;  %v1454_v0 = vmax.f32 %v1262_v5, 0.0 }
 0x191   : > { %7664 = vmatprep.mubr.bf16.mxu1 %v1518_v4  ;;  %v1525_v4 = vpack.c.bf16 %v1447_v31, %v1446_v17  ;;  %v1278_v31 = vadd.f32 %v9334_v39, %v9152_v19 }
 0x192   : > { %v1529_v17 = vpack.c.bf16 %v1455_v53, %v1454_v0 }
 0x198   : > { %7665 = vmatmul.mubr.bf16.gmra.mxu1 %v1519_v25 }
 0x199   : > { %7668 = vmatprep.mubr.bf16.mxu1 %v1520_v26 }
 0x1a0   : > { %7669 = vmatmul.mubr.bf16.gmra.mxu1 %v1521_v43 }
 0x1a1   : > { %7672 = vmatprep.mubr.bf16.mxu1 %v1522_v6 }
 0x1a8   : > { %7673 = vmatmul.mubr.bf16.gmra.mxu1 %v1523_v14 }
 0x1a9   : > { %7676 = vmatprep.mubr.bf16.mxu1 %v1524_v24 }
 0x1b0   : > { %v7582_v25 = vpop.f32.mrf.mxu1  ;;  %7677 = vmatmul.mubr.bf16.gmra.mxu1 %v1525_v4  ;;  %v9490_v4 = vld [vmem:[%s10998_s2] ss:$0 sm:$0xff] }
 0x1b1   : > { %7680 = vmatprep.mubr.bf16.mxu1 %v1526_v18  ;;  %v1654_v37 = vadd.f32 %v7582_v25, %v9466_v27  ;;  %v1286_v8 = vadd.f32 %v9490_v4, %v9367_v62  ;;  %v1289_v48 = vadd.f32 %v9490_v4, %v9379_v33  ;;  %v1458_v25 = vmax.f32 %v1278_v31, 0.0 }
 0x1b2   : > { %v1645_v55 = vpop.f32.mrf.mxu1  ;;  %v1294_v5 = vadd.f32 %v9490_v4, %v9361_v57  ;;  %v1297_v28 = vadd.f32 %v9490_v4, %v9373_v16  ;;  %v1302_v51 = vadd.f32 %v9490_v4, %v9391_v58  ;;  %v1305_v40 = vadd.f32 %v9490_v4, %v9406_v46 }
 0x1b3   : > { %v1646_v26 = vadd.f32 %v9466_v27, %v1645_v55  ;;  %v2158_v2 = vmax.f32 %v1654_v37, 0.0  ;;  %v1460_v60 = vmax.f32 %v1286_v8, 0.0  ;;  %v1461_v45 = vmax.f32 %v1289_v48, 0.0 }
 0x1b4   : > { %v7583_v30 = vpop.f32.mrf.mxu1  ;;  %v1462_v16 = vmax.f32 %v1294_v5, 0.0  ;;  %v1318_v13 = vadd.f32 %v9490_v4, %v9418_v47 }
 0x1b5   : > { %v1657_v15 = vadd.f32 %v7583_v30, %v9466_v27  ;;  %v2156_v54 = vmax.f32 %v1646_v26, 0.0 }
 0x1b6   : > { %v1648_v43 = vpop.f32.mrf.mxu1 }
 0x1b7   : > { %v1649_v34 = vadd.f32 %v9466_v27, %v1648_v43  ;;  %v2159_v6 = vmax.f32 %v1657_v15, 0.0 }
 0x1b8   : > { %v7586_v56 = vpop.f32.mrf.mxu1  ;;  %7681 = vmatmul.mubr.bf16.gmra.mxu1 %v1527_v59  ;;  %v1531_v59 = vpack.c.bf16 %v1459_v29, %v1458_v25 }
 0x1b9   : > { %v2157_v7 = vmax.f32 %v1649_v34, 0.0  ;;  %7684 = vmatprep.mubr.bf16.mxu1 %v1528_v41  ;;  %v2285_v1 = vpack.c.bf16 %v2159_v6, %v2158_v2  ;;  %v1670_v49 = vadd.f32 %v7586_v56, %v9466_v27  ;;  %v1532_v41 = vpack.c.bf16 %v1461_v45, %v1460_v60 }
 0x1ba   : > { %v1661_v14 = vpop.f32.mrf.mxu1  ;;  %v1464_v2 = vmax.f32 %v1302_v51, 0.0  ;;  %v1326_v45 = vadd.f32 %v9490_v4, %v9412_v36 }
 0x1bb   : > { %v2284_v35 = vpack.c.bf16 %v2157_v7, %v2156_v54  ;;  %v1662_v32 = vadd.f32 %v9466_v27, %v1661_v14  ;;  %v2162_v44 = vmax.f32 %v1670_v49, 0.0  ;;  %v1463_v7 = vmax.f32 %v1297_v28, 0.0 }
 0x1bc   : > { %v7587_v63 = vpop.f32.mrf.mxu1  ;;  %v1465_v14 = vmax.f32 %v1305_v40, 0.0  ;;  %v1321_v49 = vadd.f32 %v9490_v4, %v9430_v10 }
 0x1bd   : > { %v1673_v24 = vadd.f32 %v7587_v63, %v9466_v27  ;;  %7724 = vmatprep.mubr.bf16.mxu0 %v2284_v35  ;;  %v2160_v23 = vmax.f32 %v1662_v32, 0.0  ;;  %v1533_v63 = vpack.c.bf16 %v1463_v7, %v1462_v16  ;;  %v1310_v32 = vadd.f32 %v9490_v4, %v9385_v38 }
 0x1be   : > { %v1664_v20 = vpop.f32.mrf.mxu1  ;;  %7725 = vmatmul.mubr.bf16.vlgmr.msra.gmra.mxu0 %v2285_v1  ;;  %v8210_v1 = vld [vmem:[%s11003_s7 + $0x8] sm:$0xff]   ;;  %v1534_v8 = vpack.c.bf16 %v1465_v14, %v1464_v2  ;;  %v1469_v47 = vmax.f32 %v1321_v49, 0.0 }
 0x1bf   : > { %v1665_v39 = vadd.f32 %v9466_v27, %v1664_v20  ;;  %v2163_v11 = vmax.f32 %v1673_v24, 0.0  ;;  %v1313_v24 = vadd.f32 %v9490_v4, %v9397_v61  ;;  %7864 = vmatprep.subr.bf16.mxu1 %v8210_v1  ;;  %v1466_v61 = vmax.f32 %v1310_v32, 0.0 }
 0x1c0   : > { %v7590_v19 = vpop.f32.mrf.mxu1  ;;  %7685 = vmatmul.mubr.bf16.gmra.mxu1 %v1529_v17 }
 0x1c1   : > { %v2161_v18 = vmax.f32 %v1665_v39, 0.0  ;;  %7688 = vmatprep.mubr.bf16.mxu1 %v1530_v9  ;;  %v2287_v62 = vpack.c.bf16 %v2163_v11, %v2162_v44  ;;  %v1686_v37 = vadd.f32 %v7590_v19, %v9466_v27  ;;  %7865 = vmatpush3.bf16.msra.mxu1 %v8210_v1  ;;  %v1467_v11 = vmax.f32 %v1313_v24, 0.0 }
 0x1c2   : > { %v1677_v55 = vpop.f32.mrf.mxu1 }
 0x1c3   : > { %v2286_v30 = vpack.c.bf16 %v2161_v18, %v2160_v23  ;;  %v1678_v33 = vadd.f32 %v9466_v27, %v1677_v55  ;;  %v2166_v0 = vmax.f32 %v1686_v37, 0.0  ;;  %v1468_v18 = vmax.f32 %v1318_v13, 0.0 }
 0x1c4   : > { %v7591_v26 = vpop.f32.mrf.mxu1  ;;  %v1535_v60 = vpack.c.bf16 %v1467_v11, %v1466_v61 }
 0x1c5   : > { %v1689_v15 = vadd.f32 %v7591_v26, %v9466_v27  ;;  %7728 = vmatprep.mubr.bf16.mxu0 %v2286_v30  ;;  %v2164_v57 = vmax.f32 %v1678_v33, 0.0  ;;  %v1329_v30 = vadd.f32 %v9490_v4, %v9424_v42  ;;  %v1334_v33 = vadd.f32 %v9490_v4, %v9442_v3  ;;  %v8211_v3 = vld [vmem:[%s11005_s9 + $0x38] sm:$0xff]  }
 0x1c6   : > { %v1680_v43 = vpop.f32.mrf.mxu1  ;;  %7729 = vmatmul.mubr.bf16.gmra.mxu0 %v2287_v62  ;;  %v1536_v5 = vpack.c.bf16 %v1469_v47, %v1468_v18  ;;  %v1470_v42 = vmax.f32 %v1326_v45, 0.0  ;;  %7996 = vmatprep.subr.bf16.mxu0 %v8211_v3 }
 0x1c7   : > { %v1681_v34 = vadd.f32 %v9466_v27, %v1680_v43  ;;  %v2167_v6 = vmax.f32 %v1689_v15, 0.0  ;;  %v1337_v15 = vadd.f32 %v9490_v4, %v9457_v22  ;;  %v1471_v51 = vmax.f32 %v1329_v30, 0.0  ;;  %7997 = vmatpush3.bf16.msra.mxu0 %v8211_v3 }
 0x1c8   : > { %v7594_v56 = vpop.f32.mrf.mxu1  ;;  %7689 = vmatmul.mubr.bf16.gmra.mxu1 %v1531_v59 }
 0x1c9   : > { %v2165_v54 = vmax.f32 %v1681_v34, 0.0  ;;  %7692 = vmatprep.mubr.bf16.mxu1 %v1532_v41  ;;  %v2289_v58 = vpack.c.bf16 %v2167_v6, %v2166_v0  ;;  %v1702_v17 = vadd.f32 %v7594_v56, %v9466_v27  ;;  %v1472_v41 = vmax.f32 %v1334_v33, 0.0 }
 0x1ca   : > { %v1693_v53 = vpop.f32.mrf.mxu1  ;;  %v1473_v6 = vmax.f32 %v1337_v15, 0.0  ;;  %v1537_v7 = vpack.c.bf16 %v1471_v51, %v1470_v42  ;;  %v1342_v0 = vadd.f32 %v9490_v4, %v9436_v50 }
 0x1cb   : > { %v2288_v21 = vpack.c.bf16 %v2165_v54, %v2164_v57  ;;  %v1694_v46 = vadd.f32 %v9466_v27, %v1693_v53  ;;  %v2170_v19 = vmax.f32 %v1702_v17, 0.0  ;;  %v1345_v53 = vadd.f32 %v9490_v4, %v9448_v12 }
 0x1cc   : > { %v7595_v52 = vpop.f32.mrf.mxu1 }
 0x1cd   : > { %v1705_v35 = vadd.f32 %v7595_v52, %v9466_v27  ;;  %7732 = vmatprep.mubr.bf16.mxu0 %v2288_v21  ;;  %v2168_v38 = vmax.f32 %v1694_v46, 0.0  ;;  %v1475_v32 = vmax.f32 %v1345_v53, 0.0 }
 0x1ce   : > { %v1696_v31 = vpop.f32.mrf.mxu1  ;;  %7733 = vmatmul.mubr.bf16.gmra.mxu0 %v2289_v58  ;;  %v1538_v58 = vpack.c.bf16 %v1473_v6, %v1472_v41 }
 0x1cf   : > { %v1697_v20 = vadd.f32 %v9466_v27, %v1696_v31  ;;  %v2171_v48 = vmax.f32 %v1705_v35, 0.0 }
 0x1d0   : > { %v7598_v39 = vpop.f32.mrf.mxu1  ;;  %7693 = vmatmul.mubr.bf16.gmra.mxu1 %v1533_v63  ;;  %v1474_v63 = vmax.f32 %v1342_v0, 0.0 }
 0x1d1   : > { %v2169_v9 = vmax.f32 %v1697_v20, 0.0  ;;  %7696 = vmatprep.mubr.bf16.mxu1 %v1534_v8  ;;  %v2291_v29 = vpack.c.bf16 %v2171_v48, %v2170_v19  ;;  %v1718_v62 = vadd.f32 %v7598_v39, %v9466_v27 }
 0x1d2   : > { %v1709_v23 = vpop.f32.mrf.mxu1  ;;  %v1539_v49 = vpack.c.bf16 %v1475_v32, %v1474_v63 }
 0x1d3   : > { %v2290_v25 = vpack.c.bf16 %v2169_v9, %v2168_v38  ;;  %v1710_v44 = vadd.f32 %v9466_v27, %v1709_v23  ;;  %v2174_v40 = vmax.f32 %v1718_v62, 0.0 }
 0x1d4   : > { %v7599_v10 = vpop.f32.mrf.mxu1 }
 0x1d5   : > { %v1721_v55 = vadd.f32 %v7599_v10, %v9466_v27  ;;  %7736 = vmatprep.mubr.bf16.mxu0 %v2290_v25  ;;  %v2172_v36 = vmax.f32 %v1710_v44, 0.0  ;;  %v8212_v10 = vld [vmem:[%s11003_s7] sm:$0xff]  }
 0x1d6   : > { %v1712_v26 = vpop.f32.mrf.mxu1  ;;  %7737 = vmatmul.mubr.bf16.gmra.mxu0 %v2291_v29  ;;  %7866 = vmatprep.subr.bf16.mxu1 %v8212_v10 }
 0x1d7   : > { %v1713_v59 = vadd.f32 %v9466_v27, %v1712_v26  ;;  %v2175_v28 = vmax.f32 %v1721_v55, 0.0  ;;  %7867 = vmatpush3.bf16.msra.mxu1 %v8212_v10 }
 0x1d8   : > { %v7602_v37 = vpop.f32.mrf.mxu1  ;;  %7697 = vmatmul.mubr.bf16.gmra.mxu1 %v1535_v60 }
 0x1d9   : > { %v2173_v43 = vmax.f32 %v1713_v59, 0.0  ;;  %7700 = vmatprep.mubr.bf16.mxu1 %v1536_v5  ;;  %v2293_v22 = vpack.c.bf16 %v2175_v28, %v2174_v40  ;;  %v1734_v2 = vadd.f32 %v7602_v37, %v9466_v27 }
 0x1da   : > { %v1725_v34 = vpop.f32.mrf.mxu1 }
 0x1db   : > { %v2292_v56 = vpack.c.bf16 %v2173_v43, %v2172_v36  ;;  %v1726_v54 = vadd.f32 %v9466_v27, %v1725_v34  ;;  %v2178_v50 = vmax.f32 %v1734_v2, 0.0 }
 0x1dc   : > { %v7603_v57 = vpop.f32.mrf.mxu1 }
 0x1dd   : > { %v1737_v16 = vadd.f32 %v7603_v57, %v9466_v27  ;;  %7740 = vmatprep.mubr.bf16.mxu0 %v2292_v56  ;;  %v2176_v35 = vmax.f32 %v1726_v54, 0.0  ;;  %v8213_v57 = vld [vmem:[%s11005_s9 + $0x30] sm:$0xff]  }
 0x1de   : > { %v1728_v14 = vpop.f32.mrf.mxu1  ;;  %7741 = vmatmul.mubr.bf16.gmra.mxu0 %v2293_v22  ;;  %7998 = vmatprep.subr.bf16.mxu0 %v8213_v57 }
 0x1df   : > { %v1729_v21 = vadd.f32 %v9466_v27, %v1728_v14  ;;  %v2179_v52 = vmax.f32 %v1737_v16, 0.0  ;;  %7999 = vmatpush3.bf16.msra.mxu0 %v8213_v57 }
 0x1e0   : > { %v7606_v46 = vpop.f32.mrf.mxu1  ;;  %7701 = vmatmul.mubr.bf16.gmra.mxu1 %v1537_v7 }
 0x1e1   : > { %v2177_v1 = vmax.f32 %v1729_v21, 0.0  ;;  %7704 = vmatprep.mubr.bf16.mxu1 %v1538_v58  ;;  %v2295_v12 = vpack.c.bf16 %v2179_v52, %v2178_v50  ;;  %v1750_v20 = vadd.f32 %v7606_v46, %v9466_v27 }
 0x1e2   : > { %v1741_v24 = vpop.f32.mrf.mxu1 }
 0x1e3   : > { %v2294_v17 = vpack.c.bf16 %v2177_v1, %v2176_v35  ;;  %v1742_v31 = vadd.f32 %v9466_v27, %v1741_v24  ;;  %v2182_v11 = vmax.f32 %v1750_v20, 0.0 }
 0x1e4   : > { %v7607_v4 = vpop.f32.mrf.mxu1 }
 0x1e5   : > { %v1753_v13 = vadd.f32 %v7607_v4, %v9466_v27  ;;  %7744 = vmatprep.mubr.bf16.mxu0 %v2294_v17  ;;  %v2180_v9 = vmax.f32 %v1742_v31, 0.0 }
 0x1e6   : > { %v1744_v8 = vpop.f32.mrf.mxu1  ;;  %7745 = vmatmul.mubr.bf16.gmra.mxu0 %v2295_v12 }
 0x1e7   : > { %v1745_v48 = vadd.f32 %v9466_v27, %v1744_v8  ;;  %v2183_v39 = vmax.f32 %v1753_v13, 0.0 }
 0x1e8   : > { %v7610_v38 = vpop.f32.mrf.mxu1  ;;  %7705 = vmatmul.mubr.bf16.gmra.mxu1 %v1539_v49 }
 0x1e9   : > { %v2181_v61 = vmax.f32 %v1745_v48, 0.0  ;;  %v2297_v18 = vpack.c.bf16 %v2183_v39, %v2182_v11  ;;  %v1766_v44 = vadd.f32 %v7610_v38, %v9466_v27 }
 0x1ea   : > { %v1757_v19 = vpop.f32.mrf.mxu1 }
 0x1eb   : > { %v2296_v23 = vpack.c.bf16 %v2181_v61, %v2180_v9  ;;  %v1758_v25 = vadd.f32 %v9466_v27, %v1757_v19  ;;  %v2186_v33 = vmax.f32 %v1766_v44, 0.0 }
 0x1ec   : > { %v7611_v47 = vpop.f32.mrf.mxu1 }
 0x1ed   : > { %v1769_v29 = vadd.f32 %v7611_v47, %v9466_v27  ;;  %7748 = vmatprep.mubr.bf16.mxu0 %v2296_v23  ;;  %v2184_v62 = vmax.f32 %v1758_v25, 0.0 }
 0x1ee   : > { %v1760_v55 = vpop.f32.mrf.mxu1  ;;  %7749 = vmatmul.mubr.bf16.gmra.mxu0 %v2297_v18 }
 0x1ef   : > { %v1761_v60 = vadd.f32 %v9466_v27, %v1760_v55  ;;  %v2187_v45 = vmax.f32 %v1769_v29, 0.0 }
 0x1f0   : > { %v7614_v30 = vpop.f32.mrf.mxu1 }
 0x1f1   : > { %v2185_v26 = vmax.f32 %v1761_v60, 0.0  ;;  %v2299_v5 = vpack.c.bf16 %v2187_v45, %v2186_v33  ;;  %v1782_v43 = vadd.f32 %v7614_v30, %v9466_v27 }
 0x1f2   : > { %v1773_v15 = vpop.f32.mrf.mxu1 }
 0x1f3   : > { %v2298_v59 = vpack.c.bf16 %v2185_v26, %v2184_v62  ;;  %v1774_v37 = vadd.f32 %v9466_v27, %v1773_v15  ;;  %v2190_v56 = vmax.f32 %v1782_v43, 0.0 }
 0x1f4   : > { %v7615_v28 = vpop.f32.mrf.mxu1 }
 0x1f5   : > { %v1785_v36 = vadd.f32 %v7615_v28, %v9466_v27  ;;  %7752 = vmatprep.mubr.bf16.mxu0 %v2298_v59  ;;  %v2188_v41 = vmax.f32 %v1774_v37, 0.0 }
 0x1f6   : > { %v1776_v42 = vpop.f32.mrf.mxu1  ;;  %7753 = vmatmul.mubr.bf16.gmra.mxu0 %v2299_v5 }
 0x1f7   : > { %v1777_v51 = vadd.f32 %v9466_v27, %v1776_v42  ;;  %v2191_v40 = vmax.f32 %v1785_v36, 0.0 }
 0x1f8   : > { %v7618_v34 = vpop.f32.mrf.mxu1 }
 0x1f9   : > { %v2189_v6 = vmax.f32 %v1777_v51, 0.0  ;;  %v2301_v54 = vpack.c.bf16 %v2191_v40, %v2190_v56  ;;  %v1798_v53 = vadd.f32 %v7618_v34, %v9466_v27  ;;  %v8214_v34 = vld [vmem:[%s11005_s9 + $0x28] sm:$0xff]  }
 0x1fa   : > { %v1789_v3 = vpop.f32.mrf.mxu1  ;;  %8000 = vmatprep.subr.bf16.mxu0 %v8214_v34 }
 0x1fb   : > { %v2300_v22 = vpack.c.bf16 %v2189_v6, %v2188_v41  ;;  %v1790_v7 = vadd.f32 %v9466_v27, %v1789_v3  ;;  %v2194_v35 = vmax.f32 %v1798_v53, 0.0  ;;  %8001 = vmatpush3.bf16.msra.mxu0 %v8214_v34 }
 0x1fc   : > { %v7619_v16 = vpop.f32.mrf.mxu1 }
 0x1fd   : > { %v1801_v0 = vadd.f32 %v7619_v16, %v9466_v27  ;;  %7756 = vmatprep.mubr.bf16.mxu0 %v2300_v22  ;;  %v2192_v52 = vmax.f32 %v1790_v7, 0.0 }
 0x1fe   : > { %v1792_v2 = vpop.f32.mrf.mxu1  ;;  %7757 = vmatmul.mubr.bf16.gmra.mxu0 %v2301_v54 }
 0x1ff   : > { %v1793_v14 = vadd.f32 %v9466_v27, %v1792_v2  ;;  %v2195_v21 = vmax.f32 %v1801_v0, 0.0 }
 0x200   : > { %v7622_v58 = vpop.f32.mrf.mxu1 }
 0x201   : > { %v2193_v46 = vmax.f32 %v1793_v14, 0.0  ;;  %v2303_v32 = vpack.c.bf16 %v2195_v21, %v2194_v35  ;;  %v1814_v12 = vadd.f32 %v7622_v58, %v9466_v27 }
 0x202   : > { %v1805_v1 = vpop.f32.mrf.mxu1 }
 0x203   : > { %v2302_v63 = vpack.c.bf16 %v2193_v46, %v2192_v52  ;;  %v1806_v24 = vadd.f32 %v9466_v27, %v1805_v1  ;;  %v2198_v48 = vmax.f32 %v1814_v12, 0.0 }
 0x204   : > { %v7623_v50 = vpop.f32.mrf.mxu1 }
 0x205   : > { %v1817_v17 = vadd.f32 %v7623_v50, %v9466_v27  ;;  %7760 = vmatprep.mubr.bf16.mxu0 %v2302_v63  ;;  %v2196_v20 = vmax.f32 %v1806_v24, 0.0 }
 0x206   : > { %v1808_v4 = vpop.f32.mrf.mxu1  ;;  %7761 = vmatmul.mubr.bf16.gmra.mxu0 %v2303_v32 }
 0x207   : > { %v1809_v31 = vadd.f32 %v9466_v27, %v1808_v4  ;;  %v2199_v13 = vmax.f32 %v1817_v17, 0.0 }
 0x208   : > { %v7626_v49 = vpop.f32.mrf.mxu1 }
 0x209   : > { %v2197_v8 = vmax.f32 %v1809_v31, 0.0  ;;  %v2305_v9 = vpack.c.bf16 %v2199_v13, %v2198_v48  ;;  %v1830_v23 = vadd.f32 %v7626_v49, %v9466_v27 }
 0x20a   : > { %v1821_v39 = vpop.f32.mrf.mxu1 }
 0x20b   : > { %v2304_v38 = vpack.c.bf16 %v2197_v8, %v2196_v20  ;;  %v1822_v11 = vadd.f32 %v9466_v27, %v1821_v39  ;;  %v2202_v55 = vmax.f32 %v1830_v23, 0.0 }
 0x20c   : > { %v7627_v61 = vpop.f32.mrf.mxu1 }
 0x20d   : > { %v1833_v19 = vadd.f32 %v7627_v61, %v9466_v27  ;;  %7764 = vmatprep.mubr.bf16.mxu0 %v2304_v38  ;;  %v2200_v10 = vmax.f32 %v1822_v11, 0.0 }
 0x20e   : > { %v1824_v18 = vpop.f32.mrf.mxu1  ;;  %7765 = vmatmul.mubr.bf16.gmra.mxu0 %v2305_v9 }
 0x20f   : > { %v1825_v47 = vadd.f32 %v9466_v27, %v1824_v18  ;;  %v2203_v25 = vmax.f32 %v1833_v19, 0.0 }
 0x210   : > { %v7630_v29 = vpop.f32.mrf.mxu1 }
 0x211   : > { %v2201_v44 = vmax.f32 %v1825_v47, 0.0  ;;  %v2307_v30 = vpack.c.bf16 %v2203_v25, %v2202_v55  ;;  %v1846_v15 = vadd.f32 %v7630_v29, %v9466_v27 }
 0x212   : > { %v1837_v60 = vpop.f32.mrf.mxu1 }
 0x213   : > { %v2306_v45 = vpack.c.bf16 %v2201_v44, %v2200_v10  ;;  %v1838_v26 = vadd.f32 %v9466_v27, %v1837_v60  ;;  %v2206_v42 = vmax.f32 %v1846_v15, 0.0 }
 0x214   : > { %v7631_v62 = vpop.f32.mrf.mxu1 }
 0x215   : > { %v1849_v33 = vadd.f32 %v7631_v62, %v9466_v27  ;;  %7768 = vmatprep.mubr.bf16.mxu0 %v2306_v45  ;;  %v2204_v36 = vmax.f32 %v1838_v26, 0.0 }
 0x216   : > { %v1840_v59 = vpop.f32.mrf.mxu1  ;;  %7769 = vmatmul.mubr.bf16.gmra.mxu0 %v2307_v30 }
 0x217   : > { %v1841_v5 = vadd.f32 %v9466_v27, %v1840_v59  ;;  %v2207_v28 = vmax.f32 %v1849_v33, 0.0 }
 0x218   : > { %v7634_v37 = vpop.f32.mrf.mxu1 }
 0x219   : > { %v2205_v43 = vmax.f32 %v1841_v5, 0.0  ;;  %v2309_v41 = vpack.c.bf16 %v2207_v28, %v2206_v42  ;;  %v1862_v22 = vadd.f32 %v7634_v37, %v9466_v27  ;;  %v8215_v37 = vld [vmem:[%s11005_s9 + $0x20] sm:$0xff]  }
 0x21a   : > { %v1853_v51 = vpop.f32.mrf.mxu1  ;;  %8002 = vmatprep.subr.bf16.mxu0 %v8215_v37 }
 0x21b   : > { %v2308_v40 = vpack.c.bf16 %v2205_v43, %v2204_v36  ;;  %v1854_v56 = vadd.f32 %v9466_v27, %v1853_v51  ;;  %v2210_v2 = vmax.f32 %v1862_v22, 0.0  ;;  %8003 = vmatpush3.bf16.msra.mxu0 %v8215_v37 }
 0x21c   : > { %v7635_v6 = vpop.f32.mrf.mxu1 }
 0x21d   : > { %v1865_v3 = vadd.f32 %v7635_v6, %v9466_v27  ;;  %7772 = vmatprep.mubr.bf16.mxu0 %v2308_v40  ;;  %v2208_v0 = vmax.f32 %v1854_v56, 0.0 }
 0x21e   : > { %v1856_v57 = vpop.f32.mrf.mxu1  ;;  %7773 = vmatmul.mubr.bf16.gmra.mxu0 %v2309_v41 }
 0x21f   : > { %v1857_v54 = vadd.f32 %v9466_v27, %v1856_v57  ;;  %v2211_v16 = vmax.f32 %v1865_v3, 0.0 }
 0x220   : > { %v7638_v7 = vpop.f32.mrf.mxu1 }
 0x221   : > { %v2209_v53 = vmax.f32 %v1857_v54, 0.0  ;;  %v2311_v58 = vpack.c.bf16 %v2211_v16, %v2210_v2  ;;  %v1878_v1 = vadd.f32 %v7638_v7, %v9466_v27 }
 0x222   : > { %v1869_v14 = vpop.f32.mrf.mxu1 }
 0x223   : > { %v2310_v21 = vpack.c.bf16 %v2209_v53, %v2208_v0  ;;  %v1870_v46 = vadd.f32 %v9466_v27, %v1869_v14  ;;  %v2214_v4 = vmax.f32 %v1878_v1, 0.0 }
 0x224   : > { %v7639_v52 = vpop.f32.mrf.mxu1 }
 0x225   : > { %v1881_v35 = vadd.f32 %v7639_v52, %v9466_v27  ;;  %7776 = vmatprep.mubr.bf16.mxu0 %v2310_v21  ;;  %v2212_v17 = vmax.f32 %v1870_v46, 0.0 }
 0x226   : > { %v1872_v63 = vpop.f32.mrf.mxu1  ;;  %7777 = vmatmul.mubr.bf16.gmra.mxu0 %v2311_v58 }
 0x227   : > { %v1873_v32 = vadd.f32 %v9466_v27, %v1872_v63  ;;  %v2215_v50 = vmax.f32 %v1881_v35, 0.0 }
 0x228   : > { %v7642_v24 = vpop.f32.mrf.mxu1 }
 0x229   : > { %v2213_v12 = vmax.f32 %v1873_v32, 0.0  ;;  %v2313_v49 = vpack.c.bf16 %v2215_v50, %v2214_v4  ;;  %v1894_v39 = vadd.f32 %v7642_v24, %v9466_v27 }
 0x22a   : > { %v1885_v31 = vpop.f32.mrf.mxu1 }
 0x22b   : > { %v2312_v13 = vpack.c.bf16 %v2213_v12, %v2212_v17  ;;  %v1886_v8 = vadd.f32 %v9466_v27, %v1885_v31  ;;  %v2218_v18 = vmax.f32 %v1894_v39, 0.0 }
 0x22c   : > { %v7643_v20 = vpop.f32.mrf.mxu1 }
 0x22d   : > { %v1897_v48 = vadd.f32 %v7643_v20, %v9466_v27  ;;  %7780 = vmatprep.mubr.bf16.mxu0 %v2312_v13  ;;  %v2216_v19 = vmax.f32 %v1886_v8, 0.0 }
 0x22e   : > { %v1888_v38 = vpop.f32.mrf.mxu1  ;;  %7781 = vmatmul.mubr.bf16.gmra.mxu0 %v2313_v49 }
 0x22f   : > { %v1889_v9 = vadd.f32 %v9466_v27, %v1888_v38  ;;  %v2219_v61 = vmax.f32 %v1897_v48, 0.0 }
 0x230   : > { %v7646_v11 = vpop.f32.mrf.mxu1 }
 0x231   : > { %v2217_v23 = vmax.f32 %v1889_v9, 0.0  ;;  %v2315_v29 = vpack.c.bf16 %v2219_v61, %v2218_v18  ;;  %v1910_v60 = vadd.f32 %v7646_v11, %v9466_v27 }
 0x232   : > { %v1901_v47 = vpop.f32.mrf.mxu1 }
 0x233   : > { %v2314_v25 = vpack.c.bf16 %v2217_v23, %v2216_v19  ;;  %v1902_v44 = vadd.f32 %v9466_v27, %v1901_v47  ;;  %v2222_v59 = vmax.f32 %v1910_v60, 0.0 }
 0x234   : > { %v7647_v10 = vpop.f32.mrf.mxu1 }
 0x235   : > { %v1913_v55 = vadd.f32 %v7647_v10, %v9466_v27  ;;  %7784 = vmatprep.mubr.bf16.mxu0 %v2314_v25  ;;  %v2220_v33 = vmax.f32 %v1902_v44, 0.0 }
 0x236   : > { %v1904_v45 = vpop.f32.mrf.mxu1  ;;  %7785 = vmatmul.mubr.bf16.gmra.mxu0 %v2315_v29 }
 0x237   : > { %v1905_v30 = vadd.f32 %v9466_v27, %v1904_v45  ;;  %v2223_v62 = vmax.f32 %v1913_v55, 0.0 }
 0x238   : > { %v7650_v26 = vpop.f32.mrf.mxu1 }
 0x239   : > { %v2221_v15 = vmax.f32 %v1905_v30, 0.0  ;;  %v2317_v36 = vpack.c.bf16 %v2223_v62, %v2222_v59  ;;  %v1926_v40 = vadd.f32 %v7650_v26, %v9466_v27  ;;  %v8216_v26 = vld [vmem:[%s11005_s9 + $0x18] sm:$0xff]  }
 0x23a   : > { %v1917_v5 = vpop.f32.mrf.mxu1  ;;  %8004 = vmatprep.subr.bf16.mxu0 %v8216_v26 }
 0x23b   : > { %v2316_v28 = vpack.c.bf16 %v2221_v15, %v2220_v33  ;;  %v1918_v42 = vadd.f32 %v9466_v27, %v1917_v5  ;;  %v2226_v57 = vmax.f32 %v1926_v40, 0.0  ;;  %8005 = vmatpush3.bf16.msra.mxu0 %v8216_v26 }
 0x23c   : > { %v7651_v43 = vpop.f32.mrf.mxu1 }
 0x23d   : > { %v1929_v51 = vadd.f32 %v7651_v43, %v9466_v27  ;;  %7788 = vmatprep.mubr.bf16.mxu0 %v2316_v28  ;;  %v2224_v3 = vmax.f32 %v1918_v42, 0.0 }
 0x23e   : > { %v1920_v34 = vpop.f32.mrf.mxu1  ;;  %7789 = vmatmul.mubr.bf16.gmra.mxu0 %v2317_v36 }
 0x23f   : > { %v1921_v41 = vadd.f32 %v9466_v27, %v1920_v34  ;;  %v2227_v6 = vmax.f32 %v1929_v51, 0.0 }
 0x240   : > { %v7654_v56 = vpop.f32.mrf.mxu1 }
 0x241   : > { %v2225_v22 = vmax.f32 %v1921_v41, 0.0  ;;  %v2319_v7 = vpack.c.bf16 %v2227_v6, %v2226_v57  ;;  %v1942_v14 = vadd.f32 %v7654_v56, %v9466_v27 }
 0x242   : > { %v1933_v54 = vpop.f32.mrf.mxu1 }
 0x243   : > { %v2318_v16 = vpack.c.bf16 %v2225_v22, %v2224_v3  ;;  %v1934_v53 = vadd.f32 %v9466_v27, %v1933_v54  ;;  %v2230_v63 = vmax.f32 %v1942_v14, 0.0 }
 0x244   : > { %v7655_v0 = vpop.f32.mrf.mxu1 }
 0x245   : > { %v1945_v2 = vadd.f32 %v7655_v0, %v9466_v27  ;;  %7792 = vmatprep.mubr.bf16.mxu0 %v2318_v16  ;;  %v2228_v35 = vmax.f32 %v1934_v53, 0.0 }
 0x246   : > { %v1936_v21 = vpop.f32.mrf.mxu1  ;;  %7793 = vmatmul.mubr.bf16.gmra.mxu0 %v2319_v7 }
 0x247   : > { %v1937_v58 = vadd.f32 %v9466_v27, %v1936_v21  ;;  %v2231_v52 = vmax.f32 %v1945_v2, 0.0 }
 0x248   : > { %v7658_v46 = vpop.f32.mrf.mxu1 }
 0x249   : > { %v2229_v1 = vmax.f32 %v1937_v58, 0.0  ;;  %v2321_v24 = vpack.c.bf16 %v2231_v52, %v2230_v63  ;;  %v1958_v31 = vadd.f32 %v7658_v46, %v9466_v27 }
 0x24a   : > { %v1949_v32 = vpop.f32.mrf.mxu1 }
 0x24b   : > { %v2320_v50 = vpack.c.bf16 %v2229_v1, %v2228_v35  ;;  %v1950_v12 = vadd.f32 %v9466_v27, %v1949_v32  ;;  %v2234_v38 = vmax.f32 %v1958_v31, 0.0 }
 0x24c   : > { %v7659_v17 = vpop.f32.mrf.mxu1 }
 0x24d   : > { %v1961_v4 = vadd.f32 %v7659_v17, %v9466_v27  ;;  %7796 = vmatprep.mubr.bf16.mxu0 %v2320_v50  ;;  %v2232_v48 = vmax.f32 %v1950_v12, 0.0 }
 0x24e   : > { %v1952_v13 = vpop.f32.mrf.mxu1  ;;  %7797 = vmatmul.mubr.bf16.gmra.mxu0 %v2321_v24 }
 0x24f   : > { %v1953_v49 = vadd.f32 %v9466_v27, %v1952_v13  ;;  %v2235_v20 = vmax.f32 %v1961_v4, 0.0 }
 0x250   : > { %v7662_v8 = vpop.f32.mrf.mxu1 }
 0x251   : > { %v2233_v39 = vmax.f32 %v1953_v49, 0.0  ;;  %v2323_v11 = vpack.c.bf16 %v2235_v20, %v2234_v38  ;;  %v1974_v47 = vadd.f32 %v7662_v8, %v9466_v27 }
 0x252   : > { %v1965_v9 = vpop.f32.mrf.mxu1 }
 0x253   : > { %v2322_v61 = vpack.c.bf16 %v2233_v39, %v2232_v48  ;;  %v1966_v23 = vadd.f32 %v9466_v27, %v1965_v9  ;;  %v2238_v45 = vmax.f32 %v1974_v47, 0.0 }
 0x254   : > { %v7663_v19 = vpop.f32.mrf.mxu1 }
 0x255   : > { %v1977_v18 = vadd.f32 %v7663_v19, %v9466_v27  ;;  %7800 = vmatprep.mubr.bf16.mxu0 %v2322_v61  ;;  %v2236_v55 = vmax.f32 %v1966_v23, 0.0 }
 0x256   : > { %v1968_v25 = vpop.f32.mrf.mxu1  ;;  %7801 = vmatmul.mubr.bf16.gmra.mxu0 %v2323_v11 }
 0x257   : > { %v1969_v29 = vadd.f32 %v9466_v27, %v1968_v25  ;;  %v2239_v10 = vmax.f32 %v1977_v18, 0.0 }
 0x258   : > { %v7666_v44 = vpop.f32.mrf.mxu1 }
 0x259   : > { %v2237_v60 = vmax.f32 %v1969_v29, 0.0  ;;  %v2325_v33 = vpack.c.bf16 %v2239_v10, %v2238_v45  ;;  %v1990_v28 = vadd.f32 %v7666_v44, %v9466_v27  ;;  %v8217_v44 = vld [vmem:[%s11005_s9 + $0x10] sm:$0xff]  }
 0x25a   : > { %v1981_v30 = vpop.f32.mrf.mxu1  ;;  %8006 = vmatprep.subr.bf16.mxu0 %v8217_v44 }
 0x25b   : > { %v2324_v62 = vpack.c.bf16 %v2237_v60, %v2236_v55  ;;  %v1982_v59 = vadd.f32 %v9466_v27, %v1981_v30  ;;  %v2242_v34 = vmax.f32 %v1990_v28, 0.0  ;;  %8007 = vmatpush3.bf16.msra.mxu0 %v8217_v44 }
 0x25c   : > { %v7667_v15 = vpop.f32.mrf.mxu1 }
 0x25d   : > { %v1993_v5 = vadd.f32 %v7667_v15, %v9466_v27  ;;  %7804 = vmatprep.mubr.bf16.mxu0 %v2324_v62  ;;  %v2240_v51 = vmax.f32 %v1982_v59, 0.0 }
 0x25e   : > { %v1984_v37 = vpop.f32.mrf.mxu1  ;;  %7805 = vmatmul.mubr.bf16.gmra.mxu0 %v2325_v33 }
 0x25f   : > { %v1985_v36 = vadd.f32 %v9466_v27, %v1984_v37  ;;  %v2243_v43 = vmax.f32 %v1993_v5, 0.0 }
 0x260   : > { %v7670_v42 = vpop.f32.mrf.mxu1 }
 0x261   : > { %v2241_v40 = vmax.f32 %v1985_v36, 0.0  ;;  %v2327_v56 = vpack.c.bf16 %v2243_v43, %v2242_v34  ;;  %v2006_v54 = vadd.f32 %v7670_v42, %v9466_v27  ;;  %v9648_v42 = vld [vmem:[%s11002_s6] ss:$0 sm:$0xff] }
 0x262   : > { %v1997_v41 = vpop.f32.mrf.mxu1 }
 0x263   : > { %v2326_v6 = vpack.c.bf16 %v2241_v40, %v2240_v51  ;;  %v1998_v22 = vadd.f32 %v9466_v27, %v1997_v41  ;;  %v2246_v21 = vmax.f32 %v2006_v54, 0.0 }
 0x264   : > { %v7671_v3 = vpop.f32.mrf.mxu1 }
 0x265   : > { %v2009_v57 = vadd.f32 %v7671_v3, %v9466_v27  ;;  %7808 = vmatprep.mubr.bf16.mxu0 %v2326_v6  ;;  %v2244_v2 = vmax.f32 %v1998_v22, 0.0 }
 0x266   : > { %v2000_v16 = vpop.f32.mrf.mxu1  ;;  %7809 = vmatmul.mubr.bf16.gmra.mxu0 %v2327_v56 }
 0x267   : > { %v2001_v7 = vadd.f32 %v9466_v27, %v2000_v16  ;;  %v2247_v0 = vmax.f32 %v2009_v57, 0.0  ;;  %v9656_v57 = vld [vmem:[%s11000_s4] ss:$0 sm:$0xff] }
 0x268   : > { %v7674_v53 = vpop.f32.mrf.mxu1 }
 0x269   : > { %v2245_v14 = vmax.f32 %v2001_v7, 0.0  ;;  %v2329_v46 = vpack.c.bf16 %v2247_v0, %v2246_v21  ;;  %v2022_v32 = vadd.f32 %v7674_v53, %v9466_v27 }
 0x26a   : > { %v2013_v58 = vpop.f32.mrf.mxu1 }
 0x26b   : > { %v2328_v52 = vpack.c.bf16 %v2245_v14, %v2244_v2  ;;  %v2014_v1 = vadd.f32 %v9466_v27, %v2013_v58  ;;  %v2250_v13 = vmax.f32 %v2022_v32, 0.0 }
 0x26c   : > { %v7675_v35 = vpop.f32.mrf.mxu1 }
 0x26d   : > { %v2025_v63 = vadd.f32 %v7675_v35, %v9466_v27  ;;  %7812 = vmatprep.mubr.bf16.mxu0 %v2328_v52  ;;  %v2248_v4 = vmax.f32 %v2014_v1, 0.0 }
 0x26e   : > { %v2016_v50 = vpop.f32.mrf.mxu1  ;;  %7813 = vmatmul.mubr.bf16.gmra.mxu0 %v2329_v46 }
 0x26f   : > { %v2017_v24 = vadd.f32 %v9466_v27, %v2016_v50  ;;  %v2251_v17 = vmax.f32 %v2025_v63, 0.0 }
 0x270   : > { %v7678_v12 = vpop.f32.mrf.mxu1 }
 0x271   : > { %v2249_v31 = vmax.f32 %v2017_v24, 0.0  ;;  %v2331_v8 = vpack.c.bf16 %v2251_v17, %v2250_v13  ;;  %v2038_v9 = vadd.f32 %v7678_v12, %v9466_v27 }
 0x272   : > { %v2029_v49 = vpop.f32.mrf.mxu1 }
 0x273   : > { %v2330_v20 = vpack.c.bf16 %v2249_v31, %v2248_v4  ;;  %v2030_v39 = vadd.f32 %v9466_v27, %v2029_v49  ;;  %v2254_v25 = vmax.f32 %v2038_v9, 0.0 }
 0x274   : > { %v7679_v48 = vpop.f32.mrf.mxu1 }
 0x275   : > { %v2041_v38 = vadd.f32 %v7679_v48, %v9466_v27  ;;  %7816 = vmatprep.mubr.bf16.mxu0 %v2330_v20  ;;  %v2252_v18 = vmax.f32 %v2030_v39, 0.0 }
 0x276   : > { %v2032_v61 = vpop.f32.mrf.mxu1  ;;  %7817 = vmatmul.mubr.bf16.gmra.mxu0 %v2331_v8 }
 0x277   : > { %v2033_v11 = vadd.f32 %v9466_v27, %v2032_v61  ;;  %v2255_v19 = vmax.f32 %v2041_v38, 0.0 }
 0x278   : > { %v7682_v23 = vpop.f32.mrf.mxu1 }
 0x279   : > { %v2253_v47 = vmax.f32 %v2033_v11, 0.0  ;;  %v2333_v55 = vpack.c.bf16 %v2255_v19, %v2254_v25  ;;  %v2054_v62 = vadd.f32 %v7682_v23, %v9466_v27 }
 0x27a   : > { %v2045_v29 = vpop.f32.mrf.mxu1 }
 0x27b   : > { %v2332_v10 = vpack.c.bf16 %v2253_v47, %v2252_v18  ;;  %v2046_v45 = vadd.f32 %v9466_v27, %v2045_v29  ;;  %v2258_v43 = vmax.f32 %v2054_v62, 0.0 }
 0x27c   : > { %v7683_v60 = vpop.f32.mrf.mxu1 }
 0x27d   : > { %v2057_v30 = vadd.f32 %v7683_v60, %v9466_v27  ;;  %7820 = vmatprep.mubr.bf16.mxu0 %v2332_v10  ;;  %v2256_v37 = vmax.f32 %v2046_v45, 0.0 }
 0x27e   : > { %v2048_v26 = vpop.f32.mrf.mxu1  ;;  %v7726_v33 = vpop.f32.mrf.mxu0  ;;  %7821 = vmatmul.mubr.bf16.gmra.mxu0 %v2333_v55 }
 0x27f   : > { %v2049_v15 = vadd.f32 %v9466_v27, %v2048_v26  ;;  %v2259_v59 = vmax.f32 %v2057_v30, 0.0  ;;  %v2462_v22 = vadd.f32 %v7726_v33, %v9648_v42 }
 0x280   : > { %v7686_v5 = vpop.f32.mrf.mxu1  ;;  %v2453_v28 = vpop.f32.mrf.mxu0 }
 0x281   : > { %v2257_v36 = vmax.f32 %v2049_v15, 0.0  ;;  %v2335_v6 = vpack.c.bf16 %v2259_v59, %v2258_v43  ;;  %v2454_v27 = vadd.f32 %v9648_v42, %v2453_v28  ;;  %v2070_v2 = vadd.f32 %v9656_v57, %v7686_v5 }
 0x282   : > { %v2061_v51 = vpop.f32.mrf.mxu1  ;;  %v7727_v40 = vpop.f32.mrf.mxu0  ;;  %v2966_v1 = vmax.f32 %v2462_v22, 0.0 }
 0x283   : > { %v2465_v34 = vadd.f32 %v7727_v40, %v9648_v42  ;;  %v2334_v41 = vpack.c.bf16 %v2257_v36, %v2256_v37  ;;  %v2062_v7 = vadd.f32 %v9656_v57, %v2061_v51  ;;  %v2964_v52 = vmax.f32 %v2454_v27, 0.0 }
 0x284   : > { %v7687_v56 = vpop.f32.mrf.mxu1  ;;  %v2456_v3 = vpop.f32.mrf.mxu0  ;;  %v2262_v4 = vmax.f32 %v2070_v2, 0.0 }
 0x285   : > { %v2073_v54 = vadd.f32 %v9656_v57, %v7687_v56  ;;  %v2457_v16 = vadd.f32 %v9648_v42, %v2456_v3  ;;  %7824 = vmatprep.mubr.bf16.mxu0 %v2334_v41  ;;  %v2967_v14 = vmax.f32 %v2465_v34, 0.0  ;;  %v2260_v50 = vmax.f32 %v2062_v7, 0.0 }
 0x286   : > { %v2064_v0 = vpop.f32.mrf.mxu1  ;;  %v7730_v53 = vpop.f32.mrf.mxu0  ;;  %7825 = vmatmul.mubr.bf16.gmra.mxu0 %v2335_v6 }
 0x287   : > { %v2965_v21 = vmax.f32 %v2457_v16, 0.0  ;;  %v2065_v58 = vadd.f32 %v9656_v57, %v2064_v0  ;;  %v2263_v63 = vmax.f32 %v2073_v54, 0.0  ;;  %v3093_v31 = vpack.c.bf16 %v2967_v14, %v2966_v1 }
 0x288   : > { %v7690_v46 = vpop.f32.mrf.mxu1  ;;  %v2469_v35 = vpop.f32.mrf.mxu0  ;;  %v2478_v38 = vadd.f32 %v7730_v53, %v9648_v42 }
 0x289   : > { %v2261_v32 = vmax.f32 %v2065_v58, 0.0  ;;  %v3092_v12 = vpack.c.bf16 %v2965_v21, %v2964_v52  ;;  %v2470_v49 = vadd.f32 %v9648_v42, %v2469_v35  ;;  %v2337_v39 = vpack.c.bf16 %v2263_v63, %v2262_v4 }
 0x28a   : > { %v2077_v24 = vpop.f32.mrf.mxu1  ;;  %v7731_v17 = vpop.f32.mrf.mxu0  ;;  %v2086_v18 = vadd.f32 %v9656_v57, %v7690_v46  ;;  %v2970_v60 = vmax.f32 %v2478_v38, 0.0 }
 0x28b   : > { %v2481_v13 = vadd.f32 %v7731_v17, %v9648_v42  ;;  %7868 = vmatprep.mubr.bf16.mxu1 %v3092_v12  ;;  %v2336_v48 = vpack.c.bf16 %v2261_v32, %v2260_v50  ;;  %v2078_v11 = vadd.f32 %v9656_v57, %v2077_v24  ;;  %v2968_v10 = vmax.f32 %v2470_v49, 0.0  ;;  %v8218_v24 = vld [vmem:[%s11005_s9 + $0x8] sm:$0xff]  }
 0x28c   : > { %v7691_v20 = vpop.f32.mrf.mxu1  ;;  %v2472_v8 = vpop.f32.mrf.mxu0  ;;  %7869 = vmatmul.mubr.bf16.vlgmr.msra.gmra.mxu1 %v3093_v31  ;;  %v2266_v59 = vmax.f32 %v2086_v18, 0.0  ;;  %8008 = vmatprep.subr.bf16.mxu0 %v8218_v24 }
 0x28d   : > { %v2089_v9 = vadd.f32 %v9656_v57, %v7691_v20  ;;  %v2473_v61 = vadd.f32 %v9648_v42, %v2472_v8  ;;  %7828 = vmatprep.mubr.bf16.mxu0 %v2336_v48  ;;  %v2971_v47 = vmax.f32 %v2481_v13, 0.0  ;;  %v2264_v62 = vmax.f32 %v2078_v11, 0.0  ;;  %8009 = vmatpush3.bf16.msra.mxu0 %v8218_v24 }
 0x28e   : > { %v2080_v19 = vpop.f32.mrf.mxu1  ;;  %v7734_v23 = vpop.f32.mrf.mxu0  ;;  %7829 = vmatmul.mubr.bf16.gmra.mxu0 %v2337_v39 }
 0x28f   : > { %v2969_v25 = vmax.f32 %v2473_v61, 0.0  ;;  %v2081_v29 = vadd.f32 %v9656_v57, %v2080_v19  ;;  %v2267_v45 = vmax.f32 %v2089_v9, 0.0  ;;  %v3095_v5 = vpack.c.bf16 %v2971_v47, %v2970_v60 }
 0x290   : > { %v7694_v44 = vpop.f32.mrf.mxu1  ;;  %v2485_v55 = vpop.f32.mrf.mxu0  ;;  %v2494_v34 = vadd.f32 %v7734_v23, %v9648_v42 }
 0x291   : > { %v2265_v30 = vmax.f32 %v2081_v29, 0.0  ;;  %v3094_v15 = vpack.c.bf16 %v2969_v25, %v2968_v10  ;;  %v2486_v37 = vadd.f32 %v9648_v42, %v2485_v55  ;;  %v2339_v40 = vpack.c.bf16 %v2267_v45, %v2266_v59 }
 0x292   : > { %v2093_v26 = vpop.f32.mrf.mxu1  ;;  %v7735_v33 = vpop.f32.mrf.mxu0  ;;  %v2102_v22 = vadd.f32 %v9656_v57, %v7694_v44  ;;  %v2974_v14 = vmax.f32 %v2494_v34, 0.0 }
 0x293   : > { %v2497_v28 = vadd.f32 %v7735_v33, %v9648_v42  ;;  %7872 = vmatprep.mubr.bf16.mxu1 %v3094_v15  ;;  %v2338_v51 = vpack.c.bf16 %v2265_v30, %v2264_v62  ;;  %v2094_v27 = vadd.f32 %v9656_v57, %v2093_v26  ;;  %v2972_v0 = vmax.f32 %v2486_v37, 0.0 }
 0x294   : > { %v7695_v36 = vpop.f32.mrf.mxu1  ;;  %v2488_v43 = vpop.f32.mrf.mxu0  ;;  %7873 = vmatmul.mubr.bf16.gmra.mxu1 %v3095_v5  ;;  %v2270_v63 = vmax.f32 %v2102_v22, 0.0 }
 0x295   : > { %v2105_v41 = vadd.f32 %v9656_v57, %v7695_v36  ;;  %v2489_v6 = vadd.f32 %v9648_v42, %v2488_v43  ;;  %7832 = vmatprep.mubr.bf16.mxu0 %v2338_v51  ;;  %v2975_v54 = vmax.f32 %v2497_v28, 0.0  ;;  %v2268_v52 = vmax.f32 %v2094_v27, 0.0 }
 0x296   : > { %v2096_v56 = vpop.f32.mrf.mxu1  ;;  %v7738_v3 = vpop.f32.mrf.mxu0  ;;  %7833 = vmatmul.mubr.bf16.gmra.mxu0 %v2339_v40 }
 0x297   : > { %v2973_v16 = vmax.f32 %v2489_v6, 0.0  ;;  %v2097_v7 = vadd.f32 %v9656_v57, %v2096_v56  ;;  %v2271_v21 = vmax.f32 %v2105_v41, 0.0  ;;  %v3097_v32 = vpack.c.bf16 %v2975_v54, %v2974_v14 }
 0x298   : > { %v7698_v53 = vpop.f32.mrf.mxu1  ;;  %v2501_v2 = vpop.f32.mrf.mxu0  ;;  %v2510_v17 = vadd.f32 %v7738_v3, %v9648_v42 }
 0x299   : > { %v2269_v58 = vmax.f32 %v2097_v7, 0.0  ;;  %v3096_v1 = vpack.c.bf16 %v2973_v16, %v2972_v0  ;;  %v2502_v12 = vadd.f32 %v9648_v42, %v2501_v2  ;;  %v2341_v49 = vpack.c.bf16 %v2271_v21, %v2270_v63 }
 0x29a   : > { %v2109_v46 = vpop.f32.mrf.mxu1  ;;  %v7739_v35 = vpop.f32.mrf.mxu0  ;;  %v2118_v9 = vadd.f32 %v9656_v57, %v7698_v53  ;;  %v2978_v25 = vmax.f32 %v2510_v17, 0.0 }
 0x29b   : > { %v2513_v50 = vadd.f32 %v7739_v35, %v9648_v42  ;;  %7876 = vmatprep.mubr.bf16.mxu1 %v3096_v1  ;;  %v2340_v13 = vpack.c.bf16 %v2269_v58, %v2268_v52  ;;  %v2110_v48 = vadd.f32 %v9656_v57, %v2109_v46  ;;  %v2976_v23 = vmax.f32 %v2502_v12, 0.0 }
 0x29c   : > { %v7699_v4 = vpop.f32.mrf.mxu1  ;;  %v2504_v31 = vpop.f32.mrf.mxu0  ;;  %7877 = vmatmul.mubr.bf16.gmra.mxu1 %v3097_v32  ;;  %v2274_v30 = vmax.f32 %v2118_v9, 0.0 }
 0x29d   : > { %v2121_v20 = vadd.f32 %v9656_v57, %v7699_v4  ;;  %v2505_v8 = vadd.f32 %v9648_v42, %v2504_v31  ;;  %7836 = vmatprep.mubr.bf16.mxu0 %v2340_v13  ;;  %v2979_v61 = vmax.f32 %v2513_v50, 0.0  ;;  %v2272_v44 = vmax.f32 %v2110_v48, 0.0 }
 0x29e   : > { %v2112_v39 = vpop.f32.mrf.mxu1  ;;  %v7742_v38 = vpop.f32.mrf.mxu0  ;;  %7837 = vmatmul.mubr.bf16.gmra.mxu0 %v2341_v49 }
 0x29f   : > { %v2977_v11 = vmax.f32 %v2505_v8, 0.0  ;;  %v2113_v19 = vadd.f32 %v9656_v57, %v2112_v39  ;;  %v2275_v29 = vmax.f32 %v2121_v20, 0.0  ;;  %v3099_v62 = vpack.c.bf16 %v2979_v61, %v2978_v25 }
 0x2a0   : > { %v7702_v18 = vpop.f32.mrf.mxu1  ;;  %v2517_v47 = vpop.f32.mrf.mxu0  ;;  %v2526_v37 = vadd.f32 %v7742_v38, %v9648_v42 }
 0x2a1   : > { %v2273_v10 = vmax.f32 %v2113_v19, 0.0  ;;  %v3098_v45 = vpack.c.bf16 %v2977_v11, %v2976_v23  ;;  %v2518_v33 = vadd.f32 %v9648_v42, %v2517_v47  ;;  %v2343_v28 = vpack.c.bf16 %v2275_v29, %v2274_v30 }
 0x2a2   : > { %v2125_v55 = vpop.f32.mrf.mxu1  ;;  %v7743_v60 = vpop.f32.mrf.mxu0  ;;  %v2134_v41 = vadd.f32 %v9656_v57, %v7702_v18  ;;  %v2982_v16 = vmax.f32 %v2526_v37, 0.0 }
 0x2a3   : > { %v2529_v26 = vadd.f32 %v7743_v60, %v9648_v42  ;;  %7880 = vmatprep.mubr.bf16.mxu1 %v3098_v45  ;;  %v2342_v5 = vpack.c.bf16 %v2273_v10, %v2272_v44  ;;  %v2126_v51 = vadd.f32 %v9656_v57, %v2125_v55  ;;  %v2980_v3 = vmax.f32 %v2518_v33, 0.0 }
 0x2a4   : > { %v7703_v15 = vpop.f32.mrf.mxu1  ;;  %v2520_v59 = vpop.f32.mrf.mxu0  ;;  %7881 = vmatmul.mubr.bf16.gmra.mxu1 %v3099_v62  ;;  %v2278_v58 = vmax.f32 %v2134_v41, 0.0 }
 0x2a5   : > { %v2137_v36 = vadd.f32 %v9656_v57, %v7703_v15  ;;  %v2521_v43 = vadd.f32 %v9648_v42, %v2520_v59  ;;  %7840 = vmatprep.mubr.bf16.mxu0 %v2342_v5  ;;  %v2983_v6 = vmax.f32 %v2529_v26, 0.0  ;;  %v2276_v53 = vmax.f32 %v2126_v51, 0.0  ;;  %v8219_v51 = vld [vmem:[%s11005_s9] sm:$0xff]  }
 0x2a6   : > { %v2128_v40 = vpop.f32.mrf.mxu1  ;;  %v7746_v34 = vpop.f32.mrf.mxu0  ;;  %7841 = vmatmul.mubr.bf16.gmra.mxu0 %v2343_v28  ;;  %8010 = vmatprep.subr.bf16.mxu0 %v8219_v51 }
 0x2a7   : > { %v2981_v27 = vmax.f32 %v2521_v43, 0.0  ;;  %v2129_v56 = vadd.f32 %v9656_v57, %v2128_v40  ;;  %v2279_v7 = vmax.f32 %v2137_v36, 0.0  ;;  %v3101_v52 = vpack.c.bf16 %v2983_v6, %v2982_v16  ;;  %8011 = vmatpush3.bf16.msra.mxu0 %v8219_v51 }
 0x2a8   : > { %v7706_v22 = vpop.f32.mrf.mxu1  ;;  %v2533_v54 = vpop.f32.mrf.mxu0  ;;  %v2542_v1 = vadd.f32 %v7746_v34, %v9648_v42 }
 0x2a9   : > { %v2277_v0 = vmax.f32 %v2129_v56, 0.0  ;;  %v3100_v21 = vpack.c.bf16 %v2981_v27, %v2980_v3  ;;  %v2534_v46 = vadd.f32 %v9648_v42, %v2533_v54  ;;  %v2345_v24 = vpack.c.bf16 %v2279_v7, %v2278_v58 }
 0x2aa   : > { %v2141_v2 = vpop.f32.mrf.mxu1  ;;  %v7747_v14 = vpop.f32.mrf.mxu0  ;;  %v2150_v31 = vadd.f32 %v9656_v57, %v7706_v22  ;;  %v2986_v38 = vmax.f32 %v2542_v1, 0.0 }
 0x2ab   : > { %v2545_v35 = vadd.f32 %v7747_v14, %v9648_v42  ;;  %7884 = vmatprep.mubr.bf16.mxu1 %v3100_v21  ;;  %v2344_v50 = vpack.c.bf16 %v2277_v0, %v2276_v53  ;;  %v2142_v17 = vadd.f32 %v9656_v57, %v2141_v2  ;;  %v2984_v20 = vmax.f32 %v2534_v46, 0.0 }
 0x2ac   : > { %v7707_v63 = vpop.f32.mrf.mxu1  ;;  %v2536_v32 = vpop.f32.mrf.mxu0  ;;  %7885 = vmatmul.mubr.bf16.gmra.mxu1 %v3101_v52  ;;  %v2282_v18 = vmax.f32 %v2150_v31, 0.0 }
 0x2ad   : > { %v2153_v12 = vadd.f32 %v9656_v57, %v7707_v63  ;;  %v2537_v4 = vadd.f32 %v9648_v42, %v2536_v32  ;;  %7844 = vmatprep.mubr.bf16.mxu0 %v2344_v50  ;;  %v2987_v8 = vmax.f32 %v2545_v35, 0.0  ;;  %v2280_v61 = vmax.f32 %v2142_v17, 0.0 }
 0x2ae   : > { %v2144_v13 = vpop.f32.mrf.mxu1  ;;  %v7750_v49 = vpop.f32.mrf.mxu0  ;;  %7845 = vmatmul.mubr.bf16.gmra.mxu0 %v2345_v24 }
 0x2af   : > { %v2985_v48 = vmax.f32 %v2537_v4, 0.0  ;;  %v2145_v39 = vadd.f32 %v9656_v57, %v2144_v13  ;;  %v2283_v11 = vmax.f32 %v2153_v12, 0.0  ;;  %v3103_v25 = vpack.c.bf16 %v2987_v8, %v2986_v38 }
 0x2b0   : > { %v2549_v9 = vpop.f32.mrf.mxu0  ;;  %v2558_v57 = vadd.f32 %v7750_v49, %v9648_v42 }
 0x2b1   : > { %v2281_v19 = vmax.f32 %v2145_v39, 0.0  ;;  %v3102_v23 = vpack.c.bf16 %v2985_v48, %v2984_v20  ;;  %v2550_v29 = vadd.f32 %v9648_v42, %v2549_v9  ;;  %v2347_v60 = vpack.c.bf16 %v2283_v11, %v2282_v18 }
 0x2b2   : > { %v7751_v47 = vpop.f32.mrf.mxu0  ;;  %v2990_v59 = vmax.f32 %v2558_v57, 0.0 }
 0x2b3   : > { %v2561_v10 = vadd.f32 %v7751_v47, %v9648_v42  ;;  %7888 = vmatprep.mubr.bf16.mxu1 %v3102_v23  ;;  %v2346_v44 = vpack.c.bf16 %v2281_v19, %v2280_v61  ;;  %v2988_v62 = vmax.f32 %v2550_v29, 0.0 }
 0x2b4   : > { %v2552_v55 = vpop.f32.mrf.mxu0  ;;  %7889 = vmatmul.mubr.bf16.gmra.mxu1 %v3103_v25 }
 0x2b5   : > { %v2553_v45 = vadd.f32 %v9648_v42, %v2552_v55  ;;  %7848 = vmatprep.mubr.bf16.mxu0 %v2346_v44  ;;  %v2991_v26 = vmax.f32 %v2561_v10, 0.0 }
 0x2b6   : > { %v7754_v30 = vpop.f32.mrf.mxu0  ;;  %7849 = vmatmul.mubr.bf16.gmra.mxu0 %v2347_v60 }
 0x2b7   : > { %v2989_v33 = vmax.f32 %v2553_v45, 0.0  ;;  %v3105_v37 = vpack.c.bf16 %v2991_v26, %v2990_v59  ;;  %v2574_v34 = vadd.f32 %v7754_v30, %v9648_v42 }
 0x2b8   : > { %v2565_v15 = vpop.f32.mrf.mxu0 }
 0x2b9   : > { %v3104_v5 = vpack.c.bf16 %v2989_v33, %v2988_v62  ;;  %v2566_v36 = vadd.f32 %v9648_v42, %v2565_v15  ;;  %v2994_v54 = vmax.f32 %v2574_v34, 0.0 }
 0x2ba   : > { %v7755_v28 = vpop.f32.mrf.mxu0 }
 0x2bb   : > { %v2577_v43 = vadd.f32 %v7755_v28, %v9648_v42  ;;  %7892 = vmatprep.mubr.bf16.mxu1 %v3104_v5  ;;  %v2992_v27 = vmax.f32 %v2566_v36, 0.0 }
 0x2bc   : > { %v2568_v40 = vpop.f32.mrf.mxu0  ;;  %7893 = vmatmul.mubr.bf16.gmra.mxu1 %v3105_v37 }
 0x2bd   : > { %v2569_v41 = vadd.f32 %v9648_v42, %v2568_v40  ;;  %v2995_v56 = vmax.f32 %v2577_v43, 0.0 }
 0x2be   : > { %v7758_v6 = vpop.f32.mrf.mxu0 }
 0x2bf   : > { %v2993_v3 = vmax.f32 %v2569_v41, 0.0  ;;  %v3107_v0 = vpack.c.bf16 %v2995_v56, %v2994_v54  ;;  %v2590_v21 = vadd.f32 %v7758_v6, %v9648_v42 }
 0x2c0   : > { %v2581_v22 = vpop.f32.mrf.mxu0 }
 0x2c1   : > { %v3106_v16 = vpack.c.bf16 %v2993_v3, %v2992_v27  ;;  %v2582_v53 = vadd.f32 %v9648_v42, %v2581_v22  ;;  %v2998_v32 = vmax.f32 %v2590_v21, 0.0 }
 0x2c2   : > { %v7759_v7 = vpop.f32.mrf.mxu0 }
 0x2c3   : > { %v2593_v2 = vadd.f32 %v7759_v7, %v9648_v42  ;;  %7896 = vmatprep.mubr.bf16.mxu1 %v3106_v16  ;;  %v2996_v46 = vmax.f32 %v2582_v53, 0.0 }
 0x2c4   : > { %v2584_v14 = vpop.f32.mrf.mxu0  ;;  %7897 = vmatmul.mubr.bf16.gmra.mxu1 %v3107_v0 }
 0x2c5   : > { %v2585_v58 = vadd.f32 %v9648_v42, %v2584_v14  ;;  %v2999_v35 = vmax.f32 %v2593_v2, 0.0 }
 0x2c6   : > { %v7762_v52 = vpop.f32.mrf.mxu0 }
 0x2c7   : > { %v2997_v1 = vmax.f32 %v2585_v58, 0.0  ;;  %v3109_v17 = vpack.c.bf16 %v2999_v35, %v2998_v32  ;;  %v2606_v13 = vadd.f32 %v7762_v52, %v9648_v42 }
 0x2c8   : > { %v2597_v63 = vpop.f32.mrf.mxu0 }
 0x2c9   : > { %v3108_v50 = vpack.c.bf16 %v2997_v1, %v2996_v46  ;;  %v2598_v12 = vadd.f32 %v9648_v42, %v2597_v63  ;;  %v3002_v9 = vmax.f32 %v2606_v13, 0.0 }
 0x2ca   : > { %v7763_v24 = vpop.f32.mrf.mxu0 }
 0x2cb   : > { %v2609_v4 = vadd.f32 %v7763_v24, %v9648_v42  ;;  %7900 = vmatprep.mubr.bf16.mxu1 %v3108_v50  ;;  %v3000_v8 = vmax.f32 %v2598_v12, 0.0 }
 0x2cc   : > { %v2600_v31 = vpop.f32.mrf.mxu0  ;;  %7901 = vmatmul.mubr.bf16.gmra.mxu1 %v3109_v17 }
 0x2cd   : > { %v2601_v49 = vadd.f32 %v9648_v42, %v2600_v31  ;;  %v3003_v48 = vmax.f32 %v2609_v4, 0.0 }
 0x2ce   : > { %v7766_v20 = vpop.f32.mrf.mxu0 }
 0x2cf   : > { %v3001_v39 = vmax.f32 %v2601_v49, 0.0  ;;  %v3111_v19 = vpack.c.bf16 %v3003_v48, %v3002_v9  ;;  %v2622_v25 = vadd.f32 %v7766_v20, %v9648_v42 }
 0x2d0   : > { %v2613_v38 = vpop.f32.mrf.mxu0 }
 0x2d1   : > { %v3110_v61 = vpack.c.bf16 %v3001_v39, %v3000_v8  ;;  %v2614_v23 = vadd.f32 %v9648_v42, %v2613_v38  ;;  %v3006_v45 = vmax.f32 %v2622_v25, 0.0 }
 0x2d2   : > { %v7767_v11 = vpop.f32.mrf.mxu0 }
 0x2d3   : > { %v2625_v18 = vadd.f32 %v7767_v11, %v9648_v42  ;;  %7904 = vmatprep.mubr.bf16.mxu1 %v3110_v61  ;;  %v3004_v44 = vmax.f32 %v2614_v23, 0.0 }
 0x2d4   : > { %v2616_v47 = vpop.f32.mrf.mxu0  ;;  %7905 = vmatmul.mubr.bf16.gmra.mxu1 %v3111_v19 }
 0x2d5   : > { %v2617_v29 = vadd.f32 %v9648_v42, %v2616_v47  ;;  %v3007_v55 = vmax.f32 %v2625_v18, 0.0 }
 0x2d6   : > { %v7770_v10 = vpop.f32.mrf.mxu0 }
 0x2d7   : > { %v3005_v60 = vmax.f32 %v2617_v29, 0.0  ;;  %v3113_v26 = vpack.c.bf16 %v3007_v55, %v3006_v45  ;;  %v2638_v5 = vadd.f32 %v7770_v10, %v9648_v42 }
 0x2d8   : > { %v2629_v57 = vpop.f32.mrf.mxu0 }
 0x2d9   : > { %v3112_v30 = vpack.c.bf16 %v3005_v60, %v3004_v44  ;;  %v2630_v33 = vadd.f32 %v9648_v42, %v2629_v57  ;;  %v3010_v34 = vmax.f32 %v2638_v5, 0.0 }
 0x2da   : > { %v7771_v62 = vpop.f32.mrf.mxu0 }
 0x2db   : > { %v2641_v15 = vadd.f32 %v7771_v62, %v9648_v42  ;;  %7908 = vmatprep.mubr.bf16.mxu1 %v3112_v30  ;;  %v3008_v36 = vmax.f32 %v2630_v33, 0.0 }
 0x2dc   : > { %v2632_v59 = vpop.f32.mrf.mxu0  ;;  %7909 = vmatmul.mubr.bf16.gmra.mxu1 %v3113_v26 }
 0x2dd   : > { %v2633_v28 = vadd.f32 %v9648_v42, %v2632_v59  ;;  %v3011_v43 = vmax.f32 %v2641_v15, 0.0 }
 0x2de   : > { %v7774_v37 = vpop.f32.mrf.mxu0 }
 0x2df   : > { %v3009_v51 = vmax.f32 %v2633_v28, 0.0  ;;  %v3115_v27 = vpack.c.bf16 %v3011_v43, %v3010_v34  ;;  %v2654_v54 = vadd.f32 %v7774_v37, %v9648_v42 }
 0x2e0   : > { %v2645_v40 = vpop.f32.mrf.mxu0 }
 0x2e1   : > { %v3114_v41 = vpack.c.bf16 %v3009_v51, %v3008_v36  ;;  %v2646_v56 = vadd.f32 %v9648_v42, %v2645_v40  ;;  %v3014_v21 = vmax.f32 %v2654_v54, 0.0 }
 0x2e2   : > { %v7775_v6 = vpop.f32.mrf.mxu0 }
 0x2e3   : > { %v2657_v3 = vadd.f32 %v7775_v6, %v9648_v42  ;;  %7912 = vmatprep.mubr.bf16.mxu1 %v3114_v41  ;;  %v3012_v0 = vmax.f32 %v2646_v56, 0.0 }
 0x2e4   : > { %v2648_v22 = vpop.f32.mrf.mxu0  ;;  %7913 = vmatmul.mubr.bf16.gmra.mxu1 %v3115_v27 }
 0x2e5   : > { %v2649_v16 = vadd.f32 %v9648_v42, %v2648_v22  ;;  %v3015_v53 = vmax.f32 %v2657_v3, 0.0 }
 0x2e6   : > { %v7778_v7 = vpop.f32.mrf.mxu0 }
 0x2e7   : > { %v3013_v2 = vmax.f32 %v2649_v16, 0.0  ;;  %v3117_v46 = vpack.c.bf16 %v3015_v53, %v3014_v21  ;;  %v2670_v32 = vadd.f32 %v7778_v7, %v9648_v42 }
 0x2e8   : > { %v2661_v14 = vpop.f32.mrf.mxu0 }
 0x2e9   : > { %v3116_v58 = vpack.c.bf16 %v3013_v2, %v3012_v0  ;;  %v2662_v35 = vadd.f32 %v9648_v42, %v2661_v14  ;;  %v3018_v13 = vmax.f32 %v2670_v32, 0.0 }
 0x2ea   : > { %v7779_v52 = vpop.f32.mrf.mxu0 }
 0x2eb   : > { %v2673_v1 = vadd.f32 %v7779_v52, %v9648_v42  ;;  %7916 = vmatprep.mubr.bf16.mxu1 %v3116_v58  ;;  %v3016_v17 = vmax.f32 %v2662_v35, 0.0 }
 0x2ec   : > { %v2664_v63 = vpop.f32.mrf.mxu0  ;;  %7917 = vmatmul.mubr.bf16.gmra.mxu1 %v3117_v46 }
 0x2ed   : > { %v2665_v50 = vadd.f32 %v9648_v42, %v2664_v63  ;;  %v3019_v12 = vmax.f32 %v2673_v1, 0.0 }
 0x2ee   : > { %v7782_v24 = vpop.f32.mrf.mxu0 }
 0x2ef   : > { %v3017_v4 = vmax.f32 %v2665_v50, 0.0  ;;  %v3119_v8 = vpack.c.bf16 %v3019_v12, %v3018_v13  ;;  %v2686_v9 = vadd.f32 %v7782_v24, %v9648_v42 }
 0x2f0   : > { %v2677_v31 = vpop.f32.mrf.mxu0 }
 0x2f1   : > { %v3118_v49 = vpack.c.bf16 %v3017_v4, %v3016_v17  ;;  %v2678_v48 = vadd.f32 %v9648_v42, %v2677_v31  ;;  %v3022_v25 = vmax.f32 %v2686_v9, 0.0 }
 0x2f2   : > { %v7783_v20 = vpop.f32.mrf.mxu0 }
 0x2f3   : > { %v2689_v39 = vadd.f32 %v7783_v20, %v9648_v42  ;;  %7920 = vmatprep.mubr.bf16.mxu1 %v3118_v49  ;;  %v3020_v19 = vmax.f32 %v2678_v48, 0.0 }
 0x2f4   : > { %v2680_v38 = vpop.f32.mrf.mxu0  ;;  %7921 = vmatmul.mubr.bf16.gmra.mxu1 %v3119_v8 }
 0x2f5   : > { %v2681_v61 = vadd.f32 %v9648_v42, %v2680_v38  ;;  %v3023_v23 = vmax.f32 %v2689_v39, 0.0 }
 0x2f6   : > { %v7786_v11 = vpop.f32.mrf.mxu0 }
 0x2f7   : > { %v3021_v18 = vmax.f32 %v2681_v61, 0.0  ;;  %v3121_v44 = vpack.c.bf16 %v3023_v23, %v3022_v25  ;;  %v2702_v45 = vadd.f32 %v7786_v11, %v9648_v42 }
 0x2f8   : > { %v2693_v47 = vpop.f32.mrf.mxu0 }
 0x2f9   : > { %v3120_v29 = vpack.c.bf16 %v3021_v18, %v3020_v19  ;;  %v2694_v55 = vadd.f32 %v9648_v42, %v2693_v47  ;;  %v3026_v5 = vmax.f32 %v2702_v45, 0.0 }
 0x2fa   : > { %v7787_v10 = vpop.f32.mrf.mxu0 }
 0x2fb   : > { %v2705_v60 = vadd.f32 %v7787_v10, %v9648_v42  ;;  %7924 = vmatprep.mubr.bf16.mxu1 %v3120_v29  ;;  %v3024_v26 = vmax.f32 %v2694_v55, 0.0 }
 0x2fc   : > { %v2696_v57 = vpop.f32.mrf.mxu0  ;;  %7925 = vmatmul.mubr.bf16.gmra.mxu1 %v3121_v44 }
 0x2fd   : > { %v2697_v30 = vadd.f32 %v9648_v42, %v2696_v57  ;;  %v3027_v33 = vmax.f32 %v2705_v60, 0.0 }
 0x2fe   : > { %v7790_v62 = vpop.f32.mrf.mxu0 }
 0x2ff   : > { %v3025_v15 = vmax.f32 %v2697_v30, 0.0  ;;  %v3123_v36 = vpack.c.bf16 %v3027_v33, %v3026_v5  ;;  %v2718_v34 = vadd.f32 %v7790_v62, %v9648_v42 }
 0x300   : > { %v2709_v59 = vpop.f32.mrf.mxu0 }
 0x301   : > { %v3122_v28 = vpack.c.bf16 %v3025_v15, %v3024_v26  ;;  %v2710_v43 = vadd.f32 %v9648_v42, %v2709_v59  ;;  %v3030_v54 = vmax.f32 %v2718_v34, 0.0 }
 0x302   : > { %v7791_v37 = vpop.f32.mrf.mxu0 }
 0x303   : > { %v2721_v51 = vadd.f32 %v7791_v37, %v9648_v42  ;;  %7928 = vmatprep.mubr.bf16.mxu1 %v3122_v28  ;;  %v3028_v27 = vmax.f32 %v2710_v43, 0.0 }
 0x304   : > { %v2712_v40 = vpop.f32.mrf.mxu0  ;;  %7929 = vmatmul.mubr.bf16.gmra.mxu1 %v3123_v36 }
 0x305   : > { %v2713_v41 = vadd.f32 %v9648_v42, %v2712_v40  ;;  %v3031_v56 = vmax.f32 %v2721_v51, 0.0 }
 0x306   : > { %v7794_v6 = vpop.f32.mrf.mxu0 }
 0x307   : > { %v3029_v3 = vmax.f32 %v2713_v41, 0.0  ;;  %v3125_v0 = vpack.c.bf16 %v3031_v56, %v3030_v54  ;;  %v2734_v21 = vadd.f32 %v7794_v6, %v9648_v42 }
 0x308   : > { %v2725_v22 = vpop.f32.mrf.mxu0 }
 0x309   : > { %v3124_v16 = vpack.c.bf16 %v3029_v3, %v3028_v27  ;;  %v2726_v53 = vadd.f32 %v9648_v42, %v2725_v22  ;;  %v3034_v32 = vmax.f32 %v2734_v21, 0.0 }
 0x30a   : > { %v7795_v7 = vpop.f32.mrf.mxu0 }
 0x30b   : > { %v2737_v2 = vadd.f32 %v7795_v7, %v9648_v42  ;;  %7932 = vmatprep.mubr.bf16.mxu1 %v3124_v16  ;;  %v3032_v46 = vmax.f32 %v2726_v53, 0.0 }
 0x30c   : > { %v2728_v14 = vpop.f32.mrf.mxu0  ;;  %7933 = vmatmul.mubr.bf16.gmra.mxu1 %v3125_v0 }
 0x30d   : > { %v2729_v58 = vadd.f32 %v9648_v42, %v2728_v14  ;;  %v3035_v35 = vmax.f32 %v2737_v2, 0.0 }
 0x30e   : > { %v7798_v52 = vpop.f32.mrf.mxu0 }
 0x30f   : > { %v3033_v1 = vmax.f32 %v2729_v58, 0.0  ;;  %v3127_v17 = vpack.c.bf16 %v3035_v35, %v3034_v32  ;;  %v2750_v13 = vadd.f32 %v7798_v52, %v9648_v42 }
 0x310   : > { %v2741_v63 = vpop.f32.mrf.mxu0 }
 0x311   : > { %v3126_v50 = vpack.c.bf16 %v3033_v1, %v3032_v46  ;;  %v2742_v12 = vadd.f32 %v9648_v42, %v2741_v63  ;;  %v3038_v9 = vmax.f32 %v2750_v13, 0.0 }
 0x312   : > { %v7799_v24 = vpop.f32.mrf.mxu0 }
 0x313   : > { %v2753_v4 = vadd.f32 %v7799_v24, %v9648_v42  ;;  %7936 = vmatprep.mubr.bf16.mxu1 %v3126_v50  ;;  %v3036_v8 = vmax.f32 %v2742_v12, 0.0 }
 0x314   : > { %v2744_v31 = vpop.f32.mrf.mxu0  ;;  %7937 = vmatmul.mubr.bf16.gmra.mxu1 %v3127_v17 }
 0x315   : > { %v2745_v49 = vadd.f32 %v9648_v42, %v2744_v31  ;;  %v3039_v48 = vmax.f32 %v2753_v4, 0.0 }
 0x316   : > { %v7802_v20 = vpop.f32.mrf.mxu0 }
 0x317   : > { %v3037_v39 = vmax.f32 %v2745_v49, 0.0  ;;  %v3129_v19 = vpack.c.bf16 %v3039_v48, %v3038_v9  ;;  %v2766_v25 = vadd.f32 %v7802_v20, %v9648_v42 }
 0x318   : > { %v2757_v38 = vpop.f32.mrf.mxu0 }
 0x319   : > { %v3128_v61 = vpack.c.bf16 %v3037_v39, %v3036_v8  ;;  %v2758_v23 = vadd.f32 %v9648_v42, %v2757_v38  ;;  %v3042_v45 = vmax.f32 %v2766_v25, 0.0 }
 0x31a   : > { %v7803_v11 = vpop.f32.mrf.mxu0 }
 0x31b   : > { %v2769_v18 = vadd.f32 %v7803_v11, %v9648_v42  ;;  %7940 = vmatprep.mubr.bf16.mxu1 %v3128_v61  ;;  %v3040_v44 = vmax.f32 %v2758_v23, 0.0 }
 0x31c   : > { %v2760_v47 = vpop.f32.mrf.mxu0  ;;  %7941 = vmatmul.mubr.bf16.gmra.mxu1 %v3129_v19 }
 0x31d   : > { %v2761_v29 = vadd.f32 %v9648_v42, %v2760_v47  ;;  %v3043_v55 = vmax.f32 %v2769_v18, 0.0 }
 0x31e   : > { %v7806_v10 = vpop.f32.mrf.mxu0 }
 0x31f   : > { %v3041_v60 = vmax.f32 %v2761_v29, 0.0  ;;  %v3131_v26 = vpack.c.bf16 %v3043_v55, %v3042_v45  ;;  %v2782_v5 = vadd.f32 %v7806_v10, %v9648_v42 }
 0x320   : > { %v2773_v57 = vpop.f32.mrf.mxu0 }
 0x321   : > { %v3130_v30 = vpack.c.bf16 %v3041_v60, %v3040_v44  ;;  %v2774_v33 = vadd.f32 %v9648_v42, %v2773_v57  ;;  %v3046_v34 = vmax.f32 %v2782_v5, 0.0 }
 0x322   : > { %v7807_v62 = vpop.f32.mrf.mxu0 }
 0x323   : > { %v2785_v15 = vadd.f32 %v7807_v62, %v9648_v42  ;;  %7944 = vmatprep.mubr.bf16.mxu1 %v3130_v30  ;;  %v3044_v36 = vmax.f32 %v2774_v33, 0.0 }
 0x324   : > { %v2776_v59 = vpop.f32.mrf.mxu0  ;;  %7945 = vmatmul.mubr.bf16.gmra.mxu1 %v3131_v26 }
 0x325   : > { %v2777_v28 = vadd.f32 %v9648_v42, %v2776_v59  ;;  %v3047_v43 = vmax.f32 %v2785_v15, 0.0 }
 0x326   : > { %v7810_v37 = vpop.f32.mrf.mxu0 }
 0x327   : > { %v3045_v51 = vmax.f32 %v2777_v28, 0.0  ;;  %v3133_v27 = vpack.c.bf16 %v3047_v43, %v3046_v34  ;;  %v2798_v54 = vadd.f32 %v7810_v37, %v9648_v42 }
 0x328   : > { %v2789_v40 = vpop.f32.mrf.mxu0 }
 0x329   : > { %v3132_v41 = vpack.c.bf16 %v3045_v51, %v3044_v36  ;;  %v2790_v56 = vadd.f32 %v9648_v42, %v2789_v40  ;;  %v3050_v21 = vmax.f32 %v2798_v54, 0.0 }
 0x32a   : > { %v7811_v6 = vpop.f32.mrf.mxu0 }
 0x32b   : > { %v2801_v3 = vadd.f32 %v7811_v6, %v9648_v42  ;;  %7948 = vmatprep.mubr.bf16.mxu1 %v3132_v41  ;;  %v3048_v0 = vmax.f32 %v2790_v56, 0.0 }
 0x32c   : > { %v2792_v22 = vpop.f32.mrf.mxu0  ;;  %7949 = vmatmul.mubr.bf16.gmra.mxu1 %v3133_v27 }
 0x32d   : > { %v2793_v16 = vadd.f32 %v9648_v42, %v2792_v22  ;;  %v3051_v53 = vmax.f32 %v2801_v3, 0.0 }
 0x32e   : > { %v7814_v7 = vpop.f32.mrf.mxu0 }
 0x32f   : > { %v3049_v2 = vmax.f32 %v2793_v16, 0.0  ;;  %v3135_v46 = vpack.c.bf16 %v3051_v53, %v3050_v21  ;;  %v2814_v32 = vadd.f32 %v7814_v7, %v9648_v42  ;;  %v9792_v7 = vld [vmem:[%s11004_s8] ss:$0 sm:$0xff] }
 0x330   : > { %v2805_v14 = vpop.f32.mrf.mxu0 }
 0x331   : > { %v3134_v58 = vpack.c.bf16 %v3049_v2, %v3048_v0  ;;  %v2806_v35 = vadd.f32 %v9648_v42, %v2805_v14  ;;  %v3054_v13 = vmax.f32 %v2814_v32, 0.0 }
 0x332   : > { %v7815_v52 = vpop.f32.mrf.mxu0 }
 0x333   : > { %v2817_v1 = vadd.f32 %v7815_v52, %v9648_v42  ;;  %7952 = vmatprep.mubr.bf16.mxu1 %v3134_v58  ;;  %v3052_v17 = vmax.f32 %v2806_v35, 0.0  ;;  %v9800_v35 = vld [vmem:[%s11002_s6] ss:$0 sm:$0xff] }
 0x334   : > { %v2808_v63 = vpop.f32.mrf.mxu0  ;;  %7953 = vmatmul.mubr.bf16.gmra.mxu1 %v3135_v46 }
 0x335   : > { %v2809_v50 = vadd.f32 %v9648_v42, %v2808_v63  ;;  %v3055_v12 = vmax.f32 %v2817_v1, 0.0 }
 0x336   : > { %v7818_v24 = vpop.f32.mrf.mxu0 }
 0x337   : > { %v3053_v4 = vmax.f32 %v2809_v50, 0.0  ;;  %v3137_v8 = vpack.c.bf16 %v3055_v12, %v3054_v13  ;;  %v2830_v9 = vadd.f32 %v7818_v24, %v9648_v42 }
 0x338   : > { %v2821_v31 = vpop.f32.mrf.mxu0 }
 0x339   : > { %v3136_v49 = vpack.c.bf16 %v3053_v4, %v3052_v17  ;;  %v2822_v48 = vadd.f32 %v9648_v42, %v2821_v31  ;;  %v3058_v25 = vmax.f32 %v2830_v9, 0.0 }
 0x33a   : > { %v7819_v20 = vpop.f32.mrf.mxu0 }
 0x33b   : > { %v2833_v39 = vadd.f32 %v7819_v20, %v9648_v42  ;;  %7956 = vmatprep.mubr.bf16.mxu1 %v3136_v49  ;;  %v3056_v19 = vmax.f32 %v2822_v48, 0.0 }
 0x33c   : > { %v2824_v38 = vpop.f32.mrf.mxu0  ;;  %7957 = vmatmul.mubr.bf16.gmra.mxu1 %v3137_v8 }
 0x33d   : > { %v2825_v61 = vadd.f32 %v9648_v42, %v2824_v38  ;;  %v3059_v23 = vmax.f32 %v2833_v39, 0.0 }
 0x33e   : > { %v7822_v11 = vpop.f32.mrf.mxu0 }
 0x33f   : > { %v3057_v18 = vmax.f32 %v2825_v61, 0.0  ;;  %v3139_v44 = vpack.c.bf16 %v3059_v23, %v3058_v25  ;;  %v2846_v45 = vadd.f32 %v7822_v11, %v9648_v42 }
 0x340   : > { %v2837_v47 = vpop.f32.mrf.mxu0 }
 0x341   : > { %v3138_v29 = vpack.c.bf16 %v3057_v18, %v3056_v19  ;;  %v2838_v55 = vadd.f32 %v9648_v42, %v2837_v47  ;;  %v3062_v5 = vmax.f32 %v2846_v45, 0.0 }
 0x342   : > { %v7823_v10 = vpop.f32.mrf.mxu0 }
 0x343   : > { %v2849_v60 = vadd.f32 %v7823_v10, %v9648_v42  ;;  %7960 = vmatprep.mubr.bf16.mxu1 %v3138_v29  ;;  %v3060_v26 = vmax.f32 %v2838_v55, 0.0 }
 0x344   : > { %v2840_v57 = vpop.f32.mrf.mxu0  ;;  %7961 = vmatmul.mubr.bf16.gmra.mxu1 %v3139_v44 }
 0x345   : > { %v2841_v30 = vadd.f32 %v9648_v42, %v2840_v57  ;;  %v3063_v33 = vmax.f32 %v2849_v60, 0.0 }
 0x346   : > { %v7826_v62 = vpop.f32.mrf.mxu0 }
 0x347   : > { %v3061_v15 = vmax.f32 %v2841_v30, 0.0  ;;  %v3141_v36 = vpack.c.bf16 %v3063_v33, %v3062_v5  ;;  %v2862_v34 = vadd.f32 %v7826_v62, %v9648_v42 }
 0x348   : > { %v2853_v59 = vpop.f32.mrf.mxu0 }
 0x349   : > { %v3140_v28 = vpack.c.bf16 %v3061_v15, %v3060_v26  ;;  %v2854_v43 = vadd.f32 %v9648_v42, %v2853_v59  ;;  %v3066_v16 = vmax.f32 %v2862_v34, 0.0 }
 0x34a   : > { %v7827_v37 = vpop.f32.mrf.mxu0 }
 0x34b   : > { %v2865_v51 = vadd.f32 %v7827_v37, %v9648_v42  ;;  %7964 = vmatprep.mubr.bf16.mxu1 %v3140_v28  ;;  %v3064_v27 = vmax.f32 %v2854_v43, 0.0 }
 0x34c   : > { %v2856_v40 = vpop.f32.mrf.mxu0  ;;  %v7870_v6 = vpop.f32.mrf.mxu1  ;;  %7965 = vmatmul.mubr.bf16.gmra.mxu1 %v3141_v36 }
 0x34d   : > { %v2857_v41 = vadd.f32 %v9648_v42, %v2856_v40  ;;  %v3067_v56 = vmax.f32 %v2865_v51, 0.0  ;;  %v3270_v46 = vadd.f32 %v7870_v6, %v9792_v7 }
 0x34e   : > { %v7830_v22 = vpop.f32.mrf.mxu0  ;;  %v3261_v54 = vpop.f32.mrf.mxu1 }
 0x34f   : > { %v3065_v3 = vmax.f32 %v2857_v41, 0.0  ;;  %v3143_v21 = vpack.c.bf16 %v3067_v56, %v3066_v16  ;;  %v3262_v42 = vadd.f32 %v9792_v7, %v3261_v54  ;;  %v2878_v17 = vadd.f32 %v9800_v35, %v7830_v22 }
 0x350   : > { %v2869_v0 = vpop.f32.mrf.mxu0  ;;  %v7871_v53 = vpop.f32.mrf.mxu1  ;;  %v3774_v8 = vmax.f32 %v3270_v46, 0.0 }
 0x351   : > { %v3142_v2 = vpack.c.bf16 %v3065_v3, %v3064_v27  ;;  %v3273_v14 = vadd.f32 %v7871_v53, %v9792_v7  ;;  %v2870_v32 = vadd.f32 %v9800_v35, %v2869_v0  ;;  %v3772_v13 = vmax.f32 %v3262_v42, 0.0 }
 0x352   : > { %v7831_v58 = vpop.f32.mrf.mxu0  ;;  %v3264_v52 = vpop.f32.mrf.mxu1  ;;  %v3070_v19 = vmax.f32 %v2878_v17, 0.0 }
 0x353   : > { %7968 = vmatprep.mubr.bf16.mxu1 %v3142_v2  ;;  %v2881_v1 = vadd.f32 %v9800_v35, %v7831_v58  ;;  %v3265_v63 = vadd.f32 %v9792_v7, %v3264_v52  ;;  %v3775_v12 = vmax.f32 %v3273_v14, 0.0  ;;  %v3068_v38 = vmax.f32 %v2870_v32, 0.0 }
 0x354   : > { %v2872_v50 = vpop.f32.mrf.mxu0  ;;  %v7874_v24 = vpop.f32.mrf.mxu1  ;;  %7969 = vmatmul.mubr.bf16.gmra.mxu1 %v3143_v21 }
 0x355   : > { %v3773_v4 = vmax.f32 %v3265_v63, 0.0  ;;  %v2873_v31 = vadd.f32 %v9800_v35, %v2872_v50  ;;  %v3071_v48 = vmax.f32 %v2881_v1, 0.0  ;;  %v3901_v23 = vpack.c.bf16 %v3775_v12, %v3774_v8 }
 0x356   : > { %v7834_v49 = vpop.f32.mrf.mxu0  ;;  %v3277_v20 = vpop.f32.mrf.mxu1  ;;  %v3286_v55 = vadd.f32 %v7874_v24, %v9792_v7 }
 0x357   : > { %v3069_v39 = vmax.f32 %v2873_v31, 0.0  ;;  %v3900_v11 = vpack.c.bf16 %v3773_v4, %v3772_v13  ;;  %v3278_v47 = vadd.f32 %v9792_v7, %v3277_v20  ;;  %v3145_v44 = vpack.c.bf16 %v3071_v48, %v3070_v19 }
 0x358   : > { %v2885_v9 = vpop.f32.mrf.mxu0  ;;  %v7875_v61 = vpop.f32.mrf.mxu1  ;;  %v2894_v26 = vadd.f32 %v9800_v35, %v7834_v49  ;;  %v3778_v36 = vmax.f32 %v3286_v55, 0.0 }
 0x359   : > { %v3289_v18 = vadd.f32 %v7875_v61, %v9792_v7  ;;  %8012 = vmatprep.mubr.bf16.mxu0 %v3900_v11  ;;  %v3144_v10 = vpack.c.bf16 %v3069_v39, %v3068_v38  ;;  %v2886_v45 = vadd.f32 %v9800_v35, %v2885_v9  ;;  %v3776_v5 = vmax.f32 %v3278_v47, 0.0 }
 0x35a   : > { %v7835_v25 = vpop.f32.mrf.mxu0  ;;  %v3280_v29 = vpop.f32.mrf.mxu1  ;;  %8013 = vmatmul.mubr.bf16.vlgmr.msra.gmra.mxu0 %v3901_v23  ;;  %v3074_v27 = vmax.f32 %v2894_v26, 0.0 }
 0x35b   : > { %v2897_v60 = vadd.f32 %v9800_v35, %v7835_v25  ;;  %v3281_v57 = vadd.f32 %v9792_v7, %v3280_v29  ;;  %7972 = vmatprep.mubr.bf16.mxu1 %v3144_v10  ;;  %v3779_v33 = vmax.f32 %v3289_v18, 0.0  ;;  %v3072_v40 = vmax.f32 %v2886_v45, 0.0 }
 0x35c   : > { %v2888_v30 = vpop.f32.mrf.mxu0  ;;  %v7878_v62 = vpop.f32.mrf.mxu1  ;;  %7973 = vmatmul.mubr.bf16.gmra.mxu1 %v3145_v44 }
 0x35d   : > { %v3777_v15 = vmax.f32 %v3281_v57, 0.0  ;;  %v2889_v59 = vadd.f32 %v9800_v35, %v2888_v30  ;;  %v3075_v43 = vmax.f32 %v2897_v60, 0.0  ;;  %v3903_v56 = vpack.c.bf16 %v3779_v33, %v3778_v36 }
 0x35e   : > { %v7838_v28 = vpop.f32.mrf.mxu0  ;;  %v3293_v37 = vpop.f32.mrf.mxu1  ;;  %v3302_v2 = vadd.f32 %v7878_v62, %v9792_v7 }
 0x35f   : > { %v3073_v51 = vmax.f32 %v2889_v59, 0.0  ;;  %v3902_v6 = vpack.c.bf16 %v3777_v15, %v3776_v5  ;;  %v3294_v22 = vadd.f32 %v9792_v7, %v3293_v37  ;;  %v3147_v53 = vpack.c.bf16 %v3075_v43, %v3074_v27 }
 0x360   : > { %v2901_v34 = vpop.f32.mrf.mxu0  ;;  %v7879_v41 = vpop.f32.mrf.mxu1  ;;  %v2910_v46 = vadd.f32 %v9800_v35, %v7838_v28  ;;  %v3782_v12 = vmax.f32 %v3302_v2, 0.0 }
 0x361   : > { %v3305_v3 = vadd.f32 %v7879_v41, %v9792_v7  ;;  %8016 = vmatprep.mubr.bf16.mxu0 %v3902_v6  ;;  %v3146_v0 = vpack.c.bf16 %v3073_v51, %v3072_v40  ;;  %v2902_v42 = vadd.f32 %v9800_v35, %v2901_v34  ;;  %v3780_v50 = vmax.f32 %v3294_v22, 0.0 }
 0x362   : > { %v7839_v54 = vpop.f32.mrf.mxu0  ;;  %v3296_v16 = vpop.f32.mrf.mxu1  ;;  %8017 = vmatmul.mubr.bf16.gmra.mxu0 %v3903_v56  ;;  %v3078_v48 = vmax.f32 %v2910_v46, 0.0 }
 0x363   : > { %v2913_v14 = vadd.f32 %v9800_v35, %v7839_v54  ;;  %v3297_v21 = vadd.f32 %v9792_v7, %v3296_v16  ;;  %7976 = vmatprep.mubr.bf16.mxu1 %v3146_v0  ;;  %v3783_v1 = vmax.f32 %v3305_v3, 0.0  ;;  %v3076_v13 = vmax.f32 %v2902_v42, 0.0 }
 0x364   : > { %v2904_v58 = vpop.f32.mrf.mxu0  ;;  %v7882_v52 = vpop.f32.mrf.mxu1  ;;  %7977 = vmatmul.mubr.bf16.gmra.mxu1 %v3147_v53 }
 0x365   : > { %v3781_v63 = vmax.f32 %v3297_v21, 0.0  ;;  %v2905_v32 = vadd.f32 %v9800_v35, %v2904_v58  ;;  %v3079_v4 = vmax.f32 %v2913_v14, 0.0  ;;  %v3905_v39 = vpack.c.bf16 %v3783_v1, %v3782_v12 }
 0x366   : > { %v7842_v24 = vpop.f32.mrf.mxu0  ;;  %v3309_v17 = vpop.f32.mrf.mxu1  ;;  %v3318_v18 = vadd.f32 %v7882_v52, %v9792_v7 }
 0x367   : > { %v3077_v31 = vmax.f32 %v2905_v32, 0.0  ;;  %v3904_v8 = vpack.c.bf16 %v3781_v63, %v3780_v50  ;;  %v3310_v9 = vadd.f32 %v9792_v7, %v3309_v17  ;;  %v3149_v23 = vpack.c.bf16 %v3079_v4, %v3078_v48 }
 0x368   : > { %v2917_v49 = vpop.f32.mrf.mxu0  ;;  %v7883_v20 = vpop.f32.mrf.mxu1  ;;  %v2926_v55 = vadd.f32 %v9800_v35, %v7842_v24  ;;  %v3786_v33 = vmax.f32 %v3318_v18, 0.0 }
 0x369   : > { %v3321_v38 = vadd.f32 %v7883_v20, %v9792_v7  ;;  %8020 = vmatprep.mubr.bf16.mxu0 %v3904_v8  ;;  %v3148_v19 = vpack.c.bf16 %v3077_v31, %v3076_v13  ;;  %v2918_v29 = vadd.f32 %v9800_v35, %v2917_v49  ;;  %v3784_v30 = vmax.f32 %v3310_v9, 0.0 }
 0x36a   : > { %v7843_v61 = vpop.f32.mrf.mxu0  ;;  %v3312_v11 = vpop.f32.mrf.mxu1  ;;  %8021 = vmatmul.mubr.bf16.gmra.mxu0 %v3905_v39  ;;  %v3082_v43 = vmax.f32 %v2926_v55, 0.0 }
 0x36b   : > { %v2929_v47 = vadd.f32 %v9800_v35, %v7843_v61  ;;  %v3313_v25 = vadd.f32 %v9792_v7, %v3312_v11  ;;  %7980 = vmatprep.mubr.bf16.mxu1 %v3148_v19  ;;  %v3787_v60 = vmax.f32 %v3321_v38, 0.0  ;;  %v3080_v5 = vmax.f32 %v2918_v29, 0.0 }
 0x36c   : > { %v2920_v10 = vpop.f32.mrf.mxu0  ;;  %v7886_v44 = vpop.f32.mrf.mxu1  ;;  %7981 = vmatmul.mubr.bf16.gmra.mxu1 %v3149_v23 }
 0x36d   : > { %v3785_v57 = vmax.f32 %v3313_v25, 0.0  ;;  %v2921_v45 = vadd.f32 %v9800_v35, %v2920_v10  ;;  %v3083_v15 = vmax.f32 %v2929_v47, 0.0  ;;  %v3907_v51 = vpack.c.bf16 %v3787_v60, %v3786_v33 }
 0x36e   : > { %v7846_v62 = vpop.f32.mrf.mxu0  ;;  %v3325_v26 = vpop.f32.mrf.mxu1  ;;  %v3334_v41 = vadd.f32 %v7886_v44, %v9792_v7 }
 0x36f   : > { %v3081_v59 = vmax.f32 %v2921_v45, 0.0  ;;  %v3906_v36 = vpack.c.bf16 %v3785_v57, %v3784_v30  ;;  %v3326_v40 = vadd.f32 %v9792_v7, %v3325_v26  ;;  %v3151_v3 = vpack.c.bf16 %v3083_v15, %v3082_v43 }
 0x370   : > { %v2933_v28 = vpop.f32.mrf.mxu0  ;;  %v7887_v37 = vpop.f32.mrf.mxu1  ;;  %v2942_v0 = vadd.f32 %v9800_v35, %v7846_v62  ;;  %v3790_v63 = vmax.f32 %v3334_v41, 0.0 }
 0x371   : > { %v3337_v34 = vadd.f32 %v7887_v37, %v9792_v7  ;;  %8024 = vmatprep.mubr.bf16.mxu0 %v3906_v36  ;;  %v3150_v56 = vpack.c.bf16 %v3081_v59, %v3080_v5  ;;  %v2934_v22 = vadd.f32 %v9800_v35, %v2933_v28  ;;  %v3788_v14 = vmax.f32 %v3326_v40, 0.0 }
 0x372   : > { %v7847_v6 = vpop.f32.mrf.mxu0  ;;  %v3328_v27 = vpop.f32.mrf.mxu1  ;;  %8025 = vmatmul.mubr.bf16.gmra.mxu0 %v3907_v51  ;;  %v3086_v17 = vmax.f32 %v2942_v0, 0.0 }
 0x373   : > { %v2945_v54 = vadd.f32 %v9800_v35, %v7847_v6  ;;  %v3329_v16 = vadd.f32 %v9792_v7, %v3328_v27  ;;  %7984 = vmatprep.mubr.bf16.mxu1 %v3150_v56  ;;  %v3791_v21 = vmax.f32 %v3337_v34, 0.0  ;;  %v3084_v32 = vmax.f32 %v2934_v22, 0.0 }
 0x374   : > { %v2936_v53 = vpop.f32.mrf.mxu0  ;;  %v7890_v2 = vpop.f32.mrf.mxu1  ;;  %7985 = vmatmul.mubr.bf16.gmra.mxu1 %v3151_v3 }
 0x375   : > { %v3789_v42 = vmax.f32 %v3329_v16, 0.0  ;;  %v2937_v58 = vadd.f32 %v9800_v35, %v2936_v53  ;;  %v3087_v52 = vmax.f32 %v2945_v54, 0.0  ;;  %v3909_v31 = vpack.c.bf16 %v3791_v21, %v3790_v63 }
 0x376   : > { %v7850_v46 = vpop.f32.mrf.mxu0  ;;  %v3341_v1 = vpop.f32.mrf.mxu1  ;;  %v3350_v48 = vadd.f32 %v7890_v2, %v9792_v7 }
 0x377   : > { %v3908_v50 = vpack.c.bf16 %v3789_v42, %v3788_v14  ;;  %v3085_v24 = vmax.f32 %v2937_v58, 0.0  ;;  %v3342_v13 = vadd.f32 %v9792_v7, %v3341_v1  ;;  %v3153_v8 = vpack.c.bf16 %v3087_v52, %v3086_v17 }
 0x378   : > { %v2949_v12 = vpop.f32.mrf.mxu0  ;;  %v7891_v4 = vpop.f32.mrf.mxu1  ;;  %v2958_v19 = vadd.f32 %v9800_v35, %v7850_v46  ;;  %v3794_v44 = vmax.f32 %v3350_v48, 0.0 }
 0x379   : > { %v3353_v49 = vadd.f32 %v7891_v4, %v9792_v7  ;;  %8028 = vmatprep.mubr.bf16.mxu0 %v3908_v50  ;;  %v3152_v20 = vpack.c.bf16 %v3085_v24, %v3084_v32  ;;  %v2950_v9 = vadd.f32 %v9800_v35, %v2949_v12  ;;  %v3792_v47 = vmax.f32 %v3342_v13, 0.0 }
 0x37a   : > { %v7851_v39 = vpop.f32.mrf.mxu0  ;;  %v3344_v38 = vpop.f32.mrf.mxu1  ;;  %8029 = vmatmul.mubr.bf16.gmra.mxu0 %v3909_v31  ;;  %v3090_v62 = vmax.f32 %v2958_v19, 0.0 }
 0x37b   : > { %v2961_v61 = vadd.f32 %v9800_v35, %v7851_v39  ;;  %v3345_v11 = vadd.f32 %v9792_v7, %v3344_v38  ;;  %7988 = vmatprep.mubr.bf16.mxu1 %v3152_v20  ;;  %v3795_v25 = vmax.f32 %v3353_v49, 0.0  ;;  %v3088_v60 = vmax.f32 %v2950_v9, 0.0 }
 0x37c   : > { %v2952_v23 = vpop.f32.mrf.mxu0  ;;  %v7894_v18 = vpop.f32.mrf.mxu1  ;;  %7989 = vmatmul.mubr.bf16.gmra.mxu1 %v3153_v8 }
 0x37d   : > { %v3793_v29 = vmax.f32 %v3345_v11, 0.0  ;;  %v2953_v10 = vadd.f32 %v9800_v35, %v2952_v23  ;;  %v3091_v57 = vmax.f32 %v2961_v61, 0.0  ;;  %v3911_v33 = vpack.c.bf16 %v3795_v25, %v3794_v44 }
 0x37e   : > { %v3357_v55 = vpop.f32.mrf.mxu1  ;;  %v3366_v35 = vadd.f32 %v7894_v18, %v9792_v7 }
 0x37f   : > { %v3910_v45 = vpack.c.bf16 %v3793_v29, %v3792_v47  ;;  %v3089_v30 = vmax.f32 %v2953_v10, 0.0  ;;  %v3358_v15 = vadd.f32 %v9792_v7, %v3357_v55  ;;  %v3155_v37 = vpack.c.bf16 %v3091_v57, %v3090_v62 }
 0x380   : > { %v7895_v26 = vpop.f32.mrf.mxu1  ;;  %v3798_v6 = vmax.f32 %v3366_v35, 0.0 }
 0x381   : > { %v3369_v59 = vadd.f32 %v7895_v26, %v9792_v7  ;;  %8032 = vmatprep.mubr.bf16.mxu0 %v3910_v45  ;;  %v3154_v5 = vpack.c.bf16 %v3089_v30, %v3088_v60  ;;  %v3796_v51 = vmax.f32 %v3358_v15, 0.0 }
 0x382   : > { %v3360_v28 = vpop.f32.mrf.mxu1  ;;  %8033 = vmatmul.mubr.bf16.gmra.mxu0 %v3911_v33 }
 0x383   : > { %v3361_v36 = vadd.f32 %v9792_v7, %v3360_v28  ;;  %7992 = vmatprep.mubr.bf16.mxu1 %v3154_v5  ;;  %v3799_v40 = vmax.f32 %v3369_v59, 0.0 }
 0x384   : > { %v7898_v43 = vpop.f32.mrf.mxu1  ;;  %7993 = vmatmul.mubr.bf16.gmra.mxu1 %v3155_v37 }
 0x385   : > { %v3797_v34 = vmax.f32 %v3361_v36, 0.0  ;;  %v3913_v3 = vpack.c.bf16 %v3799_v40, %v3798_v6  ;;  %v3382_v0 = vadd.f32 %v7898_v43, %v9792_v7 }
 0x386   : > { %v3373_v41 = vpop.f32.mrf.mxu1 }
 0x387   : > { %v3912_v27 = vpack.c.bf16 %v3797_v34, %v3796_v51  ;;  %v3374_v22 = vadd.f32 %v9792_v7, %v3373_v41  ;;  %v3802_v52 = vmax.f32 %v3382_v0, 0.0 }
 0x388   : > { %v7899_v56 = vpop.f32.mrf.mxu1 }
 0x389   : > { %v3385_v54 = vadd.f32 %v7899_v56, %v9792_v7  ;;  %8036 = vmatprep.mubr.bf16.mxu0 %v3912_v27  ;;  %v3800_v14 = vmax.f32 %v3374_v22, 0.0 }
 0x38a   : > { %v3376_v16 = vpop.f32.mrf.mxu1  ;;  %8037 = vmatmul.mubr.bf16.gmra.mxu0 %v3913_v3 }
 0x38b   : > { %v3377_v53 = vadd.f32 %v9792_v7, %v3376_v16  ;;  %v3803_v21 = vmax.f32 %v3385_v54, 0.0 }
 0x38c   : > { %v7902_v2 = vpop.f32.mrf.mxu1 }
 0x38d   : > { %v3801_v42 = vmax.f32 %v3377_v53, 0.0  ;;  %v3915_v63 = vpack.c.bf16 %v3803_v21, %v3802_v52  ;;  %v3398_v17 = vadd.f32 %v7902_v2, %v9792_v7 }
 0x38e   : > { %v3389_v58 = vpop.f32.mrf.mxu1 }
 0x38f   : > { %v3914_v46 = vpack.c.bf16 %v3801_v42, %v3800_v14  ;;  %v3390_v32 = vadd.f32 %v9792_v7, %v3389_v58  ;;  %v3806_v8 = vmax.f32 %v3398_v17, 0.0 }
 0x390   : > { %v7903_v1 = vpop.f32.mrf.mxu1 }
 0x391   : > { %v3401_v50 = vadd.f32 %v7903_v1, %v9792_v7  ;;  %8040 = vmatprep.mubr.bf16.mxu0 %v3914_v46  ;;  %v3804_v31 = vmax.f32 %v3390_v32, 0.0 }
 0x392   : > { %v3392_v24 = vpop.f32.mrf.mxu1  ;;  %8041 = vmatmul.mubr.bf16.gmra.mxu0 %v3915_v63 }
 0x393   : > { %v3393_v12 = vadd.f32 %v9792_v7, %v3392_v24  ;;  %v3807_v13 = vmax.f32 %v3401_v50, 0.0 }
 0x394   : > { %v7906_v4 = vpop.f32.mrf.mxu1 }
 0x395   : > { %v3805_v49 = vmax.f32 %v3393_v12, 0.0  ;;  %v3917_v38 = vpack.c.bf16 %v3807_v13, %v3806_v8  ;;  %v3414_v19 = vadd.f32 %v7906_v4, %v9792_v7 }
 0x396   : > { %v3405_v20 = vpop.f32.mrf.mxu1 }
 0x397   : > { %v3916_v48 = vpack.c.bf16 %v3805_v49, %v3804_v31  ;;  %v3406_v9 = vadd.f32 %v9792_v7, %v3405_v20  ;;  %v3810_v44 = vmax.f32 %v3414_v19, 0.0 }
 0x398   : > { %v7907_v39 = vpop.f32.mrf.mxu1 }
 0x399   : > { %v3417_v61 = vadd.f32 %v7907_v39, %v9792_v7  ;;  %8044 = vmatprep.mubr.bf16.mxu0 %v3916_v48  ;;  %v3808_v47 = vmax.f32 %v3406_v9, 0.0 }
 0x39a   : > { %v3408_v11 = vpop.f32.mrf.mxu1  ;;  %8045 = vmatmul.mubr.bf16.gmra.mxu0 %v3917_v38 }
 0x39b   : > { %v3409_v23 = vadd.f32 %v9792_v7, %v3408_v11  ;;  %v3811_v25 = vmax.f32 %v3417_v61, 0.0 }
 0x39c   : > { %v7910_v18 = vpop.f32.mrf.mxu1 }
 0x39d   : > { %v3809_v29 = vmax.f32 %v3409_v23, 0.0  ;;  %v3919_v57 = vpack.c.bf16 %v3811_v25, %v3810_v44  ;;  %v3430_v26 = vadd.f32 %v7910_v18, %v9792_v7 }
 0x39e   : > { %v3421_v10 = vpop.f32.mrf.mxu1 }
 0x39f   : > { %v3918_v55 = vpack.c.bf16 %v3809_v29, %v3808_v47  ;;  %v3422_v45 = vadd.f32 %v9792_v7, %v3421_v10  ;;  %v3814_v35 = vmax.f32 %v3430_v26, 0.0 }
 0x3a0   : > { %v7911_v60 = vpop.f32.mrf.mxu1 }
 0x3a1   : > { %v3433_v30 = vadd.f32 %v7911_v60, %v9792_v7  ;;  %8048 = vmatprep.mubr.bf16.mxu0 %v3918_v55  ;;  %v3812_v59 = vmax.f32 %v3422_v45, 0.0 }
 0x3a2   : > { %v3424_v62 = vpop.f32.mrf.mxu1  ;;  %8049 = vmatmul.mubr.bf16.gmra.mxu0 %v3919_v57 }
 0x3a3   : > { %v3425_v33 = vadd.f32 %v9792_v7, %v3424_v62  ;;  %v3815_v5 = vmax.f32 %v3433_v30, 0.0 }
 0x3a4   : > { %v7914_v15 = vpop.f32.mrf.mxu1 }
 0x3a5   : > { %v3813_v28 = vmax.f32 %v3425_v33, 0.0  ;;  %v3921_v51 = vpack.c.bf16 %v3815_v5, %v3814_v35  ;;  %v3446_v6 = vadd.f32 %v7914_v15, %v9792_v7 }
 0x3a6   : > { %v3437_v37 = vpop.f32.mrf.mxu1 }
 0x3a7   : > { %v3920_v36 = vpack.c.bf16 %v3813_v28, %v3812_v59  ;;  %v3438_v40 = vadd.f32 %v9792_v7, %v3437_v37  ;;  %v3818_v0 = vmax.f32 %v3446_v6, 0.0 }
 0x3a8   : > { %v7915_v43 = vpop.f32.mrf.mxu1 }
 0x3a9   : > { %v3449_v34 = vadd.f32 %v7915_v43, %v9792_v7  ;;  %8052 = vmatprep.mubr.bf16.mxu0 %v3920_v36  ;;  %v3816_v3 = vmax.f32 %v3438_v40, 0.0 }
 0x3aa   : > { %v3440_v41 = vpop.f32.mrf.mxu1  ;;  %8053 = vmatmul.mubr.bf16.gmra.mxu0 %v3921_v51 }
 0x3ab   : > { %v3441_v27 = vadd.f32 %v9792_v7, %v3440_v41  ;;  %v3819_v22 = vmax.f32 %v3449_v34, 0.0 }
 0x3ac   : > { %v7918_v56 = vpop.f32.mrf.mxu1 }
 0x3ad   : > { %v3817_v54 = vmax.f32 %v3441_v27, 0.0  ;;  %v3923_v14 = vpack.c.bf16 %v3819_v22, %v3818_v0  ;;  %v3462_v52 = vadd.f32 %v7918_v56, %v9792_v7 }
 0x3ae   : > { %v3453_v16 = vpop.f32.mrf.mxu1 }
 0x3af   : > { %v3922_v53 = vpack.c.bf16 %v3817_v54, %v3816_v3  ;;  %v3454_v21 = vadd.f32 %v9792_v7, %v3453_v16  ;;  %v3822_v17 = vmax.f32 %v3462_v52, 0.0 }
 0x3b0   : > { %v7919_v2 = vpop.f32.mrf.mxu1 }
 0x3b1   : > { %v3465_v42 = vadd.f32 %v7919_v2, %v9792_v7  ;;  %8056 = vmatprep.mubr.bf16.mxu0 %v3922_v53  ;;  %v3820_v63 = vmax.f32 %v3454_v21, 0.0 }
 0x3b2   : > { %v3456_v58 = vpop.f32.mrf.mxu1  ;;  %8057 = vmatmul.mubr.bf16.gmra.mxu0 %v3923_v14 }
 0x3b3   : > { %v3457_v46 = vadd.f32 %v9792_v7, %v3456_v58  ;;  %v3823_v32 = vmax.f32 %v3465_v42, 0.0 }
 0x3b4   : > { %v7922_v1 = vpop.f32.mrf.mxu1 }
 0x3b5   : > { %v3821_v50 = vmax.f32 %v3457_v46, 0.0  ;;  %v3925_v31 = vpack.c.bf16 %v3823_v32, %v3822_v17  ;;  %v3478_v8 = vadd.f32 %v7922_v1, %v9792_v7 }
 0x3b6   : > { %v3469_v24 = vpop.f32.mrf.mxu1 }
 0x3b7   : > { %v3924_v12 = vpack.c.bf16 %v3821_v50, %v3820_v63  ;;  %v3470_v13 = vadd.f32 %v9792_v7, %v3469_v24  ;;  %v3826_v19 = vmax.f32 %v3478_v8, 0.0 }
 0x3b8   : > { %v7923_v4 = vpop.f32.mrf.mxu1 }
 0x3b9   : > { %v3481_v49 = vadd.f32 %v7923_v4, %v9792_v7  ;;  %8060 = vmatprep.mubr.bf16.mxu0 %v3924_v12  ;;  %v3824_v38 = vmax.f32 %v3470_v13, 0.0 }
 0x3ba   : > { %v3472_v20 = vpop.f32.mrf.mxu1  ;;  %8061 = vmatmul.mubr.bf16.gmra.mxu0 %v3925_v31 }
 0x3bb   : > { %v3473_v48 = vadd.f32 %v9792_v7, %v3472_v20  ;;  %v3827_v9 = vmax.f32 %v3481_v49, 0.0 }
 0x3bc   : > { %v7926_v39 = vpop.f32.mrf.mxu1 }
 0x3bd   : > { %v3825_v61 = vmax.f32 %v3473_v48, 0.0  ;;  %v3927_v47 = vpack.c.bf16 %v3827_v9, %v3826_v19  ;;  %v3494_v44 = vadd.f32 %v7926_v39, %v9792_v7 }
 0x3be   : > { %v3485_v11 = vpop.f32.mrf.mxu1 }
 0x3bf   : > { %v3926_v23 = vpack.c.bf16 %v3825_v61, %v3824_v38  ;;  %v3486_v25 = vadd.f32 %v9792_v7, %v3485_v11  ;;  %v3830_v26 = vmax.f32 %v3494_v44, 0.0 }
 0x3c0   : > { %v7927_v18 = vpop.f32.mrf.mxu1 }
 0x3c1   : > { %v3497_v29 = vadd.f32 %v7927_v18, %v9792_v7  ;;  %8064 = vmatprep.mubr.bf16.mxu0 %v3926_v23  ;;  %v3828_v57 = vmax.f32 %v3486_v25, 0.0 }
 0x3c2   : > { %v3488_v10 = vpop.f32.mrf.mxu1  ;;  %8065 = vmatmul.mubr.bf16.gmra.mxu0 %v3927_v47 }
 0x3c3   : > { %v3489_v55 = vadd.f32 %v9792_v7, %v3488_v10  ;;  %v3831_v45 = vmax.f32 %v3497_v29, 0.0 }
 0x3c4   : > { %v7930_v60 = vpop.f32.mrf.mxu1 }
 0x3c5   : > { %v3829_v30 = vmax.f32 %v3489_v55, 0.0  ;;  %v3929_v59 = vpack.c.bf16 %v3831_v45, %v3830_v26  ;;  %v3510_v35 = vadd.f32 %v7930_v60, %v9792_v7 }
 0x3c6   : > { %v3501_v62 = vpop.f32.mrf.mxu1 }
 0x3c7   : > { %v3928_v33 = vpack.c.bf16 %v3829_v30, %v3828_v57  ;;  %v3502_v5 = vadd.f32 %v9792_v7, %v3501_v62  ;;  %v3834_v6 = vmax.f32 %v3510_v35, 0.0 }
 0x3c8   : > { %v7931_v15 = vpop.f32.mrf.mxu1 }
 0x3c9   : > { %v3513_v28 = vadd.f32 %v7931_v15, %v9792_v7  ;;  %8068 = vmatprep.mubr.bf16.mxu0 %v3928_v33  ;;  %v3832_v51 = vmax.f32 %v3502_v5, 0.0 }
 0x3ca   : > { %v3504_v37 = vpop.f32.mrf.mxu1  ;;  %8069 = vmatmul.mubr.bf16.gmra.mxu0 %v3929_v59 }
 0x3cb   : > { %v3505_v36 = vadd.f32 %v9792_v7, %v3504_v37  ;;  %v3835_v40 = vmax.f32 %v3513_v28, 0.0 }
 0x3cc   : > { %v7934_v43 = vpop.f32.mrf.mxu1 }
 0x3cd   : > { %v3833_v34 = vmax.f32 %v3505_v36, 0.0  ;;  %v3931_v3 = vpack.c.bf16 %v3835_v40, %v3834_v6  ;;  %v3526_v0 = vadd.f32 %v7934_v43, %v9792_v7 }
 0x3ce   : > { %v3517_v41 = vpop.f32.mrf.mxu1 }
 0x3cf   : > { %v3930_v27 = vpack.c.bf16 %v3833_v34, %v3832_v51  ;;  %v3518_v22 = vadd.f32 %v9792_v7, %v3517_v41  ;;  %v3838_v52 = vmax.f32 %v3526_v0, 0.0 }
 0x3d0   : > { %v7935_v56 = vpop.f32.mrf.mxu1 }
 0x3d1   : > { %v3529_v54 = vadd.f32 %v7935_v56, %v9792_v7  ;;  %8072 = vmatprep.mubr.bf16.mxu0 %v3930_v27  ;;  %v3836_v14 = vmax.f32 %v3518_v22, 0.0 }
 0x3d2   : > { %v3520_v16 = vpop.f32.mrf.mxu1  ;;  %8073 = vmatmul.mubr.bf16.gmra.mxu0 %v3931_v3 }
 0x3d3   : > { %v3521_v53 = vadd.f32 %v9792_v7, %v3520_v16  ;;  %v3839_v21 = vmax.f32 %v3529_v54, 0.0 }
 0x3d4   : > { %v7938_v2 = vpop.f32.mrf.mxu1 }
 0x3d5   : > { %v3837_v42 = vmax.f32 %v3521_v53, 0.0  ;;  %v3933_v63 = vpack.c.bf16 %v3839_v21, %v3838_v52  ;;  %v3542_v17 = vadd.f32 %v7938_v2, %v9792_v7 }
 0x3d6   : > { %v3533_v58 = vpop.f32.mrf.mxu1 }
 0x3d7   : > { %v3932_v46 = vpack.c.bf16 %v3837_v42, %v3836_v14  ;;  %v3534_v32 = vadd.f32 %v9792_v7, %v3533_v58  ;;  %v3842_v8 = vmax.f32 %v3542_v17, 0.0 }
 0x3d8   : > { %v7939_v1 = vpop.f32.mrf.mxu1 }
 0x3d9   : > { %v3545_v50 = vadd.f32 %v7939_v1, %v9792_v7  ;;  %8076 = vmatprep.mubr.bf16.mxu0 %v3932_v46  ;;  %v3840_v31 = vmax.f32 %v3534_v32, 0.0 }
 0x3da   : > { %v3536_v24 = vpop.f32.mrf.mxu1  ;;  %8077 = vmatmul.mubr.bf16.gmra.mxu0 %v3933_v63 }
 0x3db   : > { %v3537_v12 = vadd.f32 %v9792_v7, %v3536_v24  ;;  %v3843_v13 = vmax.f32 %v3545_v50, 0.0 }
 0x3dc   : > { %v7942_v4 = vpop.f32.mrf.mxu1 }
 0x3dd   : > { %v3841_v49 = vmax.f32 %v3537_v12, 0.0  ;;  %v3935_v38 = vpack.c.bf16 %v3843_v13, %v3842_v8  ;;  %v3558_v19 = vadd.f32 %v7942_v4, %v9792_v7 }
 0x3de   : > { %v3549_v20 = vpop.f32.mrf.mxu1 }
 0x3df   : > { %v3934_v48 = vpack.c.bf16 %v3841_v49, %v3840_v31  ;;  %v3550_v9 = vadd.f32 %v9792_v7, %v3549_v20  ;;  %v3846_v44 = vmax.f32 %v3558_v19, 0.0 }
 0x3e0   : > { %v7943_v39 = vpop.f32.mrf.mxu1 }
 0x3e1   : > { %v3561_v61 = vadd.f32 %v7943_v39, %v9792_v7  ;;  %8080 = vmatprep.mubr.bf16.mxu0 %v3934_v48  ;;  %v3844_v47 = vmax.f32 %v3550_v9, 0.0 }
 0x3e2   : > { %v3552_v11 = vpop.f32.mrf.mxu1  ;;  %8081 = vmatmul.mubr.bf16.gmra.mxu0 %v3935_v38 }
 0x3e3   : > { %v3553_v23 = vadd.f32 %v9792_v7, %v3552_v11  ;;  %v3847_v25 = vmax.f32 %v3561_v61, 0.0 }
 0x3e4   : > { %v7946_v18 = vpop.f32.mrf.mxu1 }
 0x3e5   : > { %v3845_v29 = vmax.f32 %v3553_v23, 0.0  ;;  %v3937_v57 = vpack.c.bf16 %v3847_v25, %v3846_v44  ;;  %v3574_v26 = vadd.f32 %v7946_v18, %v9792_v7 }
 0x3e6   : > { %v3565_v10 = vpop.f32.mrf.mxu1 }
 0x3e7   : > { %v3936_v55 = vpack.c.bf16 %v3845_v29, %v3844_v47  ;;  %v3566_v45 = vadd.f32 %v9792_v7, %v3565_v10  ;;  %v3850_v35 = vmax.f32 %v3574_v26, 0.0 }
 0x3e8   : > { %v7947_v60 = vpop.f32.mrf.mxu1 }
 0x3e9   : > { %v3577_v30 = vadd.f32 %v7947_v60, %v9792_v7  ;;  %8084 = vmatprep.mubr.bf16.mxu0 %v3936_v55  ;;  %v3848_v59 = vmax.f32 %v3566_v45, 0.0 }
 0x3ea   : > { %v3568_v62 = vpop.f32.mrf.mxu1  ;;  %8085 = vmatmul.mubr.bf16.gmra.mxu0 %v3937_v57 }
 0x3eb   : > { %v3569_v33 = vadd.f32 %v9792_v7, %v3568_v62  ;;  %v3851_v5 = vmax.f32 %v3577_v30, 0.0 }
 0x3ec   : > { %v7950_v15 = vpop.f32.mrf.mxu1 }
 0x3ed   : > { %v3849_v28 = vmax.f32 %v3569_v33, 0.0  ;;  %v3939_v51 = vpack.c.bf16 %v3851_v5, %v3850_v35  ;;  %v3590_v6 = vadd.f32 %v7950_v15, %v9792_v7 }
 0x3ee   : > { %v3581_v37 = vpop.f32.mrf.mxu1 }
 0x3ef   : > { %v3938_v36 = vpack.c.bf16 %v3849_v28, %v3848_v59  ;;  %v3582_v40 = vadd.f32 %v9792_v7, %v3581_v37  ;;  %v3854_v0 = vmax.f32 %v3590_v6, 0.0 }
 0x3f0   : > { %v7951_v43 = vpop.f32.mrf.mxu1 }
 0x3f1   : > { %v3593_v34 = vadd.f32 %v7951_v43, %v9792_v7  ;;  %8088 = vmatprep.mubr.bf16.mxu0 %v3938_v36  ;;  %v3852_v3 = vmax.f32 %v3582_v40, 0.0 }
 0x3f2   : > { %v3584_v41 = vpop.f32.mrf.mxu1  ;;  %8089 = vmatmul.mubr.bf16.gmra.mxu0 %v3939_v51 }
 0x3f3   : > { %v3585_v27 = vadd.f32 %v9792_v7, %v3584_v41  ;;  %v3855_v22 = vmax.f32 %v3593_v34, 0.0 }
 0x3f4   : > { %v7954_v56 = vpop.f32.mrf.mxu1 }
 0x3f5   : > { %v3853_v54 = vmax.f32 %v3585_v27, 0.0  ;;  %v3941_v14 = vpack.c.bf16 %v3855_v22, %v3854_v0  ;;  %v3606_v52 = vadd.f32 %v7954_v56, %v9792_v7 }
 0x3f6   : > { %v3597_v16 = vpop.f32.mrf.mxu1 }
 0x3f7   : > { %v3940_v53 = vpack.c.bf16 %v3853_v54, %v3852_v3  ;;  %v3598_v21 = vadd.f32 %v9792_v7, %v3597_v16  ;;  %v3858_v17 = vmax.f32 %v3606_v52, 0.0  ;;  %v9928_v16 = vld [vmem:[%s11006_s10] ss:$0 sm:$0xff] }
 0x3f8   : > { %v7955_v2 = vpop.f32.mrf.mxu1 }
 0x3f9   : > { %v3609_v42 = vadd.f32 %v7955_v2, %v9792_v7  ;;  %8092 = vmatprep.mubr.bf16.mxu0 %v3940_v53  ;;  %v3856_v63 = vmax.f32 %v3598_v21, 0.0 }
 0x3fa   : > { %v3600_v58 = vpop.f32.mrf.mxu1  ;;  %8093 = vmatmul.mubr.bf16.gmra.mxu0 %v3941_v14 }
 0x3fb   : > { %v3601_v46 = vadd.f32 %v9792_v7, %v3600_v58  ;;  %v3859_v32 = vmax.f32 %v3609_v42, 0.0 }
 0x3fc   : > { %v7958_v1 = vpop.f32.mrf.mxu1 }
 0x3fd   : > { %v3857_v50 = vmax.f32 %v3601_v46, 0.0  ;;  %v3943_v31 = vpack.c.bf16 %v3859_v32, %v3858_v17  ;;  %v3622_v8 = vadd.f32 %v7958_v1, %v9792_v7 }
 0x3fe   : > { %v3613_v24 = vpop.f32.mrf.mxu1 }
 0x3ff   : > { %v3942_v12 = vpack.c.bf16 %v3857_v50, %v3856_v63  ;;  %v3614_v13 = vadd.f32 %v9792_v7, %v3613_v24  ;;  %v3862_v19 = vmax.f32 %v3622_v8, 0.0 }
 0x400   : > { %v7959_v4 = vpop.f32.mrf.mxu1 }
 0x401   : > { %v3625_v49 = vadd.f32 %v7959_v4, %v9792_v7  ;;  %8096 = vmatprep.mubr.bf16.mxu0 %v3942_v12  ;;  %v3860_v38 = vmax.f32 %v3614_v13, 0.0 }
 0x402   : > { %v3616_v20 = vpop.f32.mrf.mxu1  ;;  %8097 = vmatmul.mubr.bf16.gmra.mxu0 %v3943_v31 }
 0x403   : > { %v3617_v48 = vadd.f32 %v9792_v7, %v3616_v20  ;;  %v3863_v9 = vmax.f32 %v3625_v49, 0.0  ;;  %v9946_v20 = vld [vmem:[%s11004_s8] ss:$0 sm:$0xff] }
 0x404   : > { %v7962_v39 = vpop.f32.mrf.mxu1 }
 0x405   : > { %v3861_v61 = vmax.f32 %v3617_v48, 0.0  ;;  %v3945_v47 = vpack.c.bf16 %v3863_v9, %v3862_v19  ;;  %v3638_v44 = vadd.f32 %v7962_v39, %v9792_v7 }
 0x406   : > { %v3629_v11 = vpop.f32.mrf.mxu1 }
 0x407   : > { %v3944_v23 = vpack.c.bf16 %v3861_v61, %v3860_v38  ;;  %v3630_v25 = vadd.f32 %v9792_v7, %v3629_v11  ;;  %v3866_v26 = vmax.f32 %v3638_v44, 0.0 }
 0x408   : > { %v7963_v18 = vpop.f32.mrf.mxu1 }
 0x409   : > { %v3641_v29 = vadd.f32 %v7963_v18, %v9792_v7  ;;  %8100 = vmatprep.mubr.bf16.mxu0 %v3944_v23  ;;  %v3864_v57 = vmax.f32 %v3630_v25, 0.0 }
 0x40a   : > { %v3632_v10 = vpop.f32.mrf.mxu1  ;;  %8101 = vmatmul.mubr.bf16.gmra.mxu0 %v3945_v47 }
 0x40b   : > { %v3633_v55 = vadd.f32 %v9792_v7, %v3632_v10  ;;  %v3867_v45 = vmax.f32 %v3641_v29, 0.0 }
 0x40c   : > { %v7966_v60 = vpop.f32.mrf.mxu1 }
 0x40d   : > { %v3865_v30 = vmax.f32 %v3633_v55, 0.0  ;;  %v3947_v59 = vpack.c.bf16 %v3867_v45, %v3866_v26  ;;  %v3654_v35 = vadd.f32 %v7966_v60, %v9792_v7 }
 0x40e   : > { %v3645_v62 = vpop.f32.mrf.mxu1 }
 0x40f   : > { %v3946_v33 = vpack.c.bf16 %v3865_v30, %v3864_v57  ;;  %v3646_v5 = vadd.f32 %v9792_v7, %v3645_v62  ;;  %v3870_v6 = vmax.f32 %v3654_v35, 0.0 }
 0x410   : > { %v7967_v15 = vpop.f32.mrf.mxu1 }
 0x411   : > { %v3657_v28 = vadd.f32 %v7967_v15, %v9792_v7  ;;  %8104 = vmatprep.mubr.bf16.mxu0 %v3946_v33  ;;  %v3868_v51 = vmax.f32 %v3646_v5, 0.0 }
 0x412   : > { %v3648_v37 = vpop.f32.mrf.mxu1  ;;  %8105 = vmatmul.mubr.bf16.gmra.mxu0 %v3947_v59 }
 0x413   : > { %v3649_v36 = vadd.f32 %v9792_v7, %v3648_v37  ;;  %v3871_v40 = vmax.f32 %v3657_v28, 0.0 }
 0x414   : > { %v7970_v43 = vpop.f32.mrf.mxu1 }
 0x415   : > { %v3869_v34 = vmax.f32 %v3649_v36, 0.0  ;;  %v3949_v3 = vpack.c.bf16 %v3871_v40, %v3870_v6  ;;  %v3670_v53 = vadd.f32 %v7970_v43, %v9792_v7 }
 0x416   : > { %v3661_v41 = vpop.f32.mrf.mxu1 }
 0x417   : > { %v3948_v27 = vpack.c.bf16 %v3869_v34, %v3868_v51  ;;  %v3662_v22 = vadd.f32 %v9792_v7, %v3661_v41  ;;  %v3874_v50 = vmax.f32 %v3670_v53, 0.0 }
 0x418   : > { %v7971_v56 = vpop.f32.mrf.mxu1 }
 0x419   : > { %v3673_v54 = vadd.f32 %v7971_v56, %v9792_v7  ;;  %8108 = vmatprep.mubr.bf16.mxu0 %v3948_v27  ;;  %v3872_v42 = vmax.f32 %v3662_v22, 0.0 }
 0x41a   : > { %v3664_v0 = vpop.f32.mrf.mxu1  ;;  %v8014_v14 = vpop.f32.mrf.mxu0  ;;  %8109 = vmatmul.mubr.bf16.gmra.mxu0 %v3949_v3 }
 0x41b   : > { %v3665_v2 = vadd.f32 %v9792_v7, %v3664_v0  ;;  %v9933_v21 = vadd.f32 %v8014_v14, %v9928_v16  ;;  %v3875_v58 = vmax.f32 %v3673_v54, 0.0 }
 0x41c   : > { %v7974_v46 = vpop.f32.mrf.mxu1  ;;  %v4069_v1 = vpop.f32.mrf.mxu0 }
 0x41d   : > { %v3873_v52 = vmax.f32 %v3665_v2, 0.0  ;;  %v6307_v63 = vmul.f32 -1.442695, %v9933_v21  ;;  %v9937_v32 = vadd.f32 %v9928_v16, %v4069_v1  ;;  %v3951_v4 = vpack.c.bf16 %v3875_v58, %v3874_v50 }
 0x41e   : > { %v3677_v17 = vpop.f32.mrf.mxu1  ;;  %v8015_v12 = vpop.f32.mrf.mxu0  ;;  %v3686_v38 = vadd.f32 %v9946_v20, %v7974_v46 }
 0x41f   : > { %v3950_v24 = vpack.c.bf16 %v3873_v52, %v3872_v42  ;;  %8220 = vpow2.f32 %v6307_v63  ;;  %v6305_v7 = vmul.f32 -1.442695, %v9937_v32  ;;  %v9941_v31 = vadd.f32 %v8015_v12, %v9928_v16 }
 0x420   : > { %v7975_v13 = vpop.f32.mrf.mxu1  ;;  %v4072_v49 = vpop.f32.mrf.mxu0  ;;  %v3678_v8 = vadd.f32 %v9946_v20, %v3677_v17  ;;  %v3878_v60 = vmax.f32 %v3686_v38, 0.0  ;;  %v4580_v42 = vlaneseq }
 0x421   : > { %8112 = vmatprep.mubr.bf16.mxu0 %v3950_v24  ;;  %8222 = vpow2.f32 %v6305_v7  ;;  %v3689_v48 = vadd.f32 %v9946_v20, %v7975_v13  ;;  %v9951_v39 = vadd.f32 %v9928_v16, %v4072_v49  ;;  %v6308_v9 = vmul.f32 -1.442695, %v9941_v31 }
 0x422   : > { %v3680_v61 = vpop.f32.mrf.mxu1  ;;  %v8018_v11 = vpop.f32.mrf.mxu0  ;;  %8113 = vmatmul.mubr.bf16.gmra.mxu0 %v3951_v4  ;;  %v3876_v10 = vmax.f32 %v3678_v8, 0.0 }
 0x423   : > { %v6306_v19 = vmul.f32 -1.442695, %v9951_v39  ;;  %v3681_v23 = vadd.f32 %v9946_v20, %v3680_v61  ;;  %v9958_v18 = vadd.f32 %v8018_v11, %v9928_v16  ;;  %8224 = vpow2.f32 %v6308_v9 }
 0x424   : > { %v3879_v47 = vmax.f32 %v3689_v48, 0.0  ;;  %v7978_v25 = vpop.f32.mrf.mxu1  ;;  %v4085_v29 = vpop.f32.mrf.mxu0 }
 0x425   : > { %8226 = vpow2.f32 %v6306_v19  ;;  %v3877_v44 = vmax.f32 %v3681_v23, 0.0  ;;  %v6311_v55 = vmul.f32 -1.442695, %v9958_v18  ;;  %v9962_v57 = vadd.f32 %v9928_v16, %v4085_v29 }
 0x426   : > { %v3693_v45 = vpop.f32.mrf.mxu1  ;;  %v8019_v30 = vpop.f32.mrf.mxu0  ;;  %v3953_v33 = vpack.c.bf16 %v3879_v47, %v3878_v60  ;;  %v3702_v15 = vadd.f32 %v9946_v20, %v7978_v25  ;;  %v9995_v47 = vand.u32 127, %v4580_v42 }
 0x427   : > { %v3952_v62 = vpack.c.bf16 %v3877_v44, %v3876_v10  ;;  %8228 = vpow2.f32 %v6311_v55  ;;  %v9965_v26 = vadd.f32 %v8019_v30, %v9928_v16  ;;  %v6309_v59 = vmul.f32 -1.442695, %v9962_v57 }
 0x428   : > { %v7979_v5 = vpop.f32.mrf.mxu1  ;;  %v4088_v28 = vpop.f32.mrf.mxu0  ;;  %v3694_v37 = vadd.f32 %v9946_v20, %v3693_v45  ;;  %v3882_v56 = vmax.f32 %v3702_v15, 0.0  ;;  %vm4582_vm3 = vcmp.lt.s32.totalorder %v9995_v47, 3 }
 0x429   : > { %v6312_v35 = vmul.f32 -1.442695, %v9965_v26  ;;  %v3705_v36 = vadd.f32 %v9946_v20, %v7979_v5  ;;  %v9973_v43 = vadd.f32 %v9928_v16, %v4088_v28  ;;  %8116 = vmatprep.mubr.bf16.mxu0 %v3952_v62  ;;  %8230 = vpow2.f32 %v6309_v59 }
 0x42a   : > { %v3696_v51 = vpop.f32.mrf.mxu1  ;;  %v8022_v40 = vpop.f32.mrf.mxu0  ;;  %8117 = vmatmul.mubr.bf16.gmra.mxu0 %v3953_v33  ;;  %v3880_v53 = vmax.f32 %v3694_v37, 0.0 }
 0x42b   : > { %8232 = vpow2.f32 %v6312_v35  ;;  %v3883_v34 = vmax.f32 %v3705_v36, 0.0  ;;  %v6310_v41 = vmul.f32 -1.442695, %v9973_v43  ;;  %v3697_v6 = vadd.f32 %v9946_v20, %v3696_v51 }
 0x42c   : > { %v8221_v27 = vpop.eup %8220  ;;  %v9978_v3 = vadd.f32 %v8022_v40, %v9928_v16  ;;  %v7982_v22 = vpop.f32.mrf.mxu1 }
 0x42d   : > { %v4101_v54 = vpop.f32.mrf.mxu0  ;;  %v4969_v0 = vadd.f32 1.0, %v8221_v27  ;;  %8234 = vpow2.f32 %v6310_v41  ;;  %v3881_v2 = vmax.f32 %v3697_v6, 0.0  ;;  %v3955_v50 = vpack.c.bf16 %v3883_v34, %v3882_v56 }
 0x42e   : > { %v8223_v14 = vpop.eup %8222  ;;  %v6315_v58 = vmul.f32 -1.442695, %v9978_v3  ;;  %v9982_v52 = vadd.f32 %v9928_v16, %v4101_v54  ;;  %v3709_v46 = vpop.f32.mrf.mxu1  ;;  %v3718_v17 = vadd.f32 %v9946_v20, %v7982_v22 }
 0x42f   : > { %v8023_v1 = vpop.f32.mrf.mxu0  ;;  %8236 = vrcp.f32 %v4969_v0  ;;  %v4967_v63 = vadd.f32 1.0, %v8223_v14  ;;  %v3954_v24 = vpack.c.bf16 %v3881_v2, %v3880_v53  ;;  %v3710_v8 = vadd.f32 %v9946_v20, %v3709_v46 }
 0x430   : > { %8238 = vpow2.f32 %v6315_v58  ;;  %v6313_v12 = vmul.f32 -1.442695, %v9982_v52  ;;  %v9987_v7 = vadd.f32 %v8023_v1, %v9928_v16  ;;  %v7983_v4 = vpop.f32.mrf.mxu1  ;;  %v8225_v49 = vpop.eup %8224  ;;  %v3886_v55 = vmax.f32 %v3718_v17, 0.0 }
 0x431   : > { %v4104_v13 = vpop.f32.mrf.mxu0  ;;  %8240 = vrcp.f32 %v4967_v63  ;;  %v3721_v48 = vadd.f32 %v9946_v20, %v7983_v4  ;;  %8120 = vmatprep.mubr.bf16.mxu0 %v3954_v24  ;;  %v4970_v61 = vadd.f32 1.0, %v8225_v49  ;;  %v3884_v15 = vmax.f32 %v3710_v8, 0.0 }
 0x432   : > { %v9992_v38 = vadd.f32 %v9928_v16, %v4104_v13  ;;  %v8227_v9 = vpop.eup %8226  ;;  %8242 = vpow2.f32 %v6313_v12  ;;  %v6316_v11 = vmul.f32 -1.442695, %v9987_v7  ;;  %v3712_v19 = vpop.f32.mrf.mxu1  ;;  %8121 = vmatmul.mubr.bf16.gmra.mxu0 %v3955_v50 }
 0x433   : > { %v8026_v23 = vpop.f32.mrf.mxu0  ;;  %v4968_v25 = vadd.f32 1.0, %v8227_v9  ;;  %v3887_v29 = vmax.f32 %v3721_v48, 0.0  ;;  %v3713_v10 = vadd.f32 %v9946_v20, %v3712_v19  ;;  %8244 = vrcp.f32 %v4970_v61 }
 0x434   : > { %v8229_v44 = vpop.eup %8228  ;;  %v6314_v60 = vmul.f32 -1.442695, %v9992_v38  ;;  %v10000_v45 = vadd.f32 %v8026_v23, %v9928_v16  ;;  %v7986_v30 = vpop.f32.mrf.mxu1 }
 0x435   : > { %v4117_v62 = vpop.f32.mrf.mxu0  ;;  %8246 = vrcp.f32 %v4968_v25  ;;  %v4973_v33 = vadd.f32 1.0, %v8229_v44  ;;  %v3885_v59 = vmax.f32 %v3713_v10, 0.0  ;;  %v3957_v51 = vpack.c.bf16 %v3887_v29, %v3886_v55 }
 0x436   : > { %8248 = vpow2.f32 %v6316_v11  ;;  %v6319_v5 = vmul.f32 -1.442695, %v10000_v45  ;;  %v10004_v28 = vadd.f32 %v9928_v16, %v4117_v62  ;;  %v3725_v37 = vpop.f32.mrf.mxu1  ;;  %v8231_v36 = vpop.eup %8230  ;;  %v3734_v27 = vadd.f32 %v9946_v20, %v7986_v30 }
 0x437   : > { %v8027_v35 = vpop.f32.mrf.mxu0  ;;  %8250 = vrcp.f32 %v4973_v33  ;;  %v3956_v40 = vpack.c.bf16 %v3885_v59, %v3884_v15  ;;  %v4971_v6 = vadd.f32 1.0, %v8231_v36  ;;  %v3726_v53 = vadd.f32 %v9946_v20, %v3725_v37 }
 0x438   : > { %v10007_v34 = vadd.f32 %v8027_v35, %v9928_v16  ;;  %v8233_v41 = vpop.eup %8232  ;;  %8252 = vpow2.f32 %v6314_v60  ;;  %v6317_v56 = vmul.f32 -1.442695, %v10004_v28  ;;  %v7987_v22 = vpop.f32.mrf.mxu1  ;;  %v3890_v12 = vmax.f32 %v3734_v27, 0.0 }
 0x439   : > { %v4120_v54 = vpop.f32.mrf.mxu0  ;;  %v4974_v0 = vadd.f32 1.0, %v8233_v41  ;;  %8254 = vpow2.f32 %v6319_v5  ;;  %8124 = vmatprep.mubr.bf16.mxu0 %v3956_v40  ;;  %v3737_v42 = vadd.f32 %v9946_v20, %v7987_v22  ;;  %v3888_v9 = vmax.f32 %v3726_v53, 0.0 }
 0x43a   : > { %v8235_v2 = vpop.eup %8234  ;;  %8256 = vrcp.f32 %v4971_v6  ;;  %v6320_v14 = vmul.f32 -1.442695, %v10007_v34  ;;  %v10016_v58 = vadd.f32 %v9928_v16, %v4120_v54  ;;  %v3728_v46 = vpop.f32.mrf.mxu1  ;;  %8125 = vmatmul.mubr.bf16.gmra.mxu0 %v3957_v51 }
 0x43b   : > { %v8030_v1 = vpop.f32.mrf.mxu0  ;;  %8258 = vrcp.f32 %v4974_v0  ;;  %v4972_v63 = vadd.f32 1.0, %v8235_v2  ;;  %v3729_v50 = vadd.f32 %v9946_v20, %v3728_v46  ;;  %v3891_v4 = vmax.f32 %v3737_v42, 0.0 }
 0x43c   : > { %v10020_v24 = vadd.f32 %v8030_v1, %v9928_v16  ;;  %v8237_v17 = vpop.eup %8236  ;;  %8260 = vpow2.f32 %v6317_v56  ;;  %v6318_v13 = vmul.f32 -1.442695, %v10016_v58  ;;  %v7990_v49 = vpop.f32.mrf.mxu1 }
 0x43d   : > { %v4133_v8 = vpop.f32.mrf.mxu0  ;;  %v8239_v48 = vpop.eup %8238  ;;  %8262 = vrcp.f32 %v4972_v63  ;;  %v3889_v61 = vmax.f32 %v3729_v50, 0.0  ;;  %v5353_v23 = vsel %vm4582_vm3, %v8237_v17, %v9933_v21  ;;  %v3959_v55 = vpack.c.bf16 %v3891_v4, %v3890_v12 }
 0x43e   : > { %v6323_v11 = vmul.f32 -1.442695, %v10020_v24  ;;  %v8241_v19 = vpop.eup %8240  ;;  %v4977_v25 = vadd.f32 1.0, %v8239_v48  ;;  %8264 = vpow2.f32 %v6320_v14  ;;  %v3741_v29 = vpop.f32.mrf.mxu1  ;;  %v10033_v30 = vadd.f32 %v9928_v16, %v4133_v8 }
 0x43f   : > { %v8031_v10 = vpop.f32.mrf.mxu0  ;;  %v8243_v44 = vpop.eup %8242  ;;  %8266 = vpow2.f32 %v6318_v13  ;;  %v3958_v60 = vpack.c.bf16 %v3889_v61, %v3888_v9  ;;  %v5351_v62 = vsel %vm4582_vm3, %v8241_v19, %v9937_v32  ;;  %v3750_v33 = vadd.f32 %v9946_v20, %v7990_v49 }
 0x440   : > { %8268 = vrcp.f32 %v4977_v25  ;;  %v4975_v21 = vadd.f32 1.0, %v8243_v44  ;;  %v7991_v15 = vpop.f32.mrf.mxu1  ;;  %v8245_v5 = vpop.eup %8244  ;;  %v6321_v37 = vmul.f32 -1.442695, %v10033_v30  ;;  %v10041_v35 = vadd.f32 %v8031_v10, %v9928_v16 }
 0x441   : > { %v4136_v59 = vpop.f32.mrf.mxu0  ;;  %8270 = vpow2.f32 %v6323_v11  ;;  %v3753_v36 = vadd.f32 %v9946_v20, %v7991_v15  ;;  %8128 = vmatprep.mubr.bf16.mxu0 %v3958_v60  ;;  %v5354_v32 = vsel %vm4582_vm3, %v8245_v5, %v9941_v31  ;;  %v3742_v40 = vadd.f32 %v9946_v20, %v3741_v29 }
 0x442   : > { %v8247_v51 = vpop.eup %8246  ;;  %8272 = vrcp.f32 %v4975_v21  ;;  %v10049_v41 = vadd.f32 %v9928_v16, %v4136_v59  ;;  %v3744_v6 = vpop.f32.mrf.mxu1  ;;  %8129 = vmatmul.mubr.bf16.gmra.mxu0 %v3959_v55  ;;  %v6703_v22 = vpack.c.bf16 %v5354_v32, %v5353_v23  ;;  %v6324_v0 = vmul.f32 -1.442695, %v10041_v35 }
 0x443   : > { %v8034_v27 = vpop.f32.mrf.mxu0  ;;  %v8249_v56 = vpop.eup %8248  ;;  %v5352_v54 = vsel %vm4582_vm3, %v8247_v51, %v9951_v39  ;;  %8274 = vpow2.f32 %v6321_v37  ;;  %v3895_v14 = vmax.f32 %v3753_v36, 0.0  ;;  %v3894_v50 = vmax.f32 %v3750_v33, 0.0 }
 0x444   : > { %v8251_v31 = vpop.eup %8250  ;;  %v6698_v53 = vpack.c.bf16 %v5352_v54, %v5351_v62  ;;  %v4978_v2 = vadd.f32 1.0, %v8249_v56  ;;  %v6322_v42 = vmul.f32 -1.442695, %v10049_v41  ;;  %v7994_v46 = vpop.f32.mrf.mxu1  ;;  %7015 = vst [vmem:[%s10057_s14 + $0x8] sm:$0xff] %v6703_v22   ;;  %8276 = vpow2.f32 %v6324_v0 }
 0x445   : > { %v4149_v1 = vpop.f32.mrf.mxu0  ;;  %v8253_v63 = vpop.eup %8252  ;;  %v3745_v39 = vadd.f32 %v9946_v20, %v3744_v6  ;;  %v10062_v17 = vadd.f32 %v8034_v27, %v9928_v16  ;;  %v5357_v4 = vsel %vm4582_vm3, %v8251_v31, %v9958_v18  ;;  %v3892_v49 = vmax.f32 %v3742_v40, 0.0 }
 0x446   : > { %v8255_v12 = vpop.eup %8254  ;;  %6699 = vst [vmem:[%s10057_s14] sm:$0xff] %v6698_v53   ;;  %8278 = vrcp.f32 %v4978_v2  ;;  %v4976_v13 = vadd.f32 1.0, %v8253_v63  ;;  %v3757_v8 = vpop.f32.mrf.mxu1  ;;  %v3961_v25 = vpack.c.bf16 %v3895_v14, %v3894_v50  ;;  %v10070_v29 = vadd.f32 %v9946_v20, %v7994_v46 }
 0x447   : > { %v8035_v48 = vpop.f32.mrf.mxu0  ;;  %v8257_v9 = vpop.eup %8256  ;;  %v4981_v61 = vadd.f32 1.0, %v8255_v12  ;;  %8280 = vpow2.f32 %v6322_v42  ;;  %v3893_v11 = vmax.f32 %v3745_v39, 0.0  ;;  %v6327_v19 = vmul.f32 -1.442695, %v10062_v17 }
 0x448   : > { %v8259_v23 = vpop.eup %8258  ;;  %8282 = vrcp.f32 %v4976_v13  ;;  %v10073_v10 = vadd.f32 %v9928_v16, %v4149_v1  ;;  %v7995_v18 = vpop.f32.mrf.mxu1  ;;  %v5355_v60 = vsel %vm4582_vm3, %v8257_v9, %v9962_v57  ;;  %v3758_v57 = vadd.f32 %v9946_v20, %v3757_v8 }
 0x449   : > { %v4152_v44 = vpop.f32.mrf.mxu0  ;;  %v8261_v55 = vpop.eup %8260  ;;  %v5358_v62 = vsel %vm4582_vm3, %v8259_v23, %v9965_v26  ;;  %8284 = vrcp.f32 %v4981_v61  ;;  %v3960_v21 = vpack.c.bf16 %v3893_v11, %v3892_v49  ;;  %v10087_v32 = vadd.f32 %v8035_v48, %v9928_v16 }
 0x44a   : > { %v8263_v33 = vpop.eup %8262  ;;  %v6713_v15 = vpack.c.bf16 %v5358_v62, %v5357_v4  ;;  %v4979_v59 = vadd.f32 1.0, %v8261_v55  ;;  %8286 = vpow2.f32 %v6327_v19  ;;  %v6325_v5 = vmul.f32 -1.442695, %v10073_v10  ;;  %v3760_v40 = vpop.f32.mrf.mxu1 }
 0x44b   : > { %v8038_v37 = vpop.f32.mrf.mxu0  ;;  %v8265_v36 = vpop.eup %8264  ;;  %v5356_v51 = vsel %vm4582_vm3, %v8263_v33, %v9973_v43  ;;  %v3769_v26 = vadd.f32 %v9946_v20, %v7995_v18  ;;  %8132 = vmatprep.mubr.bf16.mxu0 %v3960_v21  ;;  %v10092_v22 = vadd.f32 %v9928_v16, %v4152_v44  ;;  %v6328_v31 = vmul.f32 -1.442695, %v10087_v32 }
 0x44c   : > { %v8267_v6 = vpop.eup %8266  ;;  %7017 = vst [vmem:[%s10057_s14 + $0x18] sm:$0xff] %v6713_v15   ;;  %v6708_v27 = vpack.c.bf16 %v5356_v51, %v5355_v60  ;;  %8288 = vrcp.f32 %v4979_v59  ;;  %v4982_v56 = vadd.f32 1.0, %v8265_v36  ;;  %8133 = vmatmul.mubr.bf16.gmra.mxu0 %v3961_v25  ;;  %v3898_v2 = vmax.f32 %v10070_v29, 0.0 }
 0x44d   : > { %v4165_v43 = vpop.f32.mrf.mxu0  ;;  %v8269_v54 = vpop.eup %8268  ;;  %v4980_v0 = vadd.f32 1.0, %v8267_v6  ;;  %8290 = vpow2.f32 %v6325_v5  ;;  %v6326_v14 = vmul.f32 -1.442695, %v10092_v22  ;;  %v3761_v42 = vadd.f32 %v9946_v20, %v3760_v40 }
 0x44e   : > { %v8271_v53 = vpop.eup %8270  ;;  %7016 = vst [vmem:[%s10057_s14 + $0x10] sm:$0xff] %v6708_v27   ;;  %8292 = vrcp.f32 %v4982_v56  ;;  %v3899_v50 = vmax.f32 %v3769_v26, 0.0  ;;  %v10100_v39 = vadd.f32 %v8038_v37, %v9928_v16  ;;  %v3896_v4 = vmax.f32 %v3758_v57, 0.0 }
 0x44f   : > { %v8039_v46 = vpop.f32.mrf.mxu0  ;;  %v8273_v1 = vpop.eup %8272  ;;  %8294 = vrcp.f32 %v4980_v0  ;;  %v4985_v63 = vadd.f32 1.0, %v8271_v53  ;;  %v3897_v13 = vmax.f32 %v3761_v42, 0.0  ;;  %v10103_v49 = vadd.f32 %v9928_v16, %v4165_v43 }
 0x450   : > { %v8275_v12 = vpop.eup %8274  ;;  %8296 = vpow2.f32 %v6328_v31  ;;  %v6331_v20 = vmul.f32 -1.442695, %v10100_v39  ;;  %v10107_v9 = vadd.f32 %v8039_v46, %v9928_v16  ;;  %v3963_v44 = vpack.c.bf16 %v3899_v50, %v3898_v2 }
 0x451   : > { %v4168_v8 = vpop.f32.mrf.mxu0  ;;  %8298 = vrcp.f32 %v4985_v63  ;;  %v4983_v48 = vadd.f32 1.0, %v8275_v12  ;;  %v8277_v61 = vpop.eup %8276  ;;  %v3962_v11 = vpack.c.bf16 %v3897_v13, %v3896_v4  ;;  %v6329_v19 = vmul.f32 -1.442695, %v10103_v49 }
 0x452   : > { %8300 = vpow2.f32 %v6326_v14  ;;  %v10111_v23 = vadd.f32 %v9928_v16, %v4168_v8  ;;  %v4986_v18 = vadd.f32 1.0, %v8277_v61  ;;  %v5361_v62 = vsel %vm4582_vm3, %v8269_v54, %v9978_v3 }
 0x453   : > { %v8042_v25 = vpop.f32.mrf.mxu0  ;;  %v8279_v29 = vpop.eup %8278  ;;  %8302 = vrcp.f32 %v4983_v48  ;;  %v6332_v33 = vmul.f32 -1.442695, %v10107_v9  ;;  %8136 = vmatprep.mubr.bf16.mxu0 %v3962_v11  ;;  %v5359_v3 = vsel %vm4582_vm3, %v8273_v1, %v9982_v52 }
 0x454   : > { %v10114_v55 = vadd.f32 %v8042_v25, %v9928_v16  ;;  %v8281_v60 = vpop.eup %8280  ;;  %v5362_v21 = vsel %vm4582_vm3, %v8279_v29, %v9987_v7  ;;  %8304 = vpow2.f32 %v6331_v20  ;;  %v6330_v36 = vmul.f32 -1.442695, %v10111_v23  ;;  %8137 = vmatmul.mubr.bf16.gmra.mxu0 %v3963_v44 }
 0x455   : > { %v4181_v15 = vpop.f32.mrf.mxu0  ;;  %v8283_v59 = vpop.eup %8282  ;;  %v6723_v5 = vpack.c.bf16 %v5362_v21, %v5361_v62  ;;  %8306 = vrcp.f32 %v4986_v18  ;;  %v4984_v37 = vadd.f32 1.0, %v8281_v60 }
 0x456   : > { %v8285_v51 = vpop.eup %8284  ;;  %v5360_v7 = vsel %vm4582_vm3, %v8283_v59, %v9992_v38  ;;  %8308 = vpow2.f32 %v6329_v19  ;;  %v10131_v57 = vadd.f32 %v9928_v16, %v4181_v15  ;;  %v6335_v27 = vmul.f32 -1.442695, %v10114_v55 }
 0x457   : > { %v8043_v26 = vpop.f32.mrf.mxu0  ;;  %v8287_v40 = vpop.eup %8286  ;;  %7019 = vst [vmem:[%s10057_s14 + $0x28] sm:$0xff] %v6723_v5   ;;  %v6718_v6 = vpack.c.bf16 %v5360_v7, %v5359_v3  ;;  %8310 = vrcp.f32 %v4984_v37  ;;  %v5365_v50 = vsel %vm4582_vm3, %v8285_v51, %v10000_v45 }
 0x458   : > { %v10136_v56 = vadd.f32 %v8043_v26, %v9928_v16  ;;  %v4989_v52 = vadd.f32 1.0, %v8287_v40  ;;  %8312 = vpow2.f32 %v6332_v33  ;;  %v6333_v43 = vmul.f32 -1.442695, %v10131_v57 }
 0x459   : > { %v4184_v54 = vpop.f32.mrf.mxu0  ;;  %v8289_v38 = vpop.eup %8288  ;;  %7018 = vst [vmem:[%s10057_s14 + $0x20] sm:$0xff] %v6718_v6   ;;  %8314 = vpow2.f32 %v6330_v36 }
 0x45a   : > { %v10141_v0 = vadd.f32 %v9928_v16, %v4184_v54  ;;  %v8291_v31 = vpop.eup %8290  ;;  %8316 = vrcp.f32 %v4989_v52  ;;  %v6336_v53 = vmul.f32 -1.442695, %v10136_v56  ;;  %v5363_v12 = vsel %vm4582_vm3, %v8289_v38, %v10004_v28 }
 0x45b   : > { %v8046_v2 = vpop.f32.mrf.mxu0  ;;  %v8293_v14 = vpop.eup %8292  ;;  %v4987_v42 = vadd.f32 1.0, %v8291_v31  ;;  %8318 = vpow2.f32 %v6335_v27 }
 0x45c   : > { %v6334_v46 = vmul.f32 -1.442695, %v10141_v0  ;;  %v10146_v1 = vadd.f32 %v8046_v2, %v9928_v16  ;;  %v8295_v63 = vpop.eup %8294  ;;  %v5366_v4 = vsel %vm4582_vm3, %v8293_v14, %v10007_v34  ;;  %8320 = vpow2.f32 %v6333_v43 }
 0x45d   : > { %v4197_v13 = vpop.f32.mrf.mxu0  ;;  %v8297_v8 = vpop.eup %8296  ;;  %v6733_v48 = vpack.c.bf16 %v5366_v4, %v5365_v50  ;;  %v5364_v20 = vsel %vm4582_vm3, %v8295_v63, %v10016_v58  ;;  %8322 = vrcp.f32 %v4987_v42 }
 0x45e   : > { %v6339_v45 = vmul.f32 -1.442695, %v10146_v1  ;;  %v8299_v61 = vpop.eup %8298  ;;  %v6728_v11 = vpack.c.bf16 %v5364_v20, %v5363_v12  ;;  %v4990_v28 = vadd.f32 1.0, %v8297_v8  ;;  %8324 = vpow2.f32 %v6336_v53 }
 0x45f   : > { %v10162_v19 = vadd.f32 %v9928_v16, %v4197_v13  ;;  %v8047_v34 = vpop.f32.mrf.mxu0  ;;  %v8301_v25 = vpop.eup %8300  ;;  %7021 = vst [vmem:[%s10057_s14 + $0x38] sm:$0xff] %v6733_v48   ;;  %8326 = vpow2.f32 %v6334_v46  ;;  %v5369_v59 = vsel %vm4582_vm3, %v8299_v61, %v10020_v24 }
 0x460   : > { %v10166_v29 = vadd.f32 %v8047_v34, %v9928_v16  ;;  %v8303_v18 = vpop.eup %8302  ;;  %7020 = vst [vmem:[%s10057_s14 + $0x30] sm:$0xff] %v6728_v11   ;;  %8328 = vrcp.f32 %v4990_v28  ;;  %v4988_v58 = vadd.f32 1.0, %v8301_v25 }
 0x461   : > { %v6337_v44 = vmul.f32 -1.442695, %v10162_v19  ;;  %v4200_v60 = vpop.f32.mrf.mxu0  ;;  %v8305_v62 = vpop.eup %8304  ;;  %8330 = vpow2.f32 %v6339_v45  ;;  %v5367_v52 = vsel %vm4582_vm3, %v8303_v18, %v10033_v30 }
 0x462   : > { %v6340_v21 = vmul.f32 -1.442695, %v10166_v29  ;;  %v10172_v33 = vadd.f32 %v9928_v16, %v4200_v60  ;;  %v8307_v15 = vpop.eup %8306  ;;  %8332 = vrcp.f32 %v4988_v58  ;;  %v4993_v5 = vadd.f32 1.0, %v8305_v62 }
 0x463   : > { %v8050_v37 = vpop.f32.mrf.mxu0  ;;  %v8309_v36 = vpop.eup %8308  ;;  %v5370_v51 = vsel %vm4582_vm3, %v8307_v15, %v10041_v35  ;;  %8334 = vpow2.f32 %v6337_v44 }
 0x464   : > { %v6338_v3 = vmul.f32 -1.442695, %v10172_v33  ;;  %v10182_v7 = vadd.f32 %v8050_v37, %v9928_v16  ;;  %v8311_v26 = vpop.eup %8310  ;;  %v6743_v40 = vpack.c.bf16 %v5370_v51, %v5369_v59  ;;  %8336 = vrcp.f32 %v4993_v5 }
 0x465   : > { %v4991_v6 = vadd.f32 1.0, %v8309_v36  ;;  %v4213_v24 = vpop.f32.mrf.mxu0  ;;  %v8313_v27 = vpop.eup %8312  ;;  %v5368_v35 = vsel %vm4582_vm3, %v8311_v26, %v10049_v41  ;;  %8338 = vpow2.f32 %v6340_v21 }
 0x466   : > { %v10191_v43 = vadd.f32 %v9928_v16, %v4213_v24  ;;  %v8315_v54 = vpop.eup %8314  ;;  %7023 = vst [vmem:[%s10057_s14 + $0x48] sm:$0xff] %v6743_v40   ;;  %v6738_v38 = vpack.c.bf16 %v5368_v35, %v5367_v52  ;;  %v4994_v31 = vadd.f32 1.0, %v8313_v27  ;;  %v6343_v53 = vmul.f32 -1.442695, %v10182_v7 }
 0x467   : > { %8340 = vrcp.f32 %v4991_v6  ;;  %v8051_v2 = vpop.f32.mrf.mxu0  ;;  %v8317_v14 = vpop.eup %8316  ;;  %v4992_v42 = vadd.f32 1.0, %v8315_v54 }
 0x468   : > { %8342 = vpow2.f32 %v6338_v3  ;;  %v8319_v30 = vpop.eup %8318  ;;  %7022 = vst [vmem:[%s10057_s14 + $0x40] sm:$0xff] %v6738_v38   ;;  %v10197_v41 = vadd.f32 %v8051_v2, %v9928_v16  ;;  %v6341_v12 = vmul.f32 -1.442695, %v10191_v43  ;;  %v5373_v18 = vsel %vm4582_vm3, %v8317_v14, %v10062_v17 }
 0x469   : > { %8344 = vrcp.f32 %v4994_v31  ;;  %v4216_v46 = vpop.f32.mrf.mxu0  ;;  %v8321_v63 = vpop.eup %8320  ;;  %v4997_v50 = vadd.f32 1.0, %v8319_v30 }
 0x46a   : > { %8346 = vrcp.f32 %v4992_v42  ;;  %v8323_v4 = vpop.eup %8322  ;;  %v4995_v13 = vadd.f32 1.0, %v8321_v63  ;;  %v10201_v8 = vadd.f32 %v9928_v16, %v4216_v46  ;;  %v6344_v11 = vmul.f32 -1.442695, %v10197_v41 }
 0x46b   : > { %8348 = vpow2.f32 %v6343_v53  ;;  %v8054_v48 = vpop.f32.mrf.mxu0  ;;  %v8325_v20 = vpop.eup %8324  ;;  %v5371_v17 = vsel %vm4582_vm3, %v8323_v4, %v10073_v10 }
 0x46c   : > { %8350 = vrcp.f32 %v4997_v50  ;;  %v8327_v45 = vpop.eup %8326  ;;  %v4998_v61 = vadd.f32 1.0, %v8325_v20  ;;  %v10205_v28 = vadd.f32 %v8054_v48, %v9928_v16  ;;  %v6342_v62 = vmul.f32 -1.442695, %v10201_v8 }
 0x46d   : > { %8352 = vrcp.f32 %v4995_v13  ;;  %v4229_v34 = vpop.f32.mrf.mxu0  ;;  %v8329_v25 = vpop.eup %8328  ;;  %v4996_v58 = vadd.f32 1.0, %v8327_v45 }
 0x46e   : > { %8354 = vpow2.f32 %v6341_v12  ;;  %v8331_v44 = vpop.eup %8330  ;;  %v5374_v60 = vsel %vm4582_vm3, %v8329_v25, %v10087_v32  ;;  %v10215_v21 = vadd.f32 %v9928_v16, %v4229_v34  ;;  %v6347_v51 = vmul.f32 -1.442695, %v10205_v28 }
 0x46f   : > { %8356 = vrcp.f32 %v4998_v61  ;;  %v8055_v15 = vpop.f32.mrf.mxu0  ;;  %v8333_v59 = vpop.eup %8332  ;;  %v6753_v5 = vpack.c.bf16 %v5374_v60, %v5373_v18  ;;  %v5001_v37 = vadd.f32 1.0, %v8331_v44 }
 0x470   : > { %8358 = vrcp.f32 %v4996_v58  ;;  %v8335_v36 = vpop.eup %8334  ;;  %v5372_v32 = vsel %vm4582_vm3, %v8333_v59, %v10092_v22  ;;  %v10225_v3 = vadd.f32 %v8055_v15, %v9928_v16  ;;  %v6345_v22 = vmul.f32 -1.442695, %v10215_v21 }
 0x471   : > { %8360 = vpow2.f32 %v6344_v11  ;;  %v4232_v26 = vpop.f32.mrf.mxu0  ;;  %v8337_v40 = vpop.eup %8336  ;;  %7025 = vst [vmem:[%s10057_s14 + $0x58] sm:$0xff] %v6753_v5   ;;  %v6748_v6 = vpack.c.bf16 %v5372_v32, %v5371_v17  ;;  %v4999_v10 = vadd.f32 1.0, %v8335_v36 }
 0x472   : > { %8362 = vrcp.f32 %v5001_v37  ;;  %v10229_v24 = vadd.f32 %v9928_v16, %v4232_v26  ;;  %v8339_v27 = vpop.eup %8338  ;;  %v5377_v53 = vsel %vm4582_vm3, %v8337_v40, %v10100_v39  ;;  %v6348_v2 = vmul.f32 -1.442695, %v10225_v3 }
 0x473   : > { %8364 = vpow2.f32 %v6342_v62  ;;  %v8058_v52 = vpop.f32.mrf.mxu0  ;;  %7024 = vst [vmem:[%s10057_s14 + $0x50] sm:$0xff] %v6748_v6   ;;  %v5002_v54 = vadd.f32 1.0, %v8339_v27 }
 0x474   : > { %v8341_v35 = vpop.eup %8340  ;;  %8366 = vrcp.f32 %v4999_v10  ;;  %v10234_v38 = vadd.f32 %v8058_v52, %v9928_v16  ;;  %v6346_v46 = vmul.f32 -1.442695, %v10229_v24 }
 0x475   : > { %v8343_v31 = vpop.eup %8342  ;;  %8368 = vpow2.f32 %v6347_v51  ;;  %v4245_v14 = vpop.f32.mrf.mxu0  ;;  %v5375_v12 = vsel %vm4582_vm3, %v8341_v35, %v10103_v49 }
 0x476   : > { %v8345_v42 = vpop.eup %8344  ;;  %8370 = vrcp.f32 %v5002_v54  ;;  %v5000_v30 = vadd.f32 1.0, %v8343_v31  ;;  %v10242_v63 = vadd.f32 %v9928_v16, %v4245_v14  ;;  %v6351_v4 = vmul.f32 -1.442695, %v10234_v38 }
 0x477   : > { %v8347_v50 = vpop.eup %8346  ;;  %v5378_v39 = vsel %vm4582_vm3, %v8345_v42, %v10107_v9  ;;  %8372 = vpow2.f32 %v6345_v22  ;;  %v8059_v13 = vpop.f32.mrf.mxu0 }
 0x478   : > { %v8349_v48 = vpop.eup %8348  ;;  %v6763_v20 = vpack.c.bf16 %v5378_v39, %v5377_v53  ;;  %v5376_v45 = vsel %vm4582_vm3, %v8347_v50, %v10111_v23  ;;  %8374 = vrcp.f32 %v5000_v30  ;;  %v6349_v61 = vmul.f32 -1.442695, %v10242_v63 }
 0x479   : > { %v8351_v49 = vpop.eup %8350  ;;  %v6758_v11 = vpack.c.bf16 %v5376_v45, %v5375_v12  ;;  %v5005_v34 = vadd.f32 1.0, %v8349_v48  ;;  %8376 = vpow2.f32 %v6348_v2  ;;  %v10256_v9 = vadd.f32 %v8059_v13, %v9928_v16  ;;  %v4248_v25 = vpop.f32.mrf.mxu0 }
 0x47a   : > { %v8353_v18 = vpop.eup %8352  ;;  %7027 = vst [vmem:[%s10057_s14 + $0x68] sm:$0xff] %v6763_v20   ;;  %8378 = vpow2.f32 %v6346_v46  ;;  %v10260_v58 = vadd.f32 %v9928_v16, %v4248_v25  ;;  %v5381_v37 = vsel %vm4582_vm3, %v8351_v49, %v10114_v55 }
 0x47b   : > { %v8355_v44 = vpop.eup %8354  ;;  %7026 = vst [vmem:[%s10057_s14 + $0x60] sm:$0xff] %v6758_v11   ;;  %8380 = vrcp.f32 %v5005_v34  ;;  %v6352_v23 = vmul.f32 -1.442695, %v10256_v9  ;;  %v8062_v60 = vpop.f32.mrf.mxu0  ;;  %v5379_v36 = vsel %vm4582_vm3, %v8353_v18, %v10131_v57 }
 0x47c   : > { %v8357_v62 = vpop.eup %8356  ;;  %v5003_v15 = vadd.f32 1.0, %v8355_v44  ;;  %8382 = vpow2.f32 %v6351_v4  ;;  %v6350_v59 = vmul.f32 -1.442695, %v10260_v58  ;;  %v10266_v17 = vadd.f32 %v8062_v60, %v9928_v16 }
 0x47d   : > { %v8359_v5 = vpop.eup %8358  ;;  %v5382_v32 = vsel %vm4582_vm3, %v8357_v62, %v10136_v56  ;;  %8384 = vpow2.f32 %v6349_v61  ;;  %v4261_v51 = vpop.f32.mrf.mxu0  ;;  %v10284_v56 = vld [vmem:[%s11006_s10] ss:$0 sm:$0xff] }
 0x47e   : > { %v8361_v26 = vpop.eup %8360  ;;  %v6773_v40 = vpack.c.bf16 %v5382_v32, %v5381_v37  ;;  %v5380_v16 = vsel %vm4582_vm3, %v8359_v5, %v10141_v0  ;;  %8386 = vrcp.f32 %v5003_v15  ;;  %v6355_v55 = vmul.f32 -1.442695, %v10266_v17 }
 0x47f   : > { %v8363_v6 = vpop.eup %8362  ;;  %v6768_v10 = vpack.c.bf16 %v5380_v16, %v5379_v36  ;;  %v5006_v57 = vadd.f32 1.0, %v8361_v26  ;;  %8388 = vpow2.f32 %v6352_v23  ;;  %v10287_v27 = vadd.f32 %v10284_v56, %v4261_v51  ;;  %v8063_v22 = vpop.f32.mrf.mxu0 }
 0x480   : > { %v8365_v52 = vpop.eup %8364  ;;  %7029 = vst [vmem:[%s10057_s14 + $0x78] sm:$0xff] %v6773_v40   ;;  %8390 = vpow2.f32 %v6350_v59  ;;  %v10291_v0 = vadd.f32 %v10284_v56, %v8063_v22  ;;  %v5385_v46 = vsel %vm4582_vm3, %v8363_v6, %v10146_v1 }
 0x481   : > { %v8367_v35 = vpop.eup %8366  ;;  %7028 = vst [vmem:[%s10057_s14 + $0x70] sm:$0xff] %v6768_v10   ;;  %8392 = vrcp.f32 %v5006_v57  ;;  %v5004_v54 = vadd.f32 1.0, %v8365_v52  ;;  %v6353_v31 = vmul.f32 -1.442695, %v10287_v27  ;;  %v4264_v53 = vpop.f32.mrf.mxu0 }
 0x482   : > { %v8369_v2 = vpop.eup %8368  ;;  %8394 = vpow2.f32 %v6355_v55  ;;  %v6356_v14 = vmul.f32 -1.442695, %v10291_v0  ;;  %v10297_v42 = vadd.f32 %v10284_v56, %v4264_v53  ;;  %v5383_v11 = vsel %vm4582_vm3, %v8367_v35, %v10162_v19 }
 0x483   : > { %v8371_v30 = vpop.eup %8370  ;;  %8396 = vrcp.f32 %v5004_v54  ;;  %v5009_v50 = vadd.f32 1.0, %v8369_v2  ;;  %v8066_v12 = vpop.f32.mrf.mxu0 }
 0x484   : > { %v8373_v39 = vpop.eup %8372  ;;  %v5386_v4 = vsel %vm4582_vm3, %v8371_v30, %v10166_v29  ;;  %8398 = vpow2.f32 %v6353_v31  ;;  %v6354_v13 = vmul.f32 -1.442695, %v10297_v42  ;;  %v10307_v48 = vadd.f32 %v10284_v56, %v8066_v12 }
 0x485   : > { %v8375_v20 = vpop.eup %8374  ;;  %v6783_v45 = vpack.c.bf16 %v5386_v4, %v5385_v46  ;;  %8400 = vrcp.f32 %v5009_v50  ;;  %v5007_v61 = vadd.f32 1.0, %v8373_v39  ;;  %v4277_v1 = vpop.f32.mrf.mxu0 }
 0x486   : > { %v8377_v49 = vpop.eup %8376  ;;  %v5384_v29 = vsel %vm4582_vm3, %v8375_v20, %v10172_v33  ;;  %8402 = vpow2.f32 %v6356_v14  ;;  %v10316_v34 = vadd.f32 %v10284_v56, %v4277_v1  ;;  %v6359_v23 = vmul.f32 -1.442695, %v10307_v48 }
 0x487   : > { %v8379_v25 = vpop.eup %8378  ;;  %7031 = vst [vmem:[%s10057_s14 + $0x88] sm:$0xff] %v6783_v45   ;;  %v6778_v18 = vpack.c.bf16 %v5384_v29, %v5383_v11  ;;  %8404 = vrcp.f32 %v5007_v61  ;;  %v5010_v44 = vadd.f32 1.0, %v8377_v49  ;;  %v8067_v60 = vpop.f32.mrf.mxu0 }
 0x488   : > { %v8381_v62 = vpop.eup %8380  ;;  %v5008_v15 = vadd.f32 1.0, %v8379_v25  ;;  %8406 = vpow2.f32 %v6354_v13  ;;  %v10322_v33 = vadd.f32 %v10284_v56, %v8067_v60  ;;  %v6357_v36 = vmul.f32 -1.442695, %v10316_v34 }
 0x489   : > { %v8383_v19 = vpop.eup %8382  ;;  %7030 = vst [vmem:[%s10057_s14 + $0x80] sm:$0xff] %v6778_v18   ;;  %8408 = vrcp.f32 %v5010_v44  ;;  %v4280_v59 = vpop.f32.mrf.mxu0  ;;  %v5389_v35 = vsel %vm4582_vm3, %v8381_v62, %v10182_v7 }
 0x48a   : > { %v8385_v5 = vpop.eup %8384  ;;  %8410 = vrcp.f32 %v5008_v15  ;;  %v5013_v37 = vadd.f32 1.0, %v8383_v19  ;;  %v10326_v26 = vadd.f32 %v10284_v56, %v4280_v59  ;;  %v6360_v10 = vmul.f32 -1.442695, %v10322_v33 }
 0x48b   : > { %v8387_v32 = vpop.eup %8386  ;;  %v5011_v51 = vadd.f32 1.0, %v8385_v5  ;;  %8412 = vpow2.f32 %v6359_v23  ;;  %v8070_v40 = vpop.f32.mrf.mxu0 }
 0x48c   : > { %v8389_v16 = vpop.eup %8388  ;;  %8414 = vrcp.f32 %v5013_v37  ;;  %v10330_v57 = vadd.f32 %v10284_v56, %v8070_v40  ;;  %v6358_v2 = vmul.f32 -1.442695, %v10326_v26  ;;  %v5387_v7 = vsel %vm4582_vm3, %v8387_v32, %v10191_v43 }
 0x48d   : > { %v8391_v55 = vpop.eup %8390  ;;  %8416 = vrcp.f32 %v5011_v51  ;;  %v5014_v6 = vadd.f32 1.0, %v8389_v16  ;;  %v4293_v22 = vpop.f32.mrf.mxu0 }
 0x48e   : > { %v8393_v52 = vpop.eup %8392  ;;  %v5012_v54 = vadd.f32 1.0, %v8391_v55  ;;  %8418 = vpow2.f32 %v6357_v36  ;;  %v10340_v14 = vadd.f32 %v10284_v56, %v4293_v22  ;;  %v6363_v4 = vmul.f32 -1.442695, %v10330_v57 }
 0x48f   : > { %v8395_v31 = vpop.eup %8394  ;;  %v5390_v53 = vsel %vm4582_vm3, %v8393_v52, %v10197_v41  ;;  %8420 = vrcp.f32 %v5014_v6  ;;  %v8071_v30 = vpop.f32.mrf.mxu0 }
 0x490   : > { %v8397_v46 = vpop.eup %8396  ;;  %v6793_v50 = vpack.c.bf16 %v5390_v53, %v5389_v35  ;;  %8422 = vrcp.f32 %v5012_v54  ;;  %v5017_v12 = vadd.f32 1.0, %v8395_v31  ;;  %v10350_v13 = vadd.f32 %v10284_v56, %v8071_v30 }
 0x491   : > { %v8399_v39 = vpop.eup %8398  ;;  %v5388_v41 = vsel %vm4582_vm3, %v8397_v46, %v10201_v8  ;;  %8424 = vpow2.f32 %v6360_v10  ;;  %v4296_v20 = vpop.f32.mrf.mxu0  ;;  %v6361_v8 = vmul.f32 -1.442695, %v10340_v14 }
 0x492   : > { %v8401_v45 = vpop.eup %8400  ;;  %7033 = vst [vmem:[%s10057_s14 + $0x98] sm:$0xff] %v6793_v50   ;;  %v6788_v61 = vpack.c.bf16 %v5388_v41, %v5387_v7  ;;  %8426 = vrcp.f32 %v5017_v12  ;;  %v5015_v43 = vadd.f32 1.0, %v8399_v39  ;;  %v10354_v1 = vadd.f32 %v10284_v56, %v4296_v20 }
 0x493   : > { %v8403_v49 = vpop.eup %8402  ;;  %8428 = vpow2.f32 %v6358_v2  ;;  %v8074_v11 = vpop.f32.mrf.mxu0  ;;  %v5393_v23 = vsel %vm4582_vm3, %v8401_v45, %v10205_v28  ;;  %v6364_v60 = vmul.f32 -1.442695, %v10350_v13 }
 0x494   : > { %v8405_v29 = vpop.eup %8404  ;;  %7032 = vst [vmem:[%s10057_s14 + $0x90] sm:$0xff] %v6788_v61   ;;  %8430 = vrcp.f32 %v5015_v43  ;;  %v5018_v25 = vadd.f32 1.0, %v8403_v49  ;;  %v10359_v18 = vadd.f32 %v10284_v56, %v8074_v11  ;;  %v6362_v59 = vmul.f32 -1.442695, %v10354_v1 }
 0x495   : > { %v8407_v44 = vpop.eup %8406  ;;  %8432 = vpow2.f32 %v6363_v4  ;;  %v4309_v62 = vpop.f32.mrf.mxu0  ;;  %v5391_v36 = vsel %vm4582_vm3, %v8405_v29, %v10215_v21 }
 0x496   : > { %v8409_v15 = vpop.eup %8408  ;;  %8434 = vrcp.f32 %v5018_v25  ;;  %v5016_v19 = vadd.f32 1.0, %v8407_v44  ;;  %v10367_v5 = vadd.f32 %v10284_v56, %v4309_v62  ;;  %v6367_v32 = vmul.f32 -1.442695, %v10359_v18 }
 0x497   : > { %v8411_v37 = vpop.eup %8410  ;;  %v5394_v28 = vsel %vm4582_vm3, %v8409_v15, %v10225_v3  ;;  %8436 = vpow2.f32 %v6361_v8  ;;  %v8075_v51 = vpop.f32.mrf.mxu0 }
 0x498   : > { %v8413_v40 = vpop.eup %8412  ;;  %v6803_v16 = vpack.c.bf16 %v5394_v28, %v5393_v23  ;;  %v5392_v55 = vsel %vm4582_vm3, %v8411_v37, %v10229_v24  ;;  %8438 = vrcp.f32 %v5016_v19  ;;  %v6365_v6 = vmul.f32 -1.442695, %v10367_v5 }
 0x499   : > { %v8415_v21 = vpop.eup %8414  ;;  %v6798_v10 = vpack.c.bf16 %v5392_v55, %v5391_v36  ;;  %v5021_v22 = vadd.f32 1.0, %v8413_v40  ;;  %8440 = vpow2.f32 %v6364_v60  ;;  %v10381_v3 = vadd.f32 %v10284_v56, %v8075_v51  ;;  %v4312_v52 = vpop.f32.mrf.mxu0 }
 0x49a   : > { %v8417_v35 = vpop.eup %8416  ;;  %7035 = vst [vmem:[%s10057_s14 + $0xa8] sm:$0xff] %v6803_v16   ;;  %8442 = vpow2.f32 %v6362_v59  ;;  %v10385_v54 = vadd.f32 %v10284_v56, %v4312_v52  ;;  %v5397_v12 = vsel %vm4582_vm3, %v8415_v21, %v10234_v38 }
 0x49b   : > { %v8419_v31 = vpop.eup %8418  ;;  %7034 = vst [vmem:[%s10057_s14 + $0xa0] sm:$0xff] %v6798_v10   ;;  %8444 = vrcp.f32 %v5021_v22  ;;  %v6368_v24 = vmul.f32 -1.442695, %v10381_v3  ;;  %v8078_v53 = vpop.f32.mrf.mxu0  ;;  %v5395_v39 = vsel %vm4582_vm3, %v8417_v35, %v10242_v63 }
 0x49c   : > { %v8421_v2 = vpop.eup %8420  ;;  %v5019_v30 = vadd.f32 1.0, %v8419_v31  ;;  %8446 = vpow2.f32 %v6367_v32  ;;  %v6366_v46 = vmul.f32 -1.442695, %v10385_v54  ;;  %v10391_v7 = vadd.f32 %v10284_v56, %v8078_v53 }
 0x49d   : > { %v8423_v50 = vpop.eup %8422  ;;  %v5398_v41 = vsel %vm4582_vm3, %v8421_v2, %v10256_v9  ;;  %8448 = vpow2.f32 %v6365_v6  ;;  %v4325_v4 = vpop.f32.mrf.mxu0 }
 0x49e   : > { %v8425_v20 = vpop.eup %8424  ;;  %v6813_v45 = vpack.c.bf16 %v5398_v41, %v5397_v12  ;;  %v5396_v61 = vsel %vm4582_vm3, %v8423_v50, %v10260_v58  ;;  %8450 = vrcp.f32 %v5019_v30  ;;  %v6371_v38 = vmul.f32 -1.442695, %v10391_v7 }
 0x49f   : > { %v8427_v43 = vpop.eup %8426  ;;  %v6808_v49 = vpack.c.bf16 %v5396_v61, %v5395_v39  ;;  %v5022_v63 = vadd.f32 1.0, %v8425_v20  ;;  %8452 = vpow2.f32 %v6368_v24  ;;  %v10407_v8 = vadd.f32 %v10284_v56, %v4325_v4  ;;  %v8079_v9 = vpop.f32.mrf.mxu0 }
 0x4a0   : > { %v8429_v11 = vpop.eup %8428  ;;  %7037 = vst [vmem:[%s10057_s14 + $0xb8] sm:$0xff] %v6813_v45   ;;  %8454 = vpow2.f32 %v6366_v46  ;;  %v10411_v29 = vadd.f32 %v10284_v56, %v8079_v9  ;;  %v5401_v59 = vsel %vm4582_vm3, %v8427_v43, %v10266_v17 }
 0x4a1   : > { %v8431_v25 = vpop.eup %8430  ;;  %7036 = vst [vmem:[%s10057_s14 + $0xb0] sm:$0xff] %v6808_v49   ;;  %8456 = vrcp.f32 %v5022_v63  ;;  %v5020_v58 = vadd.f32 1.0, %v8429_v11  ;;  %v6369_v44 = vmul.f32 -1.442695, %v10407_v8  ;;  %v4328_v23 = vpop.f32.mrf.mxu0 }
 0x4a2   : > { %v8433_v60 = vpop.eup %8432  ;;  %8458 = vpow2.f32 %v6371_v38  ;;  %v6372_v62 = vmul.f32 -1.442695, %v10411_v29  ;;  %v10417_v15 = vadd.f32 %v10284_v56, %v4328_v23  ;;  %v5399_v10 = vsel %vm4582_vm3, %v8431_v25, %v10287_v27 }
 0x4a3   : > { %v8435_v19 = vpop.eup %8434  ;;  %8460 = vrcp.f32 %v5020_v58  ;;  %v5025_v37 = vadd.f32 1.0, %v8433_v60  ;;  %v8082_v36 = vpop.f32.mrf.mxu0 }
 0x4a4   : > { %v8437_v28 = vpop.eup %8436  ;;  %v5402_v32 = vsel %vm4582_vm3, %v8435_v19, %v10291_v0  ;;  %8462 = vpow2.f32 %v6369_v44  ;;  %v6370_v51 = vmul.f32 -1.442695, %v10417_v15  ;;  %v10427_v40 = vadd.f32 %v10284_v56, %v8082_v36 }
 0x4a5   : > { %v8439_v16 = vpop.eup %8438  ;;  %v6823_v55 = vpack.c.bf16 %v5402_v32, %v5401_v59  ;;  %8464 = vrcp.f32 %v5025_v37  ;;  %v5023_v6 = vadd.f32 1.0, %v8437_v28  ;;  %v4341_v17 = vpop.f32.mrf.mxu0 }
 0x4a6   : > { %v8441_v21 = vpop.eup %8440  ;;  %v5400_v0 = vsel %vm4582_vm3, %v8439_v16, %v10297_v42  ;;  %8466 = vpow2.f32 %v6372_v62  ;;  %v10436_v22 = vadd.f32 %v10284_v56, %v4341_v17  ;;  %v6375_v24 = vmul.f32 -1.442695, %v10427_v40 }
 0x4a7   : > { %v8443_v52 = vpop.eup %8442  ;;  %7039 = vst [vmem:[%s10057_s14 + $0xc8] sm:$0xff] %v6823_v55   ;;  %v6818_v35 = vpack.c.bf16 %v5400_v0, %v5399_v10  ;;  %8468 = vrcp.f32 %v5023_v6  ;;  %v5026_v31 = vadd.f32 1.0, %v8441_v21  ;;  %v8083_v53 = vpop.f32.mrf.mxu0 }
 0x4a8   : > { %v8445_v2 = vpop.eup %8444  ;;  %v5024_v30 = vadd.f32 1.0, %v8443_v52  ;;  %8470 = vpow2.f32 %v6370_v51  ;;  %v10442_v42 = vadd.f32 %v10284_v56, %v8083_v53  ;;  %v6373_v39 = vmul.f32 -1.442695, %v10436_v22 }
 0x4a9   : > { %v8447_v27 = vpop.eup %8446  ;;  %7038 = vst [vmem:[%s10057_s14 + $0xc0] sm:$0xff] %v6818_v35   ;;  %8472 = vrcp.f32 %v5026_v31  ;;  %v4344_v46 = vpop.f32.mrf.mxu0  ;;  %v5405_v25 = vsel %vm4582_vm3, %v8445_v2, %v10307_v48 }
 0x4aa   : > { %v8449_v50 = vpop.eup %8448  ;;  %8474 = vrcp.f32 %v5024_v30  ;;  %v5029_v12 = vadd.f32 1.0, %v8447_v27  ;;  %v10446_v20 = vadd.f32 %v10284_v56, %v4344_v46  ;;  %v6376_v49 = vmul.f32 -1.442695, %v10442_v42 }
 0x4ab   : > { %v8451_v41 = vpop.eup %8450  ;;  %v5027_v4 = vadd.f32 1.0, %v8449_v50  ;;  %8476 = vpow2.f32 %v6375_v24  ;;  %v8086_v45 = vpop.f32.mrf.mxu0 }
 0x4ac   : > { %v8453_v61 = vpop.eup %8452  ;;  %8478 = vrcp.f32 %v5029_v12  ;;  %v10450_v63 = vadd.f32 %v10284_v56, %v8086_v45  ;;  %v6374_v60 = vmul.f32 -1.442695, %v10446_v20  ;;  %v5403_v48 = vsel %vm4582_vm3, %v8451_v41, %v10316_v34 }
 0x4ad   : > { %v8455_v38 = vpop.eup %8454  ;;  %8480 = vrcp.f32 %v5027_v4  ;;  %v5030_v43 = vadd.f32 1.0, %v8453_v61  ;;  %v4357_v9 = vpop.f32.mrf.mxu0 }
 0x4ae   : > { %v8457_v11 = vpop.eup %8456  ;;  %v5028_v58 = vadd.f32 1.0, %v8455_v38  ;;  %8482 = vpow2.f32 %v6373_v39  ;;  %v10460_v62 = vadd.f32 %v10284_v56, %v4357_v9  ;;  %v6379_v32 = vmul.f32 -1.442695, %v10450_v63 }
 0x4af   : > { %v8459_v44 = vpop.eup %8458  ;;  %v5406_v23 = vsel %vm4582_vm3, %v8457_v11, %v10322_v33  ;;  %8484 = vrcp.f32 %v5030_v43  ;;  %v8087_v19 = vpop.f32.mrf.mxu0 }
 0x4b0   : > { %v8461_v59 = vpop.eup %8460  ;;  %v6833_v37 = vpack.c.bf16 %v5406_v23, %v5405_v25  ;;  %8486 = vrcp.f32 %v5028_v58  ;;  %v5033_v36 = vadd.f32 1.0, %v8459_v44  ;;  %v10470_v51 = vadd.f32 %v10284_v56, %v8087_v19 }
 0x4b1   : > { %v8463_v28 = vpop.eup %8462  ;;  %v5404_v33 = vsel %vm4582_vm3, %v8461_v59, %v10326_v26  ;;  %8488 = vpow2.f32 %v6376_v49  ;;  %v4360_v16 = vpop.f32.mrf.mxu0  ;;  %v6377_v26 = vmul.f32 -1.442695, %v10460_v62 }
 0x4b2   : > { %v8465_v55 = vpop.eup %8464  ;;  %7041 = vst [vmem:[%s10057_s14 + $0xd8] sm:$0xff] %v6833_v37   ;;  %v6828_v6 = vpack.c.bf16 %v5404_v33, %v5403_v48  ;;  %8490 = vrcp.f32 %v5033_v36  ;;  %v5031_v34 = vadd.f32 1.0, %v8463_v28  ;;  %v10474_v17 = vadd.f32 %v10284_v56, %v4360_v16 }
 0x4b3   : > { %v8467_v21 = vpop.eup %8466  ;;  %8492 = vpow2.f32 %v6374_v60  ;;  %v8090_v10 = vpop.f32.mrf.mxu0  ;;  %v5409_v24 = vsel %vm4582_vm3, %v8465_v55, %v10330_v57  ;;  %v6380_v53 = vmul.f32 -1.442695, %v10470_v51 }
 0x4b4   : > { %v8469_v0 = vpop.eup %8468  ;;  %7040 = vst [vmem:[%s10057_s14 + $0xd0] sm:$0xff] %v6828_v6   ;;  %8494 = vrcp.f32 %v5031_v34  ;;  %v5034_v52 = vadd.f32 1.0, %v8467_v21  ;;  %v10479_v35 = vadd.f32 %v10284_v56, %v8090_v10  ;;  %v6378_v46 = vmul.f32 -1.442695, %v10474_v17 }
 0x4b5   : > { %v8471_v31 = vpop.eup %8470  ;;  %8496 = vpow2.f32 %v6379_v32  ;;  %v4373_v2 = vpop.f32.mrf.mxu0  ;;  %v5407_v39 = vsel %vm4582_vm3, %v8469_v0, %v10340_v14 }
 0x4b6   : > { %v8473_v30 = vpop.eup %8472  ;;  %8498 = vrcp.f32 %v5034_v52  ;;  %v5032_v27 = vadd.f32 1.0, %v8471_v31  ;;  %v10487_v50 = vadd.f32 %v10284_v56, %v4373_v2  ;;  %v6383_v41 = vmul.f32 -1.442695, %v10479_v35 }
 0x4b7   : > { %v8475_v12 = vpop.eup %8474  ;;  %v5410_v57 = vsel %vm4582_vm3, %v8473_v30, %v10350_v13  ;;  %8500 = vpow2.f32 %v6377_v26  ;;  %v8091_v4 = vpop.f32.mrf.mxu0 }
 0x4b8   : > { %v8477_v45 = vpop.eup %8476  ;;  %v6843_v61 = vpack.c.bf16 %v5410_v57, %v5409_v24  ;;  %v5408_v38 = vsel %vm4582_vm3, %v8475_v12, %v10354_v1  ;;  %8502 = vrcp.f32 %v5032_v27  ;;  %v6381_v43 = vmul.f32 -1.442695, %v10487_v50 }
 0x4b9   : > { %v8479_v14 = vpop.eup %8478  ;;  %v6838_v49 = vpack.c.bf16 %v5408_v38, %v5407_v39  ;;  %v5037_v9 = vadd.f32 1.0, %v8477_v45  ;;  %8504 = vpow2.f32 %v6380_v53  ;;  %v10501_v13 = vadd.f32 %v10284_v56, %v8091_v4  ;;  %v4376_v11 = vpop.f32.mrf.mxu0 }
 0x4ba   : > { %v8481_v25 = vpop.eup %8480  ;;  %7043 = vst [vmem:[%s10057_s14 + $0xe8] sm:$0xff] %v6843_v61   ;;  %8506 = vpow2.f32 %v6378_v46  ;;  %v10505_v58 = vadd.f32 %v10284_v56, %v4376_v11  ;;  %v5413_v36 = vsel %vm4582_vm3, %v8479_v14, %v10359_v18 }
 0x4bb   : > { %v8483_v44 = vpop.eup %8482  ;;  %7042 = vst [vmem:[%s10057_s14 + $0xe0] sm:$0xff] %v6838_v49   ;;  %8508 = vrcp.f32 %v5037_v9  ;;  %v6384_v1 = vmul.f32 -1.442695, %v10501_v13  ;;  %v8094_v23 = vpop.f32.mrf.mxu0  ;;  %v5411_v28 = vsel %vm4582_vm3, %v8481_v25, %v10367_v5 }
 0x4bc   : > { %v8485_v60 = vpop.eup %8484  ;;  %v5035_v19 = vadd.f32 1.0, %v8483_v44  ;;  %8510 = vpow2.f32 %v6383_v41  ;;  %v6382_v59 = vmul.f32 -1.442695, %v10505_v58  ;;  %v10511_v48 = vadd.f32 %v10284_v56, %v8094_v23 }
 0x4bd   : > { %v8487_v37 = vpop.eup %8486  ;;  %v5414_v33 = vsel %vm4582_vm3, %v8485_v60, %v10381_v3  ;;  %8512 = vpow2.f32 %v6381_v43  ;;  %v4389_v32 = vpop.f32.mrf.mxu0 }
 0x4be   : > { %v8489_v16 = vpop.eup %8488  ;;  %v6853_v55 = vpack.c.bf16 %v5414_v33, %v5413_v36  ;;  %v5412_v6 = vsel %vm4582_vm3, %v8487_v37, %v10385_v54  ;;  %8514 = vrcp.f32 %v5035_v19  ;;  %v6387_v18 = vmul.f32 -1.442695, %v10511_v48 }
 0x4bf   : > { %v8491_v34 = vpop.eup %8490  ;;  %v6848_v21 = vpack.c.bf16 %v5412_v6, %v5411_v28  ;;  %v5038_v5 = vadd.f32 1.0, %v8489_v16  ;;  %8516 = vpow2.f32 %v6384_v1  ;;  %v10527_v26 = vadd.f32 %v10284_v56, %v4389_v32  ;;  %v8095_v3 = vpop.f32.mrf.mxu0 }
 0x4c0   : > { %v8493_v10 = vpop.eup %8492  ;;  %7045 = vst [vmem:[%s10057_s14 + $0xf8] sm:$0xff] %v6853_v55   ;;  %8518 = vpow2.f32 %v6382_v59  ;;  %v10531_v0 = vadd.f32 %v10284_v56, %v8095_v3  ;;  %v5417_v46 = vsel %vm4582_vm3, %v8491_v34, %v10391_v7 }
 0x4c1   : > { %v8495_v52 = vpop.eup %8494  ;;  %7044 = vst [vmem:[%s10057_s14 + $0xf0] sm:$0xff] %v6848_v21   ;;  %8520 = vrcp.f32 %v5038_v5  ;;  %v5036_v54 = vadd.f32 1.0, %v8493_v10  ;;  %v6385_v31 = vmul.f32 -1.442695, %v10527_v26  ;;  %v4392_v24 = vpop.f32.mrf.mxu0 }
 0x4c2   : > { %v8497_v53 = vpop.eup %8496  ;;  %8522 = vpow2.f32 %v6387_v18  ;;  %v6388_v2 = vmul.f32 -1.442695, %v10531_v0  ;;  %v10537_v30 = vadd.f32 %v10284_v56, %v4392_v24  ;;  %v5415_v49 = vsel %vm4582_vm3, %v8495_v52, %v10407_v8 }
 0x4c3   : > { %v8499_v27 = vpop.eup %8498  ;;  %8524 = vrcp.f32 %v5036_v54  ;;  %v5041_v12 = vadd.f32 1.0, %v8497_v53  ;;  %v8098_v39 = vpop.f32.mrf.mxu0 }
 0x4c4   : > { %v8501_v57 = vpop.eup %8500  ;;  %v5418_v41 = vsel %vm4582_vm3, %v8499_v27, %v10411_v29  ;;  %8526 = vpow2.f32 %v6385_v31  ;;  %v6386_v4 = vmul.f32 -1.442695, %v10537_v30  ;;  %v10547_v45 = vadd.f32 %v10284_v56, %v8098_v39 }
 0x4c5   : > { %v8503_v61 = vpop.eup %8502  ;;  %v6863_v38 = vpack.c.bf16 %v5418_v41, %v5417_v46  ;;  %8528 = vrcp.f32 %v5041_v12  ;;  %v5039_v43 = vadd.f32 1.0, %v8501_v57  ;;  %v4405_v7 = vpop.f32.mrf.mxu0 }
 0x4c6   : > { %v8505_v14 = vpop.eup %8504  ;;  %v5416_v29 = vsel %vm4582_vm3, %v8503_v61, %v10417_v15  ;;  %8530 = vpow2.f32 %v6388_v2  ;;  %v10556_v9 = vadd.f32 %v10284_v56, %v4405_v7  ;;  %v6391_v1 = vmul.f32 -1.442695, %v10547_v45 }
 0x4c7   : > { %v8507_v11 = vpop.eup %8506  ;;  %7047 = vst [vmem:[%s10057_s14 + $0x108] sm:$0xff] %v6863_v38   ;;  %v6858_v25 = vpack.c.bf16 %v5416_v29, %v5415_v49  ;;  %8532 = vrcp.f32 %v5039_v43  ;;  %v5042_v44 = vadd.f32 1.0, %v8505_v14  ;;  %v8099_v23 = vpop.f32.mrf.mxu0 }
 0x4c8   : > { %v8509_v60 = vpop.eup %8508  ;;  %v5040_v19 = vadd.f32 1.0, %v8507_v11  ;;  %8534 = vpow2.f32 %v6386_v4  ;;  %v10562_v15 = vadd.f32 %v10284_v56, %v8099_v23  ;;  %v6389_v28 = vmul.f32 -1.442695, %v10556_v9 }
 0x4c9   : > { %v8511_v8 = vpop.eup %8510  ;;  %7046 = vst [vmem:[%s10057_s14 + $0x100] sm:$0xff] %v6858_v25   ;;  %8536 = vrcp.f32 %v5042_v44  ;;  %v4408_v59 = vpop.f32.mrf.mxu0  ;;  %v5421_v52 = vsel %vm4582_vm3, %v8509_v60, %v10427_v40 }
 0x4ca   : > { %v8513_v37 = vpop.eup %8512  ;;  %8538 = vrcp.f32 %v5040_v19  ;;  %v5045_v36 = vadd.f32 1.0, %v8511_v8  ;;  %v10566_v16 = vadd.f32 %v10284_v56, %v4408_v59  ;;  %v6392_v21 = vmul.f32 -1.442695, %v10562_v15 }
 0x4cb   : > { %v8515_v33 = vpop.eup %8514  ;;  %v5043_v32 = vadd.f32 1.0, %v8513_v37  ;;  %8540 = vpow2.f32 %v6391_v1  ;;  %v8102_v55 = vpop.f32.mrf.mxu0 }
 0x4cc   : > { %v8517_v6 = vpop.eup %8516  ;;  %8542 = vrcp.f32 %v5045_v36  ;;  %v10570_v5 = vadd.f32 %v10284_v56, %v8102_v55  ;;  %v6390_v53 = vmul.f32 -1.442695, %v10566_v16  ;;  %v5419_v40 = vsel %vm4582_vm3, %v8515_v33, %v10436_v22 }
 0x4cd   : > { %v8519_v18 = vpop.eup %8518  ;;  %8544 = vrcp.f32 %v5043_v32  ;;  %v5046_v34 = vadd.f32 1.0, %v8517_v6  ;;  %v4421_v3 = vpop.f32.mrf.mxu0 }
 0x4ce   : > { %v8521_v10 = vpop.eup %8520  ;;  %v5044_v54 = vadd.f32 1.0, %v8519_v18  ;;  %8546 = vpow2.f32 %v6389_v28  ;;  %v10580_v2 = vadd.f32 %v10284_v56, %v4421_v3  ;;  %v6395_v41 = vmul.f32 -1.442695, %v10570_v5 }
 0x4cf   : > { %v8523_v31 = vpop.eup %8522  ;;  %v5422_v24 = vsel %vm4582_vm3, %v8521_v10, %v10442_v42  ;;  %8548 = vrcp.f32 %v5046_v34  ;;  %v8103_v27 = vpop.f32.mrf.mxu0 }
 0x4d0   : > { %v8525_v46 = vpop.eup %8524  ;;  %v6873_v12 = vpack.c.bf16 %v5422_v24, %v5421_v52  ;;  %8550 = vrcp.f32 %v5044_v54  ;;  %v5049_v39 = vadd.f32 1.0, %v8523_v31  ;;  %v10590_v4 = vadd.f32 %v10284_v56, %v8103_v27 }
 0x4d1   : > { %v8527_v57 = vpop.eup %8526  ;;  %v5420_v42 = vsel %vm4582_vm3, %v8525_v46, %v10446_v20  ;;  %8552 = vpow2.f32 %v6392_v21  ;;  %v4424_v61 = vpop.f32.mrf.mxu0  ;;  %v6393_v20 = vmul.f32 -1.442695, %v10580_v2 }
 0x4d2   : > { %v8529_v38 = vpop.eup %8528  ;;  %7049 = vst [vmem:[%s10057_s14 + $0x118] sm:$0xff] %v6873_v12   ;;  %v6868_v43 = vpack.c.bf16 %v5420_v42, %v5419_v40  ;;  %8554 = vrcp.f32 %v5049_v39  ;;  %v5047_v22 = vadd.f32 1.0, %v8527_v57  ;;  %v10594_v7 = vadd.f32 %v10284_v56, %v4424_v61 }
 0x4d3   : > { %v8531_v14 = vpop.eup %8530  ;;  %8556 = vpow2.f32 %v6390_v53  ;;  %v8106_v49 = vpop.f32.mrf.mxu0  ;;  %v5425_v1 = vsel %vm4582_vm3, %v8529_v38, %v10450_v63  ;;  %v6396_v23 = vmul.f32 -1.442695, %v10590_v4 }
 0x4d4   : > { %v8533_v29 = vpop.eup %8532  ;;  %7048 = vst [vmem:[%s10057_s14 + $0x110] sm:$0xff] %v6868_v43   ;;  %8558 = vrcp.f32 %v5047_v22  ;;  %v5050_v11 = vadd.f32 1.0, %v8531_v14  ;;  %v10599_v25 = vadd.f32 %v10284_v56, %v8106_v49  ;;  %v6394_v59 = vmul.f32 -1.442695, %v10594_v7 }
 0x4d5   : > { %v8535_v44 = vpop.eup %8534  ;;  %8560 = vpow2.f32 %v6395_v41  ;;  %v4437_v60 = vpop.f32.mrf.mxu0  ;;  %v5423_v28 = vsel %vm4582_vm3, %v8533_v29, %v10460_v62 }
 0x4d6   : > { %v8537_v19 = vpop.eup %8536  ;;  %8562 = vrcp.f32 %v5050_v11  ;;  %v5048_v8 = vadd.f32 1.0, %v8535_v44  ;;  %v10607_v37 = vadd.f32 %v10284_v56, %v4437_v60  ;;  %v6399_v33 = vmul.f32 -1.442695, %v10599_v25 }
 0x4d7   : > { %v8539_v36 = vpop.eup %8538  ;;  %v5426_v63 = vsel %vm4582_vm3, %v8537_v19, %v10470_v51  ;;  %8564 = vpow2.f32 %v6393_v20  ;;  %v8107_v32 = vpop.f32.mrf.mxu0 }
 0x4d8   : > { %v8541_v55 = vpop.eup %8540  ;;  %v6883_v6 = vpack.c.bf16 %v5426_v63, %v5425_v1  ;;  %v5424_v18 = vsel %vm4582_vm3, %v8539_v36, %v10474_v17  ;;  %8566 = vrcp.f32 %v5048_v8  ;;  %v6397_v34 = vmul.f32 -1.442695, %v10607_v37 }
 0x4d9   : > { %v8543_v62 = vpop.eup %8542  ;;  %v6878_v21 = vpack.c.bf16 %v5424_v18, %v5423_v28  ;;  %v5053_v3 = vadd.f32 1.0, %v8541_v55  ;;  %8568 = vpow2.f32 %v6396_v23  ;;  %v10621_v51 = vadd.f32 %v10284_v56, %v8107_v32  ;;  %v4440_v10 = vpop.f32.mrf.mxu0 }
 0x4da   : > { %v8545_v52 = vpop.eup %8544  ;;  %7051 = vst [vmem:[%s10057_s14 + $0x128] sm:$0xff] %v6883_v6   ;;  %8570 = vpow2.f32 %v6394_v59  ;;  %v10625_v54 = vadd.f32 %v10284_v56, %v4440_v10  ;;  %v5429_v39 = vsel %vm4582_vm3, %v8543_v62, %v10479_v35 }
 0x4db   : > { %v8547_v31 = vpop.eup %8546  ;;  %7050 = vst [vmem:[%s10057_s14 + $0x120] sm:$0xff] %v6878_v21   ;;  %8572 = vrcp.f32 %v5053_v3  ;;  %v6400_v17 = vmul.f32 -1.442695, %v10621_v51  ;;  %v8110_v24 = vpop.f32.mrf.mxu0  ;;  %v5427_v57 = vsel %vm4582_vm3, %v8545_v52, %v10487_v50 }
 0x4dc   : > { %v8549_v53 = vpop.eup %8548  ;;  %v5051_v27 = vadd.f32 1.0, %v8547_v31  ;;  %8574 = vpow2.f32 %v6399_v33  ;;  %v6398_v46 = vmul.f32 -1.442695, %v10625_v54  ;;  %v10631_v40 = vadd.f32 %v10284_v56, %v8110_v24 }
 0x4dd   : > { %v8551_v12 = vpop.eup %8550  ;;  %v5430_v42 = vsel %vm4582_vm3, %v8549_v53, %v10501_v13  ;;  %8576 = vpow2.f32 %v6397_v34  ;;  %v4453_v41 = vpop.f32.mrf.mxu0 }
 0x4de   : > { %v8553_v61 = vpop.eup %8552  ;;  %v6893_v38 = vpack.c.bf16 %v5430_v42, %v5429_v39  ;;  %v5428_v43 = vsel %vm4582_vm3, %v8551_v12, %v10505_v58  ;;  %8578 = vrcp.f32 %v5051_v27  ;;  %v6403_v35 = vmul.f32 -1.442695, %v10631_v40 }
 0x4df   : > { %v8555_v22 = vpop.eup %8554  ;;  %v6888_v14 = vpack.c.bf16 %v5428_v43, %v5427_v57  ;;  %v5054_v50 = vadd.f32 1.0, %v8553_v61  ;;  %8580 = vpow2.f32 %v6400_v17  ;;  %v10647_v20 = vadd.f32 %v10284_v56, %v4453_v41  ;;  %v8111_v13 = vpop.f32.mrf.mxu0 }
 0x4e0   : > { %v8557_v49 = vpop.eup %8556  ;;  %7053 = vst [vmem:[%s10057_s14 + $0x138] sm:$0xff] %v6893_v38   ;;  %8582 = vpow2.f32 %v6398_v46  ;;  %v10651_v29 = vadd.f32 %v10284_v56, %v8111_v13  ;;  %v5433_v59 = vsel %vm4582_vm3, %v8555_v22, %v10511_v48 }
 0x4e1   : > { %v8559_v11 = vpop.eup %8558  ;;  %7052 = vst [vmem:[%s10057_s14 + $0x130] sm:$0xff] %v6888_v14   ;;  %8584 = vrcp.f32 %v5054_v50  ;;  %v5052_v58 = vadd.f32 1.0, %v8557_v49  ;;  %v6401_v44 = vmul.f32 -1.442695, %v10647_v20  ;;  %v4456_v1 = vpop.f32.mrf.mxu0 }
 0x4e2   : > { %v8561_v23 = vpop.eup %8560  ;;  %8586 = vpow2.f32 %v6403_v35  ;;  %v6404_v60 = vmul.f32 -1.442695, %v10651_v29  ;;  %v10657_v19 = vadd.f32 %v10284_v56, %v4456_v1  ;;  %v5431_v21 = vsel %vm4582_vm3, %v8559_v11, %v10527_v26 }
 0x4e3   : > { %v8563_v8 = vpop.eup %8562  ;;  %8588 = vrcp.f32 %v5052_v58  ;;  %v5057_v36 = vadd.f32 1.0, %v8561_v23  ;;  %v8114_v28 = vpop.f32.mrf.mxu0 }
 0x4e4   : > { %v8565_v63 = vpop.eup %8564  ;;  %v5434_v33 = vsel %vm4582_vm3, %v8563_v8, %v10531_v0  ;;  %8590 = vpow2.f32 %v6401_v44  ;;  %v6402_v32 = vmul.f32 -1.442695, %v10657_v19  ;;  %v10667_v55 = vadd.f32 %v10284_v56, %v8114_v28  ;;  %v10678_v56 = vld [vmem:[%s11006_s10] ss:$0 sm:$0xff] }
 0x4e5   : > { %v8567_v6 = vpop.eup %8566  ;;  %v6903_v18 = vpack.c.bf16 %v5434_v33, %v5433_v59  ;;  %8592 = vrcp.f32 %v5057_v36  ;;  %v5055_v34 = vadd.f32 1.0, %v8565_v63  ;;  %v4469_v48 = vpop.f32.mrf.mxu0 }
 0x4e6   : > { %v8569_v62 = vpop.eup %8568  ;;  %v5432_v0 = vsel %vm4582_vm3, %v8567_v6, %v10537_v30  ;;  %8594 = vpow2.f32 %v6404_v60  ;;  %v10681_v3 = vadd.f32 %v10678_v56, %v4469_v48  ;;  %v6407_v26 = vmul.f32 -1.442695, %v10667_v55 }
 0x4e7   : > { %v8571_v10 = vpop.eup %8570  ;;  %7055 = vst [vmem:[%s10057_s14 + $0x148] sm:$0xff] %v6903_v18   ;;  %v6898_v52 = vpack.c.bf16 %v5432_v0, %v5431_v21  ;;  %8596 = vrcp.f32 %v5055_v34  ;;  %v5058_v31 = vadd.f32 1.0, %v8569_v62  ;;  %v8115_v17 = vpop.f32.mrf.mxu0 }
 0x4e8   : > { %v8573_v24 = vpop.eup %8572  ;;  %v5056_v53 = vadd.f32 1.0, %v8571_v10  ;;  %8598 = vpow2.f32 %v6402_v32  ;;  %v10687_v27 = vadd.f32 %v10678_v56, %v8115_v17  ;;  %v6405_v57 = vmul.f32 -1.442695, %v10681_v3 }
 0x4e9   : > { %v8575_v30 = vpop.eup %8574  ;;  %7054 = vst [vmem:[%s10057_s14 + $0x140] sm:$0xff] %v6898_v52   ;;  %8600 = vrcp.f32 %v5058_v31  ;;  %v4472_v46 = vpop.f32.mrf.mxu0  ;;  %v5437_v11 = vsel %vm4582_vm3, %v8573_v24, %v10547_v45 }
 0x4ea   : > { %v8577_v12 = vpop.eup %8576  ;;  %8602 = vrcp.f32 %v5056_v53  ;;  %v5061_v39 = vadd.f32 1.0, %v8575_v30  ;;  %v10691_v61 = vadd.f32 %v10678_v56, %v4472_v46  ;;  %v6408_v14 = vmul.f32 -1.442695, %v10687_v27 }
 0x4eb   : > { %v8579_v42 = vpop.eup %8578  ;;  %v5059_v41 = vadd.f32 1.0, %v8577_v12  ;;  %8604 = vpow2.f32 %v6407_v26  ;;  %v8118_v38 = vpop.f32.mrf.mxu0 }
 0x4ec   : > { %v8581_v43 = vpop.eup %8580  ;;  %8606 = vrcp.f32 %v5061_v39  ;;  %v10695_v50 = vadd.f32 %v10678_v56, %v8118_v38  ;;  %v6406_v23 = vmul.f32 -1.442695, %v10691_v61  ;;  %v5435_v45 = vsel %vm4582_vm3, %v8579_v42, %v10556_v9 }
 0x4ed   : > { %v8583_v35 = vpop.eup %8582  ;;  %8608 = vrcp.f32 %v5059_v41  ;;  %v5062_v22 = vadd.f32 1.0, %v8581_v43  ;;  %v4485_v13 = vpop.f32.mrf.mxu0 }
 0x4ee   : > { %v8585_v49 = vpop.eup %8584  ;;  %v5060_v58 = vadd.f32 1.0, %v8583_v35  ;;  %8610 = vpow2.f32 %v6405_v57  ;;  %v10705_v60 = vadd.f32 %v10678_v56, %v4485_v13  ;;  %v6411_v33 = vmul.f32 -1.442695, %v10695_v50 }
 0x4ef   : > { %v8587_v44 = vpop.eup %8586  ;;  %v5438_v1 = vsel %vm4582_vm3, %v8585_v49, %v10562_v15  ;;  %8612 = vrcp.f32 %v5062_v22  ;;  %v8119_v8 = vpop.f32.mrf.mxu0 }
 0x4f0   : > { %v8589_v59 = vpop.eup %8588  ;;  %v6913_v36 = vpack.c.bf16 %v5438_v1, %v5437_v11  ;;  %8614 = vrcp.f32 %v5060_v58  ;;  %v5065_v28 = vadd.f32 1.0, %v8587_v44  ;;  %v10715_v32 = vadd.f32 %v10678_v56, %v8119_v8 }
 0x4f1   : > { %v8591_v63 = vpop.eup %8590  ;;  %v5436_v15 = vsel %vm4582_vm3, %v8589_v59, %v10566_v16  ;;  %8616 = vpow2.f32 %v6408_v14  ;;  %v4488_v6 = vpop.f32.mrf.mxu0  ;;  %v6409_v16 = vmul.f32 -1.442695, %v10705_v60 }
 0x4f2   : > { %v8593_v18 = vpop.eup %8592  ;;  %7057 = vst [vmem:[%s10057_s14 + $0x158] sm:$0xff] %v6913_v36   ;;  %v6908_v34 = vpack.c.bf16 %v5436_v15, %v5435_v45  ;;  %8618 = vrcp.f32 %v5065_v28  ;;  %v5063_v9 = vadd.f32 1.0, %v8591_v63  ;;  %v10719_v48 = vadd.f32 %v10678_v56, %v4488_v6 }
 0x4f3   : > { %v8595_v62 = vpop.eup %8594  ;;  %8620 = vpow2.f32 %v6406_v23  ;;  %v8122_v21 = vpop.f32.mrf.mxu0  ;;  %v5441_v26 = vsel %vm4582_vm3, %v8593_v18, %v10570_v5  ;;  %v6412_v17 = vmul.f32 -1.442695, %v10715_v32 }
 0x4f4   : > { %v8597_v0 = vpop.eup %8596  ;;  %7056 = vst [vmem:[%s10057_s14 + $0x150] sm:$0xff] %v6908_v34   ;;  %8622 = vrcp.f32 %v5063_v9  ;;  %v5066_v10 = vadd.f32 1.0, %v8595_v62  ;;  %v10724_v52 = vadd.f32 %v10678_v56, %v8122_v21  ;;  %v6410_v46 = vmul.f32 -1.442695, %v10719_v48 }
 0x4f5   : > { %v8599_v31 = vpop.eup %8598  ;;  %8624 = vpow2.f32 %v6411_v33  ;;  %v4501_v24 = vpop.f32.mrf.mxu0  ;;  %v5439_v57 = vsel %vm4582_vm3, %v8597_v0, %v10580_v2 }
 0x4f6   : > { %v8601_v53 = vpop.eup %8600  ;;  %8626 = vrcp.f32 %v5066_v10  ;;  %v5064_v30 = vadd.f32 1.0, %v8599_v31  ;;  %v10732_v12 = vadd.f32 %v10678_v56, %v4501_v24  ;;  %v6415_v42 = vmul.f32 -1.442695, %v10724_v52 }
 0x4f7   : > { %v8603_v39 = vpop.eup %8602  ;;  %v5442_v5 = vsel %vm4582_vm3, %v8601_v53, %v10590_v4  ;;  %8628 = vpow2.f32 %v6409_v16  ;;  %v8123_v41 = vpop.f32.mrf.mxu0 }
 0x4f8   : > { %v8605_v38 = vpop.eup %8604  ;;  %v6923_v43 = vpack.c.bf16 %v5442_v5, %v5441_v26  ;;  %v5440_v35 = vsel %vm4582_vm3, %v8603_v39, %v10594_v7  ;;  %8630 = vrcp.f32 %v5064_v30  ;;  %v6413_v22 = vmul.f32 -1.442695, %v10732_v12 }
 0x4f9   : > { %v8607_v2 = vpop.eup %8606  ;;  %v6918_v14 = vpack.c.bf16 %v5440_v35, %v5439_v57  ;;  %v5069_v13 = vadd.f32 1.0, %v8605_v38  ;;  %8632 = vpow2.f32 %v6412_v17  ;;  %v10746_v4 = vadd.f32 %v10678_v56, %v8123_v41  ;;  %v4504_v49 = vpop.f32.mrf.mxu0 }
 0x4fa   : > { %v8609_v11 = vpop.eup %8608  ;;  %7059 = vst [vmem:[%s10057_s14 + $0x168] sm:$0xff] %v6923_v43   ;;  %8634 = vpow2.f32 %v6410_v46  ;;  %v10750_v58 = vadd.f32 %v10678_v56, %v4504_v49  ;;  %v5445_v28 = vsel %vm4582_vm3, %v8607_v2, %v10599_v25 }
 0x4fb   : > { %v8611_v44 = vpop.eup %8610  ;;  %7058 = vst [vmem:[%s10057_s14 + $0x160] sm:$0xff] %v6918_v14   ;;  %8636 = vrcp.f32 %v5069_v13  ;;  %v6416_v7 = vmul.f32 -1.442695, %v10746_v4  ;;  %v8126_v1 = vpop.f32.mrf.mxu0  ;;  %v5443_v63 = vsel %vm4582_vm3, %v8609_v11, %v10607_v37 }
 0x4fc   : > { %v8613_v23 = vpop.eup %8612  ;;  %v5067_v8 = vadd.f32 1.0, %v8611_v44  ;;  %8638 = vpow2.f32 %v6415_v42  ;;  %v6414_v59 = vmul.f32 -1.442695, %v10750_v58  ;;  %v10756_v45 = vadd.f32 %v10678_v56, %v8126_v1 }
 0x4fd   : > { %v8615_v36 = vpop.eup %8614  ;;  %v5446_v15 = vsel %vm4582_vm3, %v8613_v23, %v10621_v51  ;;  %8640 = vpow2.f32 %v6413_v22  ;;  %v4517_v33 = vpop.f32.mrf.mxu0 }
 0x4fe   : > { %v8617_v6 = vpop.eup %8616  ;;  %v6933_v18 = vpack.c.bf16 %v5446_v15, %v5445_v28  ;;  %v5444_v34 = vsel %vm4582_vm3, %v8615_v36, %v10625_v54  ;;  %8642 = vrcp.f32 %v5067_v8  ;;  %v6419_v25 = vmul.f32 -1.442695, %v10756_v45 }
 0x4ff   : > { %v8619_v9 = vpop.eup %8618  ;;  %v6928_v62 = vpack.c.bf16 %v5444_v34, %v5443_v63  ;;  %v5070_v37 = vadd.f32 1.0, %v8617_v6  ;;  %8644 = vpow2.f32 %v6416_v7  ;;  %v10772_v16 = vadd.f32 %v10678_v56, %v4517_v33  ;;  %v8127_v51 = vpop.f32.mrf.mxu0 }
 0x500   : > { %v8621_v21 = vpop.eup %8620  ;;  %7061 = vst [vmem:[%s10057_s14 + $0x178] sm:$0xff] %v6933_v18   ;;  %8646 = vpow2.f32 %v6414_v59  ;;  %v10776_v0 = vadd.f32 %v10678_v56, %v8127_v51  ;;  %v5449_v46 = vsel %vm4582_vm3, %v8619_v9, %v10631_v40 }
 0x501   : > { %v8623_v10 = vpop.eup %8622  ;;  %7060 = vst [vmem:[%s10057_s14 + $0x170] sm:$0xff] %v6928_v62   ;;  %8648 = vrcp.f32 %v5070_v37  ;;  %v5068_v54 = vadd.f32 1.0, %v8621_v21  ;;  %v6417_v31 = vmul.f32 -1.442695, %v10772_v16  ;;  %v4520_v26 = vpop.f32.mrf.mxu0 }
 0x502   : > { %v8625_v17 = vpop.eup %8624  ;;  %8650 = vpow2.f32 %v6419_v25  ;;  %v6420_v24 = vmul.f32 -1.442695, %v10776_v0  ;;  %v10782_v53 = vadd.f32 %v10678_v56, %v4520_v26  ;;  %v5447_v14 = vsel %vm4582_vm3, %v8623_v10, %v10647_v20 }
 0x503   : > { %v8627_v30 = vpop.eup %8626  ;;  %8652 = vrcp.f32 %v5068_v54  ;;  %v5073_v39 = vadd.f32 1.0, %v8625_v17  ;;  %v8130_v57 = vpop.f32.mrf.mxu0 }
 0x504   : > { %v8629_v5 = vpop.eup %8628  ;;  %v5450_v42 = vsel %vm4582_vm3, %v8627_v30, %v10651_v29  ;;  %8654 = vpow2.f32 %v6417_v31  ;;  %v6418_v41 = vmul.f32 -1.442695, %v10782_v53  ;;  %v10792_v38 = vadd.f32 %v10678_v56, %v8130_v57 }
 0x505   : > { %v8631_v43 = vpop.eup %8630  ;;  %v6943_v35 = vpack.c.bf16 %v5450_v42, %v5449_v46  ;;  %8656 = vrcp.f32 %v5073_v39  ;;  %v5071_v22 = vadd.f32 1.0, %v8629_v5  ;;  %v4533_v40 = vpop.f32.mrf.mxu0 }
 0x506   : > { %v8633_v2 = vpop.eup %8632  ;;  %v5448_v29 = vsel %vm4582_vm3, %v8631_v43, %v10657_v19  ;;  %8658 = vpow2.f32 %v6420_v24  ;;  %v10801_v13 = vadd.f32 %v10678_v56, %v4533_v40  ;;  %v6423_v7 = vmul.f32 -1.442695, %v10792_v38 }
 0x507   : > { %v8635_v49 = vpop.eup %8634  ;;  %7063 = vst [vmem:[%s10057_s14 + $0x188] sm:$0xff] %v6943_v35   ;;  %v6938_v11 = vpack.c.bf16 %v5448_v29, %v5447_v14  ;;  %8660 = vrcp.f32 %v5071_v22  ;;  %v5074_v44 = vadd.f32 1.0, %v8633_v2  ;;  %v8131_v1 = vpop.f32.mrf.mxu0 }
 0x508   : > { %v8637_v23 = vpop.eup %8636  ;;  %v5072_v8 = vadd.f32 1.0, %v8635_v49  ;;  %8662 = vpow2.f32 %v6418_v41  ;;  %v10807_v19 = vadd.f32 %v10678_v56, %v8131_v1  ;;  %v6421_v63 = vmul.f32 -1.442695, %v10801_v13 }
 0x509   : > { %v8639_v20 = vpop.eup %8638  ;;  %7062 = vst [vmem:[%s10057_s14 + $0x180] sm:$0xff] %v6938_v11   ;;  %8664 = vrcp.f32 %v5074_v44  ;;  %v4536_v59 = vpop.f32.mrf.mxu0  ;;  %v5453_v54 = vsel %vm4582_vm3, %v8637_v23, %v10667_v55 }
 0x50a   : > { %v8641_v36 = vpop.eup %8640  ;;  %8666 = vrcp.f32 %v5072_v8  ;;  %v5077_v28 = vadd.f32 1.0, %v8639_v20  ;;  %v10811_v6 = vadd.f32 %v10678_v56, %v4536_v59  ;;  %v6424_v9 = vmul.f32 -1.442695, %v10807_v19 }
 0x50b   : > { %v8643_v15 = vpop.eup %8642  ;;  %v5075_v33 = vadd.f32 1.0, %v8641_v36  ;;  %8668 = vpow2.f32 %v6423_v7 }
 0x50c   : > { %v8645_v18 = vpop.eup %8644  ;;  %8670 = vrcp.f32 %v5077_v28  ;;  %v8134_v62 = vpop.f32.mrf.mxu0  ;;  %v6422_v26 = vmul.f32 -1.442695, %v10811_v6  ;;  %v5451_v30 = vsel %vm4582_vm3, %v8643_v15, %v10681_v3 }
 0x50d   : > { %v8647_v34 = vpop.eup %8646  ;;  %8672 = vrcp.f32 %v5075_v33  ;;  %v5078_v25 = vadd.f32 1.0, %v8645_v18  ;;  %v10815_v21 = vadd.f32 %v10678_v56, %v8134_v62 }
 0x50e   : > { %v8649_v37 = vpop.eup %8648  ;;  %v5076_v51 = vadd.f32 1.0, %v8647_v34  ;;  %8674 = vpow2.f32 %v6421_v63  ;;  %v4549_v17 = vpop.f32.mrf.mxu0 }
 0x50f   : > { %v8651_v10 = vpop.eup %8650  ;;  %v5454_v31 = vsel %vm4582_vm3, %v8649_v37, %v10687_v27  ;;  %8676 = vrcp.f32 %v5078_v25  ;;  %v6427_v27 = vmul.f32 -1.442695, %v10815_v21  ;;  %v10832_v5 = vadd.f32 %v10678_v56, %v4549_v17 }
 0x510   : > { %v8653_v24 = vpop.eup %8652  ;;  %v6953_v46 = vpack.c.bf16 %v5454_v31, %v5453_v54  ;;  %8678 = vrcp.f32 %v5076_v51  ;;  %v5081_v39 = vadd.f32 1.0, %v8651_v10  ;;  %v8135_v42 = vpop.f32.mrf.mxu0 }
 0x511   : > { %v8655_v57 = vpop.eup %8654  ;;  %v5452_v55 = vsel %vm4582_vm3, %v8653_v24, %v10691_v61  ;;  %8680 = vpow2.f32 %v6424_v9  ;;  %v10836_v35 = vadd.f32 %v10678_v56, %v8135_v42  ;;  %v6425_v61 = vmul.f32 -1.442695, %v10832_v5 }
 0x512   : > { %v8657_v41 = vpop.eup %8656  ;;  %7065 = vst [vmem:[%s10057_s14 + $0x198] sm:$0xff] %v6953_v46   ;;  %v6948_v43 = vpack.c.bf16 %v5452_v55, %v5451_v30  ;;  %8682 = vrcp.f32 %v5081_v39  ;;  %v5079_v3 = vadd.f32 1.0, %v8655_v57  ;;  %v4552_v40 = vpop.f32.mrf.mxu0 }
 0x513   : > { %v8659_v22 = vpop.eup %8658  ;;  %8684 = vpow2.f32 %v6422_v26  ;;  %v10841_v29 = vadd.f32 %v10678_v56, %v4552_v40  ;;  %v6428_v11 = vmul.f32 -1.442695, %v10836_v35  ;;  %v5457_v20 = vsel %vm4582_vm3, %v8657_v41, %v10695_v50 }
 0x514   : > { %v8661_v2 = vpop.eup %8660  ;;  %7064 = vst [vmem:[%s10057_s14 + $0x190] sm:$0xff] %v6948_v43   ;;  %8686 = vrcp.f32 %v5079_v3  ;;  %v5082_v14 = vadd.f32 1.0, %v8659_v22  ;;  %v8138_v23 = vpop.f32.mrf.mxu0 }
 0x515   : > { %v8663_v49 = vpop.eup %8662  ;;  %8688 = vpow2.f32 %v6427_v27  ;;  %v6426_v1 = vmul.f32 -1.442695, %v10841_v29  ;;  %v10852_v36 = vadd.f32 %v10678_v56, %v8138_v23  ;;  %v5455_v63 = vsel %vm4582_vm3, %v8661_v2, %v10705_v60 }
 0x516   : > { %v8665_v44 = vpop.eup %8664  ;;  %8690 = vrcp.f32 %v5082_v14  ;;  %v5080_v7 = vadd.f32 1.0, %v8663_v49  ;;  %v4565_v33 = vpop.f32.mrf.mxu0 }
 0x517   : > { %v8667_v8 = vpop.eup %8666  ;;  %v5458_v59 = vsel %vm4582_vm3, %v8665_v44, %v10715_v32  ;;  %8692 = vpow2.f32 %v6425_v61  ;;  %v6431_v25 = vmul.f32 -1.442695, %v10852_v36  ;;  %v10863_v62 = vadd.f32 %v10678_v56, %v4565_v33 }
 0x518   : > { %v8669_v28 = vpop.eup %8668  ;;  %v6963_v15 = vpack.c.bf16 %v5458_v59, %v5457_v20  ;;  %v5456_v50 = vsel %vm4582_vm3, %v8667_v8, %v10719_v48  ;;  %8694 = vrcp.f32 %v5080_v7  ;;  %v8139_v60 = vpop.f32.mrf.mxu0 }
 0x519   : > { %v8671_v18 = vpop.eup %8670  ;;  %v6958_v34 = vpack.c.bf16 %v5456_v50, %v5455_v63  ;;  %v5085_v32 = vadd.f32 1.0, %v8669_v28  ;;  %8696 = vpow2.f32 %v6428_v11  ;;  %v10867_v51 = vadd.f32 %v10678_v56, %v8139_v60 }
 0x51a   : > { %v8673_v9 = vpop.eup %8672  ;;  %7067 = vst [vmem:[%s10057_s14 + $0x1a8] sm:$0xff] %v6963_v15   ;;  %8698 = vpow2.f32 %v6426_v1  ;;  %v5461_v10 = vsel %vm4582_vm3, %v8671_v18, %v10724_v52  ;;  %v6429_v31 = vmul.f32 -1.442695, %v10863_v62  ;;  %v4568_v26 = vpop.f32.mrf.mxu0 }
 0x51b   : > { %v8675_v37 = vpop.eup %8674  ;;  %7066 = vst [vmem:[%s10057_s14 + $0x1a0] sm:$0xff] %v6958_v34   ;;  %8700 = vpow2.f32 %v6431_v25  ;;  %v6432_v30 = vmul.f32 -1.442695, %v10867_v51  ;;  %v10878_v46 = vadd.f32 %v10678_v56, %v4568_v26  ;;  %v5459_v52 = vsel %vm4582_vm3, %v8673_v9, %v10732_v12 }
 0x51c   : > { %v8677_v48 = vpop.eup %8676  ;;  %v5083_v54 = vadd.f32 1.0, %v8675_v37  ;;  %8702 = vrcp.f32 %v5085_v32 }
 0x51d   : > { %v8679_v17 = vpop.eup %8678  ;;  %v5462_v24 = vsel %vm4582_vm3, %v8677_v48, %v10746_v4  ;;  %v6430_v41 = vmul.f32 -1.442695, %v10878_v46 }
 0x51e   : > { %v8681_v39 = vpop.eup %8680  ;;  %v6973_v57 = vpack.c.bf16 %v5462_v24, %v5461_v10  ;;  %v5460_v55 = vsel %vm4582_vm3, %v8679_v17, %v10750_v58  ;;  %8704 = vrcp.f32 %v5083_v54 }
 0x51f   : > { %v8683_v27 = vpop.eup %8682  ;;  %v6968_v4 = vpack.c.bf16 %v5460_v55, %v5459_v52  ;;  %v5086_v42 = vadd.f32 1.0, %v8681_v39  ;;  %8706 = vpow2.f32 %v6429_v31 }
 0x520   : > { %v8685_v43 = vpop.eup %8684  ;;  %7069 = vst [vmem:[%s10057_s14 + $0x1b8] sm:$0xff] %v6973_v57   ;;  %8708 = vpow2.f32 %v6432_v30  ;;  %v5465_v40 = vsel %vm4582_vm3, %v8683_v27, %v10756_v45 }
 0x521   : > { %v8687_v56 = vpop.eup %8686  ;;  %7068 = vst [vmem:[%s10057_s14 + $0x1b0] sm:$0xff] %v6968_v4   ;;  %8710 = vrcp.f32 %v5086_v42  ;;  %v5084_v3 = vadd.f32 1.0, %v8685_v43 }
 0x522   : > { %v8689_v12 = vpop.eup %8688  ;;  %8712 = vpow2.f32 %v6430_v41  ;;  %v5463_v7 = vsel %vm4582_vm3, %v8687_v56, %v10772_v16 }
 0x523   : > { %v8691_v22 = vpop.eup %8690  ;;  %8714 = vrcp.f32 %v5084_v3  ;;  %v5089_v58 = vadd.f32 1.0, %v8689_v12 }
 0x524   : > { %v8693_v61 = vpop.eup %8692  ;;  %v5466_v2 = vsel %vm4582_vm3, %v8691_v22, %v10776_v0 }
 0x525   : > { %v8695_v14 = vpop.eup %8694  ;;  %v6983_v49 = vpack.c.bf16 %v5466_v2, %v5465_v40  ;;  %v5087_v11 = vadd.f32 1.0, %v8693_v61  ;;  %8716 = vrcp.f32 %v5089_v58 }
 0x526   : > { %v8697_v44 = vpop.eup %8696  ;;  %v5464_v1 = vsel %vm4582_vm3, %v8695_v14, %v10782_v53 }
 0x527   : > { %v8699_v23 = vpop.eup %8698  ;;  %7071 = vst [vmem:[%s10057_s14 + $0x1c8] sm:$0xff] %v6983_v49   ;;  %v6978_v45 = vpack.c.bf16 %v5464_v1, %v5463_v7  ;;  %v5090_v8 = vadd.f32 1.0, %v8697_v44  ;;  %8718 = vrcp.f32 %v5087_v11 }
 0x528   : > { %v5088_v20 = vadd.f32 1.0, %v8699_v23  ;;  %v8701_v0 = vpop.eup %8700 }
 0x529   : > { %7070 = vst [vmem:[%s10057_s14 + $0x1c0] sm:$0xff] %v6978_v45   ;;  %8720 = vrcp.f32 %v5090_v8  ;;  %v8703_v59 = vpop.eup %8702  ;;  %v5093_v28 = vadd.f32 1.0, %v8701_v0 }
 0x52a   : > { %8722 = vrcp.f32 %v5088_v20  ;;  %v5469_v34 = vsel %vm4582_vm3, %v8703_v59, %v10792_v38 }
 0x52b   : > { %v8705_v63 = vpop.eup %8704  ;;  %8724 = vrcp.f32 %v5093_v28 }
 0x52c   : > { %v8707_v15 = vpop.eup %8706  ;;  %v5467_v37 = vsel %vm4582_vm3, %v8705_v63, %v10801_v13 }
 0x52d   : > { %v8709_v16 = vpop.eup %8708  ;;  %v5091_v50 = vadd.f32 1.0, %v8707_v15 }
 0x52e   : > { %v8711_v33 = vpop.eup %8710  ;;  %v5094_v53 = vadd.f32 1.0, %v8709_v16 }
 0x52f   : > { %v8713_v18 = vpop.eup %8712  ;;  %v5470_v32 = vsel %vm4582_vm3, %v8711_v33, %v10807_v19  ;;  %8726 = vrcp.f32 %v5091_v50 }
 0x530   : > { %v8715_v25 = vpop.eup %8714  ;;  %v6993_v9 = vpack.c.bf16 %v5470_v32, %v5469_v34  ;;  %8728 = vrcp.f32 %v5094_v53  ;;  %v5092_v60 = vadd.f32 1.0, %v8713_v18 }
 0x531   : > { %v5468_v48 = vsel %vm4582_vm3, %v8715_v25, %v10811_v6 }
 0x532   : > { %7073 = vst [vmem:[%s10057_s14 + $0x1d8] sm:$0xff] %v6993_v9   ;;  %v6988_v38 = vpack.c.bf16 %v5468_v48, %v5467_v37  ;;  %8730 = vrcp.f32 %v5092_v60  ;;  %v8717_v10 = vpop.eup %8716 }
 0x533   : > { %v5473_v13 = vsel %vm4582_vm3, %v8717_v10, %v10815_v21 }
 0x534   : > { %7072 = vst [vmem:[%s10057_s14 + $0x1d0] sm:$0xff] %v6988_v38   ;;  %v8719_v19 = vpop.eup %8718 }
 0x535   : > { %v5471_v6 = vsel %vm4582_vm3, %v8719_v19, %v10832_v5 }
 0x536   : > { %v8721_v54 = vpop.eup %8720 }
 0x537   : > { %v8723_v31 = vpop.eup %8722  ;;  %v5474_v26 = vsel %vm4582_vm3, %v8721_v54, %v10836_v35 }
 0x538   : > { %v7003_v17 = vpack.c.bf16 %v5474_v26, %v5473_v13  ;;  %v5472_v24 = vsel %vm4582_vm3, %v8723_v31, %v10841_v29  ;;  %v8725_v39 = vpop.eup %8724 }
 0x539   : > { %v6998_v30 = vpack.c.bf16 %v5472_v24, %v5471_v6  ;;  %v5477_v5 = vsel %vm4582_vm3, %v8725_v39, %v10852_v36 }
 0x53a   : > { %7075 = vst [vmem:[%s10057_s14 + $0x1e8] sm:$0xff] %v7003_v17  }
 0x53b   : > { %7074 = vst [vmem:[%s10057_s14 + $0x1e0] sm:$0xff] %v6998_v30  }
 0x53c   : > { %v8727_v21 = vpop.eup %8726 }
 0x53d   : > { %v8729_v52 = vpop.eup %8728  ;;  %v5475_v55 = vsel %vm4582_vm3, %v8727_v21, %v10863_v62 }
 0x53e   : > { %v5478_v35 = vsel %vm4582_vm3, %v8729_v52, %v10867_v51 }
 0x53f   : > { %v8731_v29 = vpop.eup %8730  ;;  %v7013_v57 = vpack.c.bf16 %v5478_v35, %v5477_v5 }
 0x540   : > { %v5476_v27 = vsel %vm4582_vm3, %v8731_v29, %v10878_v46 }
 0x541   : > { %7077 = vst [vmem:[%s10057_s14 + $0x1f8] sm:$0xff] %v7013_v57   ;;  %v7008_v36 = vpack.c.bf16 %v5476_v27, %v5475_v55 }
 0x543   : > { %7076 = vst [vmem:[%s10057_s14 + $0x1f0] sm:$0xff] %v7008_v36  }
 0x544   : > { %8751 = shalt.err (!%p8748_p3)
}
 0x545   : > { %s8752_s24 = scalar_lea.hbm %s10948_s13, 8192  ;;  %s8756_s12 = scalar_lea.hbm %s11007_s11, 16384 }
 0x546   : > { %p8753_p4 = scmp.ne.s32.totalorder %s10948_s13, %s8752_s24  ;;  %p8757_p9 = scmp.lt.s32.totalorder %s10948_s13, %s11007_s11 }
 0x547   : > { %p8758_p10 = scmp.lt.s32.totalorder %s8756_s12, %s8752_s24 }
 0x548   : > { %p8754_p7 = pnand %p8753_p4, %p8902_p5 }
 0x549   : > { %p8759_p11 = por %p8758_p10, %p8757_p9 }
 0x54a   : > { %p8755_p8 = pneg %p8754_p7 }
 0x54c   : > { %p8760_p12 = pnand %p8759_p11, %p8755_p8 }
 0x54e   : > { %8763 = shalt.err (!%p8760_p12)
}
 0x54f   : > { %s8802_s16 = smov 64   ;;  %s8803_s25 = smov 4  }
 0x550   : > { %8144 = dma.vmem_to_hbm [thread:$0]  (%p8902_p5), %s10950_s30, 8192, %s10948_s13, %s10956_s15, %s8802_s16, %s8802_s16, %s8803_s25  }
 0x551 PF: > { %p8150_p13 = scmp.ge.s32.totalorder %s8798_s20, 2  ;;  %s6148_s29 = sand.u32 1, %s8786_s17  }
 0x552   : > { %s6149_s0 = scalar_lea.sflag [#allocation3], %s6148_s29 }
 0x553   : > { %p8147_p0 = pnand %p8150_p13, %p8906_p6 }
 0x555   : > { %p8148_p1 = pneg %p8147_p0 }
 0x557   : > { %8781 = dma.done.wait (%p8148_p1), %s6149_s0, 8192  }
 0x558   : > { %8783 = vsyncadd (%p8148_p1), %s6149_s0, 4294959104  ;;  %p21_p2 = scmp.ge.s32.totalorder %s8889_s23, 4   ;;  %s11012_s17 = smov %s8790_s18 }
 0x559   : > { %s11013_s18 = smov %s8794_s19  ;;  %s11014_s19 = smov %s8900_s26 }
 0x55a   : > { %s11015_s20 = smov %s8889_s23  ;;  %23 = sbr.rel (!%p21_p2) target bundleno = 5 (0x5), region = 99 }
 0x55f   :  { %6154 = vsyncpa [#allocation3], 1 }
 0x560   :  { %6156 = vsyncpa [#allocation3 + $0x1], 1 }

</bundles_post_ra>
